<compile_context>
chip_gen: v7x
topology: tpu7x:2x2x1
jax: 0.10.0
libtpu: 0.0.40
codegen_flags: <defaults>
</compile_context>

<pallas_src>
import math

import jax
import jax.numpy as jnp
from jax.experimental import pallas as pl
from jax.experimental.pallas import tpu as pltpu

# ---------------- synthetic (small) MaskCLIP config -----------------
B = 2                      # batch
Q = 8                      # number of mask queries (num_mask_tokens)
IMG = 32                   # clip.visual.image_size
PATCH = 8                  # conv1 kernel == stride (patch size)
GRID = IMG // PATCH        # 4
NPATCH = GRID * GRID       # 16 image tokens
PDIM = 3 * PATCH * PATCH   # 192 (im2col patch vector length)
WIDTH = 128                # conv1.out_channels (transformer width)
HEADS = WIDTH // 64        # num_heads = out_channels // 64  -> 2
HEAD_DIM = WIDTH // HEADS  # 64
LAYERS = 2                 # transformer depth
MLP = 4 * WIDTH            # 512
OUT_DIM = 64               # visual.proj output dim (text/image latent dim)
NTEXT = 4                  # number of text labels (one synonym each)
NTEXT_PAD = 8              # padded text rows (sublane friendly)
SEQ = Q + NPATCH + 1       # mask tokens + CLS + image tokens = 25
SEQ_PAD = 32               # padded sequence length (multiple of 8)

CLIP_MEAN = (0.48145466, 0.4578275, 0.40821073)
CLIP_STD = (0.26862954, 0.26130258, 0.27577711)
LN_EPS = 1e-5


# ============================ fused Pallas kernel ============================

def _layer_norm(x, g, b):
    mu = jnp.mean(x, axis=-1, keepdims=True)
    var = jnp.mean((x - mu) ** 2, axis=-1, keepdims=True)
    return (x - mu) * jax.lax.rsqrt(var + LN_EPS) * g + b


def _maskclip_kernel(
    # per-batch inputs
    patches_ref, bias_ref,
    # shared weights (stacked over layers where applicable)
    conv1_w_ref, cls_pos_ref, patch_pos_ref,
    ln_pre_g_ref, ln_pre_b_ref,
    ln1_g_ref, ln1_b_ref, w_qkv_ref, b_qkv_ref, w_o_ref, b_o_ref,
    ln2_g_ref, ln2_b_ref, w_fc_ref, b_fc_ref, w_proj_ref, b_proj_ref,
    ln_post_g_ref, ln_post_b_ref, proj_ref, text_ref, scale_ref,
    # outputs
    me_ref, logits_ref,
    # scratch
    x_ref,
):
    f32, bf16 = jnp.float32, jnp.bfloat16

    # ---- conv1 (patch embed as matmul) + positional embedding ----
    tok = jnp.dot(patches_ref[0].astype(bf16), conv1_w_ref[...],
                  preferred_element_type=f32) + patch_pos_ref[...]   # (NPATCH, W)

    # token matrix: [Q mask tokens (CLS copies), CLS, image tokens, zero pad]
    # Pad rows must stay finite every step: their K columns feed the row max
    # inside softmax (contribution is then masked by the -1e30 bias).
    x_ref[0:Q + 1, :] = jnp.broadcast_to(cls_pos_ref[...], (Q + 1, WIDTH))
    x_ref[Q + 1:SEQ, :] = tok
    x_ref[SEQ:, :] = jnp.zeros((SEQ_PAD - SEQ, WIDTH), f32)

    # ln_pre over the whole assembled matrix in one shot (LN is row-wise, so
    # this equals applying it per-token before assembly as PyTorch does).
    x = _layer_norm(x_ref[...], ln_pre_g_ref[...], ln_pre_b_ref[...])

    bias = bias_ref[0]                                            # (S_PAD, S_PAD)
    scale = 1.0 / math.sqrt(HEAD_DIM)

    # ---- residual attention blocks, fully VMEM/vreg-resident ----
    for l in range(LAYERS):
        # -- masked multi-head self-attention --
        h = _layer_norm(x, ln1_g_ref[l], ln1_b_ref[l])
        qkv = jnp.dot(h.astype(bf16), w_qkv_ref[l],
                      preferred_element_type=f32) + b_qkv_ref[l]  # (S, 3W)
        head_out = []
        for hd in range(HEADS):                     # HEADS == 2, fully unrolled
            off = hd * HEAD_DIM
            qh = qkv[:, off:off + HEAD_DIM]
            kh = qkv[:, WIDTH + off:WIDTH + off + HEAD_DIM]
            vh = qkv[:, 2 * WIDTH + off:2 * WIDTH + off + HEAD_DIM]
            s = jax.lax.dot_general(
                qh.astype(bf16), kh.astype(bf16),
                (((1,), (1,)), ((), ())),
                preferred_element_type=f32) * scale + bias
            s = s - jnp.max(s, axis=-1, keepdims=True)
            p = jnp.exp(s)                                        # f32 softmax
            p = p * pl.reciprocal(jnp.sum(p, axis=-1, keepdims=True),
                                  approx=True)                    # EUP divide
            head_out.append(jnp.dot(p.astype(bf16), vh.astype(bf16),
                                    preferred_element_type=f32))
        o = jnp.concatenate(head_out, axis=-1)                    # (S, W)
        x = x + jnp.dot(o.astype(bf16), w_o_ref[l],
                        preferred_element_type=f32) + b_o_ref[l]

        # -- MLP with QuickGELU --
        h = _layer_norm(x, ln2_g_ref[l], ln2_b_ref[l])
        h = jnp.dot(h.astype(bf16), w_fc_ref[l],
                    preferred_element_type=f32) + b_fc_ref[l]     # (S, MLP)
        h = h * jax.nn.sigmoid(1.702 * h)                         # f32 QuickGELU
        x = x + jnp.dot(h.astype(bf16), w_proj_ref[l],
                        preferred_element_type=f32) + b_proj_ref[l]

    # ---- ln_post + visual projection on the Q mask tokens ----
    mt = _layer_norm(x[0:Q, :], ln_post_g_ref[...], ln_post_b_ref[...])
    me = jnp.dot(mt, proj_ref[...], preferred_element_type=f32)   # (Q, OUT_DIM)
    me_ref[0] = me

    # ---- pred_logits: cosine similarity vs pre-normalized text embeds ----
    inv_norm = 1.0 / jnp.maximum(
        jnp.sqrt(jnp.sum(me * me, axis=-1, keepdims=True)), 1e-12)
    logits_ref[0] = jax.lax.dot_general(
        me * inv_norm, text_ref[...], (((1,), (1,)), ((), ())),
        preferred_element_type=f32) * scale_ref[0, 0]


# ============================ parameters ============================

def init_params(key):
    def nrm(k, shape, scale=0.02):
        return scale * jax.random.normal(k, shape, jnp.float32)

    keys = iter(jax.random.split(key, 32))
    return {
        # conv1 weight (WIDTH, 3, P, P) stored pre-flattened as (3*P*P, WIDTH)
        # with (c, kh, kw) ordering so that patch_vec @ W == conv1(image).
        "conv1_w": nrm(next(keys), (PDIM, WIDTH)),
        "class_embedding": nrm(next(keys), (WIDTH,)),
        "positional_embedding": nrm(next(keys), (NPATCH + 1, WIDTH)),
        "ln_pre_g": jnp.ones((1, WIDTH), jnp.float32),
        "ln_pre_b": jnp.zeros((1, WIDTH), jnp.float32),
        "ln_post_g": jnp.ones((1, WIDTH), jnp.float32),
        "ln_post_b": jnp.zeros((1, WIDTH), jnp.float32),
        "proj": nrm(next(keys), (WIDTH, OUT_DIM)),
        "logit_scale": jnp.array(math.log(1.0 / 0.07), jnp.float32),
        # per-layer weights stacked along a leading LAYERS axis
        "ln1_g": jnp.ones((LAYERS, 1, WIDTH), jnp.float32),
        "ln1_b": jnp.zeros((LAYERS, 1, WIDTH), jnp.float32),
        "ln2_g": jnp.ones((LAYERS, 1, WIDTH), jnp.float32),
        "ln2_b": jnp.zeros((LAYERS, 1, WIDTH), jnp.float32),
        "w_qkv": nrm(next(keys), (LAYERS, WIDTH, 3 * WIDTH)),
        "b_qkv": nrm(next(keys), (LAYERS, 1, 3 * WIDTH), 0.01),
        "w_o": nrm(next(keys), (LAYERS, WIDTH, WIDTH)),
        "b_o": nrm(next(keys), (LAYERS, 1, WIDTH), 0.01),
        "w_fc": nrm(next(keys), (LAYERS, WIDTH, MLP)),
        "b_fc": nrm(next(keys), (LAYERS, 1, MLP), 0.01),
        "w_proj": nrm(next(keys), (LAYERS, MLP, WIDTH)),
        "b_proj": nrm(next(keys), (LAYERS, 1, WIDTH), 0.01),
    }


# ============================ forward pass ============================

@jax.jit
def mask_clip_forward(params, image, mask, text_embed):
    b = image.shape[0]
    n_text = text_embed.shape[0]

    # ---- get_mask_embed: bilinear resize to CLIP input size (glue) ----
    image = jax.image.resize(image, (b, 3, IMG, IMG), method="bilinear")
    mask = jax.image.resize(mask, (b, Q, IMG, IMG), method="bilinear")

    # ---- clip_preprocess: Resize/CenterCrop are no-ops at IMG; Normalize ----
    mean = jnp.asarray(CLIP_MEAN, jnp.float32).reshape(1, 3, 1, 1)
    std = jnp.asarray(CLIP_STD, jnp.float32).reshape(1, 3, 1, 1)
    x_img = (image - mean) / std

    # ---- encode_image_with_mask: sigmoid + max_pool2d(P) + attn mask ----
    m = jax.nn.sigmoid(mask).reshape(b, Q, GRID, PATCH, GRID, PATCH)
    patch_mask = m.max(axis=(3, 5)).reshape(b, Q, NPATCH)
    blocked = patch_mask < 0.5                       # True = blocked

    base = jnp.zeros((SEQ_PAD, SEQ_PAD), bool)
    base = base.at[:, :Q].set(True)                  # nobody attends to mask toks
    base = base.at[:, SEQ:].set(True)                # nobody attends to padding
    attn = jnp.broadcast_to(base, (b, SEQ_PAD, SEQ_PAD))
    attn = attn.at[:, :Q, Q + 1:SEQ].set(blocked)    # mask rows vs image patches
    attn_bias = jnp.where(attn, -1e30, 0.0).astype(jnp.float32)  # finite: no NaN

    # ---- im2col for conv1 (layout glue only) ----
    patches = x_img.reshape(b, 3, GRID, PATCH, GRID, PATCH)
    patches = patches.transpose(0, 2, 4, 1, 3, 5).reshape(b, NPATCH, PDIM)

    # ---- hoisted small precompute (done once per call in XLA) ----
    cls_pos = (params["class_embedding"][None, :]
               + params["positional_embedding"][0:1])
    patch_pos = params["positional_embedding"][1:]
    logit_scale = jnp.minimum(jnp.exp(params["logit_scale"]), 100.0)
    text_n = text_embed / jnp.maximum(
        jnp.sqrt(jnp.sum(text_embed * text_embed, axis=-1, keepdims=True)),
        1e-12)
    text_pad = jnp.zeros((NTEXT_PAD, OUT_DIM), jnp.float32).at[:n_text].set(text_n)

    # bf16 matmul operands (f32 accumulation inside the kernel)
    bf = lambda a: a.astype(jnp.bfloat16)
    conv1_w = bf(params["conv1_w"])
    w_qkv, w_o = bf(params["w_qkv"]), bf(params["w_o"])
    w_fc, w_proj = bf(params["w_fc"]), bf(params["w_proj"])

    def _per_batch(*tail):
        return pl.BlockSpec((1,) + tail, lambda i: (i,) + (0,) * len(tail))

    def _shared(arr):
        nd = arr.ndim
        return pl.BlockSpec(arr.shape, lambda i, _n=nd: (0,) * _n)

    mask_embed, logits_pad = pl.pallas_call(
        _maskclip_kernel,
        grid=(b,),
        out_shape=(jax.ShapeDtypeStruct((b, Q, OUT_DIM), jnp.float32),
                   jax.ShapeDtypeStruct((b, Q, NTEXT_PAD), jnp.float32)),
        in_specs=[
            _per_batch(NPATCH, PDIM),                  # patches
            _per_batch(SEQ_PAD, SEQ_PAD),              # additive attention bias
            _shared(conv1_w), _shared(cls_pos), _shared(patch_pos),
            _shared(params["ln_pre_g"]), _shared(params["ln_pre_b"]),
            _shared(params["ln1_g"]), _shared(params["ln1_b"]),
            _shared(w_qkv), _shared(params["b_qkv"]),
            _shared(w_o), _shared(params["b_o"]),
            _shared(params["ln2_g"]), _shared(params["ln2_b"]),
            _shared(w_fc), _shared(params["b_fc"]),
            _shared(w_proj), _shared(params["b_proj"]),
            _shared(params["ln_post_g"]), _shared(params["ln_post_b"]),
            _shared(params["proj"]), _shared(text_pad),
            pl.BlockSpec(memory_space=pltpu.MemorySpace.SMEM),   # logit scale
        ],
        out_specs=(_per_batch(Q, OUT_DIM), _per_batch(Q, NTEXT_PAD)),
        scratch_shapes=[pltpu.VMEM((SEQ_PAD, WIDTH), jnp.float32)],
        compiler_params=pltpu.CompilerParams(
            dimension_semantics=("parallel",)),
    )(
        patches, attn_bias,
        conv1_w, cls_pos, patch_pos,
        params["ln_pre_g"], params["ln_pre_b"],
        params["ln1_g"], params["ln1_b"],
        w_qkv, params["b_qkv"],
        w_o, params["b_o"],
        params["ln2_g"], params["ln2_b"],
        w_fc, params["b_fc"],
        w_proj, params["b_proj"],
        params["ln_post_g"], params["ln_post_b"],
        params["proj"], text_pad,
        logit_scale.reshape(1, 1),
    )

    logits = logits_pad[:, :, :n_text]
    # TODO(synk): ensemble_logits_with_labels source not provided; with one
    # synonym per label it is the identity, so logits are returned as-is.
    return {"mask_embed": mask_embed, "mask_pred_open_logits": logits}


# ============================ main ============================

if __name__ == "__main__":
    key = jax.random.PRNGKey(0)
    k_img, k_mask, k_text, k_par = jax.random.split(key, 4)

    image = jax.random.uniform(k_img, (B, 3, 40, 40), jnp.float32)    # pixels [0,1]
    mask = jax.random.normal(k_mask, (B, Q, 40, 40), jnp.float32)     # mask logits
    text_embed = jax.random.normal(k_text, (NTEXT, OUT_DIM), jnp.float32)
    params = init_params(k_par)

    out = mask_clip_forward(params, image, mask, text_embed)
    out = jax.block_until_ready(out)

    assert out["mask_embed"].shape == (B, Q, OUT_DIM)
    assert out["mask_pred_open_logits"].shape == (B, Q, NTEXT)
    assert bool(jnp.all(jnp.isfinite(out["mask_embed"])))
    assert bool(jnp.all(jnp.isfinite(out["mask_pred_open_logits"])))
    print("KERNEL_OK")
</pallas_src>

<mosaic_0001>
module attributes {stable_mosaic.version = 11 : i64} {
  func.func @_maskclip_kernel(%arg0: i32, %arg1: memref<1x16x192xf32, #tpu.memory_space<vmem>>, %arg2: memref<1x32x32xf32, #tpu.memory_space<vmem>>, %arg3: memref<192x128xbf16, #tpu.memory_space<vmem>>, %arg4: memref<1x128xf32, #tpu.memory_space<vmem>>, %arg5: memref<16x128xf32, #tpu.memory_space<vmem>>, %arg6: memref<1x128xf32, #tpu.memory_space<vmem>>, %arg7: memref<1x128xf32, #tpu.memory_space<vmem>>, %arg8: memref<2x1x128xf32, #tpu.memory_space<vmem>>, %arg9: memref<2x1x128xf32, #tpu.memory_space<vmem>>, %arg10: memref<2x128x384xbf16, #tpu.memory_space<vmem>>, %arg11: memref<2x1x384xf32, #tpu.memory_space<vmem>>, %arg12: memref<2x128x128xbf16, #tpu.memory_space<vmem>>, %arg13: memref<2x1x128xf32, #tpu.memory_space<vmem>>, %arg14: memref<2x1x128xf32, #tpu.memory_space<vmem>>, %arg15: memref<2x1x128xf32, #tpu.memory_space<vmem>>, %arg16: memref<2x128x512xbf16, #tpu.memory_space<vmem>>, %arg17: memref<2x1x512xf32, #tpu.memory_space<vmem>>, %arg18: memref<2x512x128xbf16, #tpu.memory_space<vmem>>, %arg19: memref<2x1x128xf32, #tpu.memory_space<vmem>>, %arg20: memref<1x128xf32, #tpu.memory_space<vmem>>, %arg21: memref<1x128xf32, #tpu.memory_space<vmem>>, %arg22: memref<128x64xf32, #tpu.memory_space<vmem>>, %arg23: memref<8x64xf32, #tpu.memory_space<vmem>>, %arg24: memref<1x1xf32, #tpu.memory_space<smem>>, %arg25: memref<1x8x64xf32, #tpu.memory_space<vmem>>, %arg26: memref<1x8x8xf32, #tpu.memory_space<vmem>>, %arg27: memref<32x128xf32, #tpu.memory_space<vmem>>) attributes {dimension_semantics = [#tpu.dimension_semantics<parallel>], iteration_bounds = array<i64: 2>, scalar_prefetch = 0 : i64, scratch_operands = 1 : i64, tpu.core_type = #tpu.core_type<tc>, window_params = [{transform_indices = @transform_0, window_bounds = array<i64: 1, 16, 192>}, {transform_indices = @transform_1, window_bounds = array<i64: 1, 32, 32>}, {pipeline_mode = #tpu.pipeline_mode<synchronous>, transform_indices = @transform_2, window_bounds = array<i64: 192, 128>}, {pipeline_mode = #tpu.pipeline_mode<synchronous>, transform_indices = @transform_3, window_bounds = array<i64: 1, 128>}, {pipeline_mode = #tpu.pipeline_mode<synchronous>, transform_indices = @transform_4, window_bounds = array<i64: 16, 128>}, {pipeline_mode = #tpu.pipeline_mode<synchronous>, transform_indices = @transform_5, window_bounds = array<i64: 1, 128>}, {pipeline_mode = #tpu.pipeline_mode<synchronous>, transform_indices = @transform_6, window_bounds = array<i64: 1, 128>}, {pipeline_mode = #tpu.pipeline_mode<synchronous>, transform_indices = @transform_7, window_bounds = array<i64: 2, 1, 128>}, {pipeline_mode = #tpu.pipeline_mode<synchronous>, transform_indices = @transform_8, window_bounds = array<i64: 2, 1, 128>}, {pipeline_mode = #tpu.pipeline_mode<synchronous>, transform_indices = @transform_9, window_bounds = array<i64: 2, 128, 384>}, {pipeline_mode = #tpu.pipeline_mode<synchronous>, transform_indices = @transform_10, window_bounds = array<i64: 2, 1, 384>}, {pipeline_mode = #tpu.pipeline_mode<synchronous>, transform_indices = @transform_11, window_bounds = array<i64: 2, 128, 128>}, {pipeline_mode = #tpu.pipeline_mode<synchronous>, transform_indices = @transform_12, window_bounds = array<i64: 2, 1, 128>}, {pipeline_mode = #tpu.pipeline_mode<synchronous>, transform_indices = @transform_13, window_bounds = array<i64: 2, 1, 128>}, {pipeline_mode = #tpu.pipeline_mode<synchronous>, transform_indices = @transform_14, window_bounds = array<i64: 2, 1, 128>}, {pipeline_mode = #tpu.pipeline_mode<synchronous>, transform_indices = @transform_15, window_bounds = array<i64: 2, 128, 512>}, {pipeline_mode = #tpu.pipeline_mode<synchronous>, transform_indices = @transform_16, window_bounds = array<i64: 2, 1, 512>}, {pipeline_mode = #tpu.pipeline_mode<synchronous>, transform_indices = @transform_17, window_bounds = array<i64: 2, 512, 128>}, {pipeline_mode = #tpu.pipeline_mode<synchronous>, transform_indices = @transform_18, window_bounds = array<i64: 2, 1, 128>}, {pipeline_mode = #tpu.pipeline_mode<synchronous>, transform_indices = @transform_19, window_bounds = array<i64: 1, 128>}, {pipeline_mode = #tpu.pipeline_mode<synchronous>, transform_indices = @transform_20, window_bounds = array<i64: 1, 128>}, {pipeline_mode = #tpu.pipeline_mode<synchronous>, transform_indices = @transform_21, window_bounds = array<i64: 128, 64>}, {pipeline_mode = #tpu.pipeline_mode<synchronous>, transform_indices = @transform_22, window_bounds = array<i64: 8, 64>}, {transform_indices = @transform_23, window_bounds = array<i64: 1, 1>}, {transform_indices = @transform_24, window_bounds = array<i64: 1, 8, 64>}, {transform_indices = @transform_25, window_bounds = array<i64: 1, 8, 8>}]} {
    %c0 = arith.constant 0 : index
    %c0_0 = arith.constant 0 : index
    %c0_1 = arith.constant 0 : index
    %0 = vector.load %arg1[%c0, %c0_0, %c0_1] : memref<1x16x192xf32, #tpu.memory_space<vmem>>, vector<1x16x192xf32>
    %1 = vector.shape_cast %0 : vector<1x16x192xf32> to vector<16x192xf32>
    %2 = arith.truncf %1 : vector<16x192xf32> to vector<16x192xbf16>
    %c0_2 = arith.constant 0 : index
    %c0_3 = arith.constant 0 : index
    %3 = vector.load %arg3[%c0_2, %c0_3] : memref<192x128xbf16, #tpu.memory_space<vmem>>, vector<192x128xbf16>
    %cst = arith.constant dense<0.000000e+00> : vector<16x128xf32>
    %4 = tpu.matmul %2, %3, %cst {dimension_numbers = #tpu.dot_dimension_numbers<[1], [0], [0], [1], [0, 0, 1, 1], [], []>} : vector<16x192xbf16>, vector<192x128xbf16>, vector<16x128xf32> -> vector<16x128xf32>
    %c0_4 = arith.constant 0 : index
    %c0_5 = arith.constant 0 : index
    %5 = vector.load %arg5[%c0_4, %c0_5] : memref<16x128xf32, #tpu.memory_space<vmem>>, vector<16x128xf32>
    %6 = arith.addf %4, %5 : vector<16x128xf32>
    %c0_6 = arith.constant 0 : index
    %c0_7 = arith.constant 0 : index
    %7 = vector.load %arg4[%c0_6, %c0_7] : memref<1x128xf32, #tpu.memory_space<vmem>>, vector<1x128xf32>
    %8 = vector.shape_cast %7 : vector<1x128xf32> to vector<1x128xf32>
    %9 = vector.broadcast %8 : vector<1x128xf32> to vector<9x128xf32>
    %c0_8 = arith.constant 0 : index
    %c0_9 = arith.constant 0 : index
    %10 = vector.load %arg27[%c0_8, %c0_9] : memref<32x128xf32, #tpu.memory_space<vmem>>, vector<9x128xf32>
    tpu.vector_store %arg27[%c0_8, %c0_9], %9 {strides = array<i32>} : memref<32x128xf32, #tpu.memory_space<vmem>>, vector<9x128xf32>,
    %c9 = arith.constant 9 : index
    %c0_10 = arith.constant 0 : index
    %11 = vector.load %arg27[%c9, %c0_10] : memref<32x128xf32, #tpu.memory_space<vmem>>, vector<16x128xf32>
    tpu.vector_store %arg27[%c9, %c0_10], %6 {strides = array<i32>} : memref<32x128xf32, #tpu.memory_space<vmem>>, vector<16x128xf32>,
    %cst_11 = arith.constant 0.000000e+00 : f32
    %12 = vector.broadcast %cst_11 : f32 to vector<7x128xf32>
    %c25 = arith.constant 25 : index
    %c0_12 = arith.constant 0 : index
    %13 = vector.load %arg27[%c25, %c0_12] : memref<32x128xf32, #tpu.memory_space<vmem>>, vector<7x128xf32>
    tpu.vector_store %arg27[%c25, %c0_12], %12 {strides = array<i32>} : memref<32x128xf32, #tpu.memory_space<vmem>>, vector<7x128xf32>,
    %c0_13 = arith.constant 0 : index
    %c0_14 = arith.constant 0 : index
    %14 = vector.load %arg27[%c0_13, %c0_14] : memref<32x128xf32, #tpu.memory_space<vmem>>, vector<32x128xf32>
    %c0_15 = arith.constant 0 : index
    %c0_16 = arith.constant 0 : index
    %15 = vector.load %arg6[%c0_15, %c0_16] : memref<1x128xf32, #tpu.memory_space<vmem>>, vector<1x128xf32>
    %c0_17 = arith.constant 0 : index
    %c0_18 = arith.constant 0 : index
    %16 = vector.load %arg7[%c0_17, %c0_18] : memref<1x128xf32, #tpu.memory_space<vmem>>, vector<1x128xf32>
    %cst_19 = arith.constant dense<0.000000e+00> : vector<32xf32>
    %17 = vector.multi_reduction <add>, %14, %cst_19 [1] : vector<32x128xf32> to vector<32xf32>
    %18 = vector.shape_cast %17 : vector<32xf32> to vector<32x1xf32>
    %cst_20 = arith.constant 1.280000e+02 : f32
    %19 = vector.broadcast %cst_20 : f32 to vector<32x1xf32>
    %20 = arith.divf %18, %19 : vector<32x1xf32>
    %21 = vector.broadcast %20 : vector<32x1xf32> to vector<32x128xf32>
    %22 = arith.subf %14, %21 : vector<32x128xf32>
    %23 = arith.mulf %22, %22 : vector<32x128xf32>
    %cst_21 = arith.constant dense<0.000000e+00> : vector<32xf32>
    %24 = vector.multi_reduction <add>, %23, %cst_21 [1] : vector<32x128xf32> to vector<32xf32>
    %25 = vector.shape_cast %24 : vector<32xf32> to vector<32x1xf32>
    %cst_22 = arith.constant 1.280000e+02 : f32
    %26 = vector.broadcast %cst_22 : f32 to vector<32x1xf32>
    %27 = arith.divf %25, %26 : vector<32x1xf32>
    %28 = vector.broadcast %20 : vector<32x1xf32> to vector<32x128xf32>
    %29 = arith.subf %14, %28 : vector<32x128xf32>
    %cst_23 = arith.constant 9.99999974E-6 : f32
    %30 = vector.broadcast %cst_23 : f32 to vector<32x1xf32>
    %31 = arith.addf %27, %30 : vector<32x1xf32>
    %32 = math.rsqrt %31 : vector<32x1xf32>
    %33 = vector.broadcast %32 : vector<32x1xf32> to vector<32x128xf32>
    %34 = arith.mulf %29, %33 : vector<32x128xf32>
    %35 = vector.broadcast %15 : vector<1x128xf32> to vector<32x128xf32>
    %36 = arith.mulf %34, %35 : vector<32x128xf32>
    %37 = vector.broadcast %16 : vector<1x128xf32> to vector<32x128xf32>
    %38 = arith.addf %36, %37 : vector<32x128xf32>
    %c0_24 = arith.constant 0 : index
    %c0_25 = arith.constant 0 : index
    %c0_26 = arith.constant 0 : index
    %39 = vector.load %arg2[%c0_24, %c0_25, %c0_26] : memref<1x32x32xf32, #tpu.memory_space<vmem>>, vector<1x32x32xf32>
    %40 = vector.shape_cast %39 : vector<1x32x32xf32> to vector<32x32xf32>
    %c0_27 = arith.constant 0 : index
    %c0_28 = arith.constant 0 : index
    %c0_29 = arith.constant 0 : index
    %41 = vector.load %arg8[%c0_27, %c0_28, %c0_29] : memref<2x1x128xf32, #tpu.memory_space<vmem>>, vector<1x1x128xf32>
    %42 = vector.shape_cast %41 : vector<1x1x128xf32> to vector<1x128xf32>
    %c0_30 = arith.constant 0 : index
    %c0_31 = arith.constant 0 : index
    %c0_32 = arith.constant 0 : index
    %43 = vector.load %arg9[%c0_30, %c0_31, %c0_32] : memref<2x1x128xf32, #tpu.memory_space<vmem>>, vector<1x1x128xf32>
    %44 = vector.shape_cast %43 : vector<1x1x128xf32> to vector<1x128xf32>
    %cst_33 = arith.constant dense<0.000000e+00> : vector<32xf32>
    %45 = vector.multi_reduction <add>, %38, %cst_33 [1] : vector<32x128xf32> to vector<32xf32>
    %46 = vector.shape_cast %45 : vector<32xf32> to vector<32x1xf32>
    %cst_34 = arith.constant 1.280000e+02 : f32
    %47 = vector.broadcast %cst_34 : f32 to vector<32x1xf32>
    %48 = arith.divf %46, %47 : vector<32x1xf32>
    %49 = vector.broadcast %48 : vector<32x1xf32> to vector<32x128xf32>
    %50 = arith.subf %38, %49 : vector<32x128xf32>
    %51 = arith.mulf %50, %50 : vector<32x128xf32>
    %cst_35 = arith.constant dense<0.000000e+00> : vector<32xf32>
    %52 = vector.multi_reduction <add>, %51, %cst_35 [1] : vector<32x128xf32> to vector<32xf32>
    %53 = vector.shape_cast %52 : vector<32xf32> to vector<32x1xf32>
    %cst_36 = arith.constant 1.280000e+02 : f32
    %54 = vector.broadcast %cst_36 : f32 to vector<32x1xf32>
    %55 = arith.divf %53, %54 : vector<32x1xf32>
    %56 = vector.broadcast %48 : vector<32x1xf32> to vector<32x128xf32>
    %57 = arith.subf %38, %56 : vector<32x128xf32>
    %cst_37 = arith.constant 9.99999974E-6 : f32
    %58 = vector.broadcast %cst_37 : f32 to vector<32x1xf32>
    %59 = arith.addf %55, %58 : vector<32x1xf32>
    %60 = math.rsqrt %59 : vector<32x1xf32>
    %61 = vector.broadcast %60 : vector<32x1xf32> to vector<32x128xf32>
    %62 = arith.mulf %57, %61 : vector<32x128xf32>
    %63 = vector.broadcast %42 : vector<1x128xf32> to vector<32x128xf32>
    %64 = arith.mulf %62, %63 : vector<32x128xf32>
    %65 = vector.broadcast %44 : vector<1x128xf32> to vector<32x128xf32>
    %66 = arith.addf %64, %65 : vector<32x128xf32>
    %67 = arith.truncf %66 : vector<32x128xf32> to vector<32x128xbf16>
    %c0_38 = arith.constant 0 : index
    %c0_39 = arith.constant 0 : index
    %c0_40 = arith.constant 0 : index
    %68 = vector.load %arg10[%c0_38, %c0_39, %c0_40] : memref<2x128x384xbf16, #tpu.memory_space<vmem>>, vector<1x128x384xbf16>
    %69 = vector.shape_cast %68 : vector<1x128x384xbf16> to vector<128x384xbf16>
    %cst_41 = arith.constant dense<0.000000e+00> : vector<32x384xf32>
    %70 = tpu.matmul %67, %69, %cst_41 {dimension_numbers = #tpu.dot_dimension_numbers<[1], [0], [0], [1], [0, 0, 1, 1], [], []>} : vector<32x128xbf16>, vector<128x384xbf16>, vector<32x384xf32> -> vector<32x384xf32>
    %c0_42 = arith.constant 0 : index
    %c0_43 = arith.constant 0 : index
    %c0_44 = arith.constant 0 : index
    %71 = vector.load %arg11[%c0_42, %c0_43, %c0_44] : memref<2x1x384xf32, #tpu.memory_space<vmem>>, vector<1x1x384xf32>
    %72 = vector.shape_cast %71 : vector<1x1x384xf32> to vector<1x384xf32>
    %73 = vector.broadcast %72 : vector<1x384xf32> to vector<32x384xf32>
    %74 = arith.addf %70, %73 : vector<32x384xf32>
    %75 = vector.extract_strided_slice %74 {offsets = [0, 0], sizes = [32, 64], strides = [1, 1]} : vector<32x384xf32> to vector<32x64xf32>
    %76 = vector.extract_strided_slice %74 {offsets = [0, 128], sizes = [32, 64], strides = [1, 1]} : vector<32x384xf32> to vector<32x64xf32>
    %77 = vector.extract_strided_slice %74 {offsets = [0, 256], sizes = [32, 64], strides = [1, 1]} : vector<32x384xf32> to vector<32x64xf32>
    %78 = arith.truncf %75 : vector<32x64xf32> to vector<32x64xbf16>
    %79 = arith.truncf %76 : vector<32x64xf32> to vector<32x64xbf16>
    %cst_45 = arith.constant dense<0.000000e+00> : vector<32x32xf32>
    %80 = tpu.matmul %78, %79, %cst_45 {dimension_numbers = #tpu.dot_dimension_numbers<[1], [1], [0], [0], [0, 0, 1, 0], [], []>} : vector<32x64xbf16>, vector<32x64xbf16>, vector<32x32xf32> -> vector<32x32xf32>
    %cst_46 = arith.constant 1.250000e-01 : f32
    %81 = vector.broadcast %cst_46 : f32 to vector<32x32xf32>
    %82 = arith.mulf %80, %81 : vector<32x32xf32>
    %83 = arith.addf %82, %40 : vector<32x32xf32>
    %cst_47 = arith.constant dense<0xFF800000> : vector<32xf32>
    %84 = vector.multi_reduction <maximumf>, %83, %cst_47 [1] : vector<32x32xf32> to vector<32xf32>
    %85 = vector.shape_cast %84 : vector<32xf32> to vector<32x1xf32>
    %86 = vector.broadcast %85 : vector<32x1xf32> to vector<32x32xf32>
    %87 = arith.subf %83, %86 : vector<32x32xf32>
    %88 = math.exp %87 : vector<32x32xf32>
    %cst_48 = arith.constant dense<0.000000e+00> : vector<32xf32>
    %89 = vector.multi_reduction <add>, %88, %cst_48 [1] : vector<32x32xf32> to vector<32xf32>
    %90 = vector.shape_cast %89 : vector<32xf32> to vector<32x1xf32>
    %91 = tpu.reciprocal %90 {approx = true} : vector<32x1xf32> -> vector<32x1xf32>
    %92 = vector.broadcast %91 : vector<32x1xf32> to vector<32x32xf32>
    %93 = arith.mulf %88, %92 : vector<32x32xf32>
    %94 = arith.truncf %93 : vector<32x32xf32> to vector<32x32xbf16>
    %95 = arith.truncf %77 : vector<32x64xf32> to vector<32x64xbf16>
    %cst_49 = arith.constant dense<0.000000e+00> : vector<32x64xf32>
    %96 = tpu.matmul %94, %95, %cst_49 {dimension_numbers = #tpu.dot_dimension_numbers<[1], [0], [0], [1], [0, 0, 1, 1], [], []>} : vector<32x32xbf16>, vector<32x64xbf16>, vector<32x64xf32> -> vector<32x64xf32>
    %97 = vector.extract_strided_slice %74 {offsets = [0, 64], sizes = [32, 64], strides = [1, 1]} : vector<32x384xf32> to vector<32x64xf32>
    %98 = vector.extract_strided_slice %74 {offsets = [0, 192], sizes = [32, 64], strides = [1, 1]} : vector<32x384xf32> to vector<32x64xf32>
    %99 = vector.extract_strided_slice %74 {offsets = [0, 320], sizes = [32, 64], strides = [1, 1]} : vector<32x384xf32> to vector<32x64xf32>
    %100 = arith.truncf %97 : vector<32x64xf32> to vector<32x64xbf16>
    %101 = arith.truncf %98 : vector<32x64xf32> to vector<32x64xbf16>
    %cst_50 = arith.constant dense<0.000000e+00> : vector<32x32xf32>
    %102 = tpu.matmul %100, %101, %cst_50 {dimension_numbers = #tpu.dot_dimension_numbers<[1], [1], [0], [0], [0, 0, 1, 0], [], []>} : vector<32x64xbf16>, vector<32x64xbf16>, vector<32x32xf32> -> vector<32x32xf32>
    %cst_51 = arith.constant 1.250000e-01 : f32
    %103 = vector.broadcast %cst_51 : f32 to vector<32x32xf32>
    %104 = arith.mulf %102, %103 : vector<32x32xf32>
    %105 = arith.addf %104, %40 : vector<32x32xf32>
    %cst_52 = arith.constant dense<0xFF800000> : vector<32xf32>
    %106 = vector.multi_reduction <maximumf>, %105, %cst_52 [1] : vector<32x32xf32> to vector<32xf32>
    %107 = vector.shape_cast %106 : vector<32xf32> to vector<32x1xf32>
    %108 = vector.broadcast %107 : vector<32x1xf32> to vector<32x32xf32>
    %109 = arith.subf %105, %108 : vector<32x32xf32>
    %110 = math.exp %109 : vector<32x32xf32>
    %cst_53 = arith.constant dense<0.000000e+00> : vector<32xf32>
    %111 = vector.multi_reduction <add>, %110, %cst_53 [1] : vector<32x32xf32> to vector<32xf32>
    %112 = vector.shape_cast %111 : vector<32xf32> to vector<32x1xf32>
    %113 = tpu.reciprocal %112 {approx = true} : vector<32x1xf32> -> vector<32x1xf32>
    %114 = vector.broadcast %113 : vector<32x1xf32> to vector<32x32xf32>
    %115 = arith.mulf %110, %114 : vector<32x32xf32>
    %116 = arith.truncf %115 : vector<32x32xf32> to vector<32x32xbf16>
    %117 = arith.truncf %99 : vector<32x64xf32> to vector<32x64xbf16>
    %cst_54 = arith.constant dense<0.000000e+00> : vector<32x64xf32>
    %118 = tpu.matmul %116, %117, %cst_54 {dimension_numbers = #tpu.dot_dimension_numbers<[1], [0], [0], [1], [0, 0, 1, 1], [], []>} : vector<32x32xbf16>, vector<32x64xbf16>, vector<32x64xf32> -> vector<32x64xf32>
    %119 = tpu.concatenate %96, %118 in 1 : vector<32x64xf32>, vector<32x64xf32> -> vector<32x128xf32>
    %120 = arith.truncf %119 : vector<32x128xf32> to vector<32x128xbf16>
    %c0_55 = arith.constant 0 : index
    %c0_56 = arith.constant 0 : index
    %c0_57 = arith.constant 0 : index
    %121 = vector.load %arg12[%c0_55, %c0_56, %c0_57] : memref<2x128x128xbf16, #tpu.memory_space<vmem>>, vector<1x128x128xbf16>
    %122 = vector.shape_cast %121 : vector<1x128x128xbf16> to vector<128x128xbf16>
    %cst_58 = arith.constant dense<0.000000e+00> : vector<32x128xf32>
    %123 = tpu.matmul %120, %122, %cst_58 {dimension_numbers = #tpu.dot_dimension_numbers<[1], [0], [0], [1], [0, 0, 1, 1], [], []>} : vector<32x128xbf16>, vector<128x128xbf16>, vector<32x128xf32> -> vector<32x128xf32>
    %124 = arith.addf %38, %123 : vector<32x128xf32>
    %c0_59 = arith.constant 0 : index
    %c0_60 = arith.constant 0 : index
    %c0_61 = arith.constant 0 : index
    %125 = vector.load %arg13[%c0_59, %c0_60, %c0_61] : memref<2x1x128xf32, #tpu.memory_space<vmem>>, vector<1x1x128xf32>
    %126 = vector.shape_cast %125 : vector<1x1x128xf32> to vector<1x128xf32>
    %127 = vector.broadcast %126 : vector<1x128xf32> to vector<32x128xf32>
    %128 = arith.addf %124, %127 : vector<32x128xf32>
    %c0_62 = arith.constant 0 : index
    %c0_63 = arith.constant 0 : index
    %c0_64 = arith.constant 0 : index
    %129 = vector.load %arg14[%c0_62, %c0_63, %c0_64] : memref<2x1x128xf32, #tpu.memory_space<vmem>>, vector<1x1x128xf32>
    %130 = vector.shape_cast %129 : vector<1x1x128xf32> to vector<1x128xf32>
    %c0_65 = arith.constant 0 : index
    %c0_66 = arith.constant 0 : index
    %c0_67 = arith.constant 0 : index
    %131 = vector.load %arg15[%c0_65, %c0_66, %c0_67] : memref<2x1x128xf32, #tpu.memory_space<vmem>>, vector<1x1x128xf32>
    %132 = vector.shape_cast %131 : vector<1x1x128xf32> to vector<1x128xf32>
    %cst_68 = arith.constant dense<0.000000e+00> : vector<32xf32>
    %133 = vector.multi_reduction <add>, %128, %cst_68 [1] : vector<32x128xf32> to vector<32xf32>
    %134 = vector.shape_cast %133 : vector<32xf32> to vector<32x1xf32>
    %cst_69 = arith.constant 1.280000e+02 : f32
    %135 = vector.broadcast %cst_69 : f32 to vector<32x1xf32>
    %136 = arith.divf %134, %135 : vector<32x1xf32>
    %137 = vector.broadcast %136 : vector<32x1xf32> to vector<32x128xf32>
    %138 = arith.subf %128, %137 : vector<32x128xf32>
    %139 = arith.mulf %138, %138 : vector<32x128xf32>
    %cst_70 = arith.constant dense<0.000000e+00> : vector<32xf32>
    %140 = vector.multi_reduction <add>, %139, %cst_70 [1] : vector<32x128xf32> to vector<32xf32>
    %141 = vector.shape_cast %140 : vector<32xf32> to vector<32x1xf32>
    %cst_71 = arith.constant 1.280000e+02 : f32
    %142 = vector.broadcast %cst_71 : f32 to vector<32x1xf32>
    %143 = arith.divf %141, %142 : vector<32x1xf32>
    %144 = vector.broadcast %136 : vector<32x1xf32> to vector<32x128xf32>
    %145 = arith.subf %128, %144 : vector<32x128xf32>
    %cst_72 = arith.constant 9.99999974E-6 : f32
    %146 = vector.broadcast %cst_72 : f32 to vector<32x1xf32>
    %147 = arith.addf %143, %146 : vector<32x1xf32>
    %148 = math.rsqrt %147 : vector<32x1xf32>
    %149 = vector.broadcast %148 : vector<32x1xf32> to vector<32x128xf32>
    %150 = arith.mulf %145, %149 : vector<32x128xf32>
    %151 = vector.broadcast %130 : vector<1x128xf32> to vector<32x128xf32>
    %152 = arith.mulf %150, %151 : vector<32x128xf32>
    %153 = vector.broadcast %132 : vector<1x128xf32> to vector<32x128xf32>
    %154 = arith.addf %152, %153 : vector<32x128xf32>
    %155 = arith.truncf %154 : vector<32x128xf32> to vector<32x128xbf16>
    %c0_73 = arith.constant 0 : index
    %c0_74 = arith.constant 0 : index
    %c0_75 = arith.constant 0 : index
    %156 = vector.load %arg16[%c0_73, %c0_74, %c0_75] : memref<2x128x512xbf16, #tpu.memory_space<vmem>>, vector<1x128x512xbf16>
    %157 = vector.shape_cast %156 : vector<1x128x512xbf16> to vector<128x512xbf16>
    %cst_76 = arith.constant dense<0.000000e+00> : vector<32x512xf32>
    %158 = tpu.matmul %155, %157, %cst_76 {dimension_numbers = #tpu.dot_dimension_numbers<[1], [0], [0], [1], [0, 0, 1, 1], [], []>} : vector<32x128xbf16>, vector<128x512xbf16>, vector<32x512xf32> -> vector<32x512xf32>
    %c0_77 = arith.constant 0 : index
    %c0_78 = arith.constant 0 : index
    %c0_79 = arith.constant 0 : index
    %159 = vector.load %arg17[%c0_77, %c0_78, %c0_79] : memref<2x1x512xf32, #tpu.memory_space<vmem>>, vector<1x1x512xf32>
    %160 = vector.shape_cast %159 : vector<1x1x512xf32> to vector<1x512xf32>
    %161 = vector.broadcast %160 : vector<1x512xf32> to vector<32x512xf32>
    %162 = arith.addf %158, %161 : vector<32x512xf32>
    %cst_80 = arith.constant 1.702000e+00 : f32
    %163 = vector.broadcast %cst_80 : f32 to vector<32x512xf32>
    %164 = arith.mulf %163, %162 : vector<32x512xf32>
    %165 = arith.negf %164 : vector<32x512xf32>
    %166 = math.exp %165 : vector<32x512xf32>
    %cst_81 = arith.constant 1.000000e+00 : f32
    %167 = vector.broadcast %cst_81 : f32 to vector<32x512xf32>
    %168 = arith.addf %167, %166 : vector<32x512xf32>
    %169 = arith.divf %167, %168 : vector<32x512xf32>
    %170 = arith.mulf %162, %169 : vector<32x512xf32>
    %171 = arith.truncf %170 : vector<32x512xf32> to vector<32x512xbf16>
    %c0_82 = arith.constant 0 : index
    %c0_83 = arith.constant 0 : index
    %c0_84 = arith.constant 0 : index
    %172 = vector.load %arg18[%c0_82, %c0_83, %c0_84] : memref<2x512x128xbf16, #tpu.memory_space<vmem>>, vector<1x512x128xbf16>
    %173 = vector.shape_cast %172 : vector<1x512x128xbf16> to vector<512x128xbf16>
    %cst_85 = arith.constant dense<0.000000e+00> : vector<32x128xf32>
    %174 = tpu.matmul %171, %173, %cst_85 {dimension_numbers = #tpu.dot_dimension_numbers<[1], [0], [0], [1], [0, 0, 1, 1], [], []>} : vector<32x512xbf16>, vector<512x128xbf16>, vector<32x128xf32> -> vector<32x128xf32>
    %175 = arith.addf %128, %174 : vector<32x128xf32>
    %c0_86 = arith.constant 0 : index
    %c0_87 = arith.constant 0 : index
    %c0_88 = arith.constant 0 : index
    %176 = vector.load %arg19[%c0_86, %c0_87, %c0_88] : memref<2x1x128xf32, #tpu.memory_space<vmem>>, vector<1x1x128xf32>
    %177 = vector.shape_cast %176 : vector<1x1x128xf32> to vector<1x128xf32>
    %178 = vector.broadcast %177 : vector<1x128xf32> to vector<32x128xf32>
    %179 = arith.addf %175, %178 : vector<32x128xf32>
    %c1 = arith.constant 1 : index
    %c0_89 = arith.constant 0 : index
    %c0_90 = arith.constant 0 : index
    %180 = vector.load %arg8[%c1, %c0_89, %c0_90] : memref<2x1x128xf32, #tpu.memory_space<vmem>>, vector<1x1x128xf32>
    %181 = vector.shape_cast %180 : vector<1x1x128xf32> to vector<1x128xf32>
    %c1_91 = arith.constant 1 : index
    %c0_92 = arith.constant 0 : index
    %c0_93 = arith.constant 0 : index
    %182 = vector.load %arg9[%c1_91, %c0_92, %c0_93] : memref<2x1x128xf32, #tpu.memory_space<vmem>>, vector<1x1x128xf32>
    %183 = vector.shape_cast %182 : vector<1x1x128xf32> to vector<1x128xf32>
    %cst_94 = arith.constant dense<0.000000e+00> : vector<32xf32>
    %184 = vector.multi_reduction <add>, %179, %cst_94 [1] : vector<32x128xf32> to vector<32xf32>
    %185 = vector.shape_cast %184 : vector<32xf32> to vector<32x1xf32>
    %cst_95 = arith.constant 1.280000e+02 : f32
    %186 = vector.broadcast %cst_95 : f32 to vector<32x1xf32>
    %187 = arith.divf %185, %186 : vector<32x1xf32>
    %188 = vector.broadcast %187 : vector<32x1xf32> to vector<32x128xf32>
    %189 = arith.subf %179, %188 : vector<32x128xf32>
    %190 = arith.mulf %189, %189 : vector<32x128xf32>
    %cst_96 = arith.constant dense<0.000000e+00> : vector<32xf32>
    %191 = vector.multi_reduction <add>, %190, %cst_96 [1] : vector<32x128xf32> to vector<32xf32>
    %192 = vector.shape_cast %191 : vector<32xf32> to vector<32x1xf32>
    %cst_97 = arith.constant 1.280000e+02 : f32
    %193 = vector.broadcast %cst_97 : f32 to vector<32x1xf32>
    %194 = arith.divf %192, %193 : vector<32x1xf32>
    %195 = vector.broadcast %187 : vector<32x1xf32> to vector<32x128xf32>
    %196 = arith.subf %179, %195 : vector<32x128xf32>
    %cst_98 = arith.constant 9.99999974E-6 : f32
    %197 = vector.broadcast %cst_98 : f32 to vector<32x1xf32>
    %198 = arith.addf %194, %197 : vector<32x1xf32>
    %199 = math.rsqrt %198 : vector<32x1xf32>
    %200 = vector.broadcast %199 : vector<32x1xf32> to vector<32x128xf32>
    %201 = arith.mulf %196, %200 : vector<32x128xf32>
    %202 = vector.broadcast %181 : vector<1x128xf32> to vector<32x128xf32>
    %203 = arith.mulf %201, %202 : vector<32x128xf32>
    %204 = vector.broadcast %183 : vector<1x128xf32> to vector<32x128xf32>
    %205 = arith.addf %203, %204 : vector<32x128xf32>
    %206 = arith.truncf %205 : vector<32x128xf32> to vector<32x128xbf16>
    %c1_99 = arith.constant 1 : index
    %c0_100 = arith.constant 0 : index
    %c0_101 = arith.constant 0 : index
    %207 = vector.load %arg10[%c1_99, %c0_100, %c0_101] : memref<2x128x384xbf16, #tpu.memory_space<vmem>>, vector<1x128x384xbf16>
    %208 = vector.shape_cast %207 : vector<1x128x384xbf16> to vector<128x384xbf16>
    %cst_102 = arith.constant dense<0.000000e+00> : vector<32x384xf32>
    %209 = tpu.matmul %206, %208, %cst_102 {dimension_numbers = #tpu.dot_dimension_numbers<[1], [0], [0], [1], [0, 0, 1, 1], [], []>} : vector<32x128xbf16>, vector<128x384xbf16>, vector<32x384xf32> -> vector<32x384xf32>
    %c1_103 = arith.constant 1 : index
    %c0_104 = arith.constant 0 : index
    %c0_105 = arith.constant 0 : index
    %210 = vector.load %arg11[%c1_103, %c0_104, %c0_105] : memref<2x1x384xf32, #tpu.memory_space<vmem>>, vector<1x1x384xf32>
    %211 = vector.shape_cast %210 : vector<1x1x384xf32> to vector<1x384xf32>
    %212 = vector.broadcast %211 : vector<1x384xf32> to vector<32x384xf32>
    %213 = arith.addf %209, %212 : vector<32x384xf32>
    %214 = vector.extract_strided_slice %213 {offsets = [0, 0], sizes = [32, 64], strides = [1, 1]} : vector<32x384xf32> to vector<32x64xf32>
    %215 = vector.extract_strided_slice %213 {offsets = [0, 128], sizes = [32, 64], strides = [1, 1]} : vector<32x384xf32> to vector<32x64xf32>
    %216 = vector.extract_strided_slice %213 {offsets = [0, 256], sizes = [32, 64], strides = [1, 1]} : vector<32x384xf32> to vector<32x64xf32>
    %217 = arith.truncf %214 : vector<32x64xf32> to vector<32x64xbf16>
    %218 = arith.truncf %215 : vector<32x64xf32> to vector<32x64xbf16>
    %cst_106 = arith.constant dense<0.000000e+00> : vector<32x32xf32>
    %219 = tpu.matmul %217, %218, %cst_106 {dimension_numbers = #tpu.dot_dimension_numbers<[1], [1], [0], [0], [0, 0, 1, 0], [], []>} : vector<32x64xbf16>, vector<32x64xbf16>, vector<32x32xf32> -> vector<32x32xf32>
    %cst_107 = arith.constant 1.250000e-01 : f32
    %220 = vector.broadcast %cst_107 : f32 to vector<32x32xf32>
    %221 = arith.mulf %219, %220 : vector<32x32xf32>
    %222 = arith.addf %221, %40 : vector<32x32xf32>
    %cst_108 = arith.constant dense<0xFF800000> : vector<32xf32>
    %223 = vector.multi_reduction <maximumf>, %222, %cst_108 [1] : vector<32x32xf32> to vector<32xf32>
    %224 = vector.shape_cast %223 : vector<32xf32> to vector<32x1xf32>
    %225 = vector.broadcast %224 : vector<32x1xf32> to vector<32x32xf32>
    %226 = arith.subf %222, %225 : vector<32x32xf32>
    %227 = math.exp %226 : vector<32x32xf32>
    %cst_109 = arith.constant dense<0.000000e+00> : vector<32xf32>
    %228 = vector.multi_reduction <add>, %227, %cst_109 [1] : vector<32x32xf32> to vector<32xf32>
    %229 = vector.shape_cast %228 : vector<32xf32> to vector<32x1xf32>
    %230 = tpu.reciprocal %229 {approx = true} : vector<32x1xf32> -> vector<32x1xf32>
    %231 = vector.broadcast %230 : vector<32x1xf32> to vector<32x32xf32>
    %232 = arith.mulf %227, %231 : vector<32x32xf32>
    %233 = arith.truncf %232 : vector<32x32xf32> to vector<32x32xbf16>
    %234 = arith.truncf %216 : vector<32x64xf32> to vector<32x64xbf16>
    %cst_110 = arith.constant dense<0.000000e+00> : vector<32x64xf32>
    %235 = tpu.matmul %233, %234, %cst_110 {dimension_numbers = #tpu.dot_dimension_numbers<[1], [0], [0], [1], [0, 0, 1, 1], [], []>} : vector<32x32xbf16>, vector<32x64xbf16>, vector<32x64xf32> -> vector<32x64xf32>
    %236 = vector.extract_strided_slice %213 {offsets = [0, 64], sizes = [32, 64], strides = [1, 1]} : vector<32x384xf32> to vector<32x64xf32>
    %237 = vector.extract_strided_slice %213 {offsets = [0, 192], sizes = [32, 64], strides = [1, 1]} : vector<32x384xf32> to vector<32x64xf32>
    %238 = vector.extract_strided_slice %213 {offsets = [0, 320], sizes = [32, 64], strides = [1, 1]} : vector<32x384xf32> to vector<32x64xf32>
    %239 = arith.truncf %236 : vector<32x64xf32> to vector<32x64xbf16>
    %240 = arith.truncf %237 : vector<32x64xf32> to vector<32x64xbf16>
    %cst_111 = arith.constant dense<0.000000e+00> : vector<32x32xf32>
    %241 = tpu.matmul %239, %240, %cst_111 {dimension_numbers = #tpu.dot_dimension_numbers<[1], [1], [0], [0], [0, 0, 1, 0], [], []>} : vector<32x64xbf16>, vector<32x64xbf16>, vector<32x32xf32> -> vector<32x32xf32>
    %cst_112 = arith.constant 1.250000e-01 : f32
    %242 = vector.broadcast %cst_112 : f32 to vector<32x32xf32>
    %243 = arith.mulf %241, %242 : vector<32x32xf32>
    %244 = arith.addf %243, %40 : vector<32x32xf32>
    %cst_113 = arith.constant dense<0xFF800000> : vector<32xf32>
    %245 = vector.multi_reduction <maximumf>, %244, %cst_113 [1] : vector<32x32xf32> to vector<32xf32>
    %246 = vector.shape_cast %245 : vector<32xf32> to vector<32x1xf32>
    %247 = vector.broadcast %246 : vector<32x1xf32> to vector<32x32xf32>
    %248 = arith.subf %244, %247 : vector<32x32xf32>
    %249 = math.exp %248 : vector<32x32xf32>
    %cst_114 = arith.constant dense<0.000000e+00> : vector<32xf32>
    %250 = vector.multi_reduction <add>, %249, %cst_114 [1] : vector<32x32xf32> to vector<32xf32>
    %251 = vector.shape_cast %250 : vector<32xf32> to vector<32x1xf32>
    %252 = tpu.reciprocal %251 {approx = true} : vector<32x1xf32> -> vector<32x1xf32>
    %253 = vector.broadcast %252 : vector<32x1xf32> to vector<32x32xf32>
    %254 = arith.mulf %249, %253 : vector<32x32xf32>
    %255 = arith.truncf %254 : vector<32x32xf32> to vector<32x32xbf16>
    %256 = arith.truncf %238 : vector<32x64xf32> to vector<32x64xbf16>
    %cst_115 = arith.constant dense<0.000000e+00> : vector<32x64xf32>
    %257 = tpu.matmul %255, %256, %cst_115 {dimension_numbers = #tpu.dot_dimension_numbers<[1], [0], [0], [1], [0, 0, 1, 1], [], []>} : vector<32x32xbf16>, vector<32x64xbf16>, vector<32x64xf32> -> vector<32x64xf32>
    %258 = tpu.concatenate %235, %257 in 1 : vector<32x64xf32>, vector<32x64xf32> -> vector<32x128xf32>
    %259 = arith.truncf %258 : vector<32x128xf32> to vector<32x128xbf16>
    %c1_116 = arith.constant 1 : index
    %c0_117 = arith.constant 0 : index
    %c0_118 = arith.constant 0 : index
    %260 = vector.load %arg12[%c1_116, %c0_117, %c0_118] : memref<2x128x128xbf16, #tpu.memory_space<vmem>>, vector<1x128x128xbf16>
    %261 = vector.shape_cast %260 : vector<1x128x128xbf16> to vector<128x128xbf16>
    %cst_119 = arith.constant dense<0.000000e+00> : vector<32x128xf32>
    %262 = tpu.matmul %259, %261, %cst_119 {dimension_numbers = #tpu.dot_dimension_numbers<[1], [0], [0], [1], [0, 0, 1, 1], [], []>} : vector<32x128xbf16>, vector<128x128xbf16>, vector<32x128xf32> -> vector<32x128xf32>
    %263 = arith.addf %179, %262 : vector<32x128xf32>
    %c1_120 = arith.constant 1 : index
    %c0_121 = arith.constant 0 : index
    %c0_122 = arith.constant 0 : index
    %264 = vector.load %arg13[%c1_120, %c0_121, %c0_122] : memref<2x1x128xf32, #tpu.memory_space<vmem>>, vector<1x1x128xf32>
    %265 = vector.shape_cast %264 : vector<1x1x128xf32> to vector<1x128xf32>
    %266 = vector.broadcast %265 : vector<1x128xf32> to vector<32x128xf32>
    %267 = arith.addf %263, %266 : vector<32x128xf32>
    %c1_123 = arith.constant 1 : index
    %c0_124 = arith.constant 0 : index
    %c0_125 = arith.constant 0 : index
    %268 = vector.load %arg14[%c1_123, %c0_124, %c0_125] : memref<2x1x128xf32, #tpu.memory_space<vmem>>, vector<1x1x128xf32>
    %269 = vector.shape_cast %268 : vector<1x1x128xf32> to vector<1x128xf32>
    %c1_126 = arith.constant 1 : index
    %c0_127 = arith.constant 0 : index
    %c0_128 = arith.constant 0 : index
    %270 = vector.load %arg15[%c1_126, %c0_127, %c0_128] : memref<2x1x128xf32, #tpu.memory_space<vmem>>, vector<1x1x128xf32>
    %271 = vector.shape_cast %270 : vector<1x1x128xf32> to vector<1x128xf32>
    %cst_129 = arith.constant dense<0.000000e+00> : vector<32xf32>
    %272 = vector.multi_reduction <add>, %267, %cst_129 [1] : vector<32x128xf32> to vector<32xf32>
    %273 = vector.shape_cast %272 : vector<32xf32> to vector<32x1xf32>
    %cst_130 = arith.constant 1.280000e+02 : f32
    %274 = vector.broadcast %cst_130 : f32 to vector<32x1xf32>
    %275 = arith.divf %273, %274 : vector<32x1xf32>
    %276 = vector.broadcast %275 : vector<32x1xf32> to vector<32x128xf32>
    %277 = arith.subf %267, %276 : vector<32x128xf32>
    %278 = arith.mulf %277, %277 : vector<32x128xf32>
    %cst_131 = arith.constant dense<0.000000e+00> : vector<32xf32>
    %279 = vector.multi_reduction <add>, %278, %cst_131 [1] : vector<32x128xf32> to vector<32xf32>
    %280 = vector.shape_cast %279 : vector<32xf32> to vector<32x1xf32>
    %cst_132 = arith.constant 1.280000e+02 : f32
    %281 = vector.broadcast %cst_132 : f32 to vector<32x1xf32>
    %282 = arith.divf %280, %281 : vector<32x1xf32>
    %283 = vector.broadcast %275 : vector<32x1xf32> to vector<32x128xf32>
    %284 = arith.subf %267, %283 : vector<32x128xf32>
    %cst_133 = arith.constant 9.99999974E-6 : f32
    %285 = vector.broadcast %cst_133 : f32 to vector<32x1xf32>
    %286 = arith.addf %282, %285 : vector<32x1xf32>
    %287 = math.rsqrt %286 : vector<32x1xf32>
    %288 = vector.broadcast %287 : vector<32x1xf32> to vector<32x128xf32>
    %289 = arith.mulf %284, %288 : vector<32x128xf32>
    %290 = vector.broadcast %269 : vector<1x128xf32> to vector<32x128xf32>
    %291 = arith.mulf %289, %290 : vector<32x128xf32>
    %292 = vector.broadcast %271 : vector<1x128xf32> to vector<32x128xf32>
    %293 = arith.addf %291, %292 : vector<32x128xf32>
    %294 = arith.truncf %293 : vector<32x128xf32> to vector<32x128xbf16>
    %c1_134 = arith.constant 1 : index
    %c0_135 = arith.constant 0 : index
    %c0_136 = arith.constant 0 : index
    %295 = vector.load %arg16[%c1_134, %c0_135, %c0_136] : memref<2x128x512xbf16, #tpu.memory_space<vmem>>, vector<1x128x512xbf16>
    %296 = vector.shape_cast %295 : vector<1x128x512xbf16> to vector<128x512xbf16>
    %cst_137 = arith.constant dense<0.000000e+00> : vector<32x512xf32>
    %297 = tpu.matmul %294, %296, %cst_137 {dimension_numbers = #tpu.dot_dimension_numbers<[1], [0], [0], [1], [0, 0, 1, 1], [], []>} : vector<32x128xbf16>, vector<128x512xbf16>, vector<32x512xf32> -> vector<32x512xf32>
    %c1_138 = arith.constant 1 : index
    %c0_139 = arith.constant 0 : index
    %c0_140 = arith.constant 0 : index
    %298 = vector.load %arg17[%c1_138, %c0_139, %c0_140] : memref<2x1x512xf32, #tpu.memory_space<vmem>>, vector<1x1x512xf32>
    %299 = vector.shape_cast %298 : vector<1x1x512xf32> to vector<1x512xf32>
    %300 = vector.broadcast %299 : vector<1x512xf32> to vector<32x512xf32>
    %301 = arith.addf %297, %300 : vector<32x512xf32>
    %cst_141 = arith.constant 1.702000e+00 : f32
    %302 = vector.broadcast %cst_141 : f32 to vector<32x512xf32>
    %303 = arith.mulf %302, %301 : vector<32x512xf32>
    %304 = arith.negf %303 : vector<32x512xf32>
    %305 = math.exp %304 : vector<32x512xf32>
    %cst_142 = arith.constant 1.000000e+00 : f32
    %306 = vector.broadcast %cst_142 : f32 to vector<32x512xf32>
    %307 = arith.addf %306, %305 : vector<32x512xf32>
    %308 = arith.divf %306, %307 : vector<32x512xf32>
    %309 = arith.mulf %301, %308 : vector<32x512xf32>
    %310 = arith.truncf %309 : vector<32x512xf32> to vector<32x512xbf16>
    %c1_143 = arith.constant 1 : index
    %c0_144 = arith.constant 0 : index
    %c0_145 = arith.constant 0 : index
    %311 = vector.load %arg18[%c1_143, %c0_144, %c0_145] : memref<2x512x128xbf16, #tpu.memory_space<vmem>>, vector<1x512x128xbf16>
    %312 = vector.shape_cast %311 : vector<1x512x128xbf16> to vector<512x128xbf16>
    %cst_146 = arith.constant dense<0.000000e+00> : vector<32x128xf32>
    %313 = tpu.matmul %310, %312, %cst_146 {dimension_numbers = #tpu.dot_dimension_numbers<[1], [0], [0], [1], [0, 0, 1, 1], [], []>} : vector<32x512xbf16>, vector<512x128xbf16>, vector<32x128xf32> -> vector<32x128xf32>
    %314 = arith.addf %267, %313 : vector<32x128xf32>
    %c1_147 = arith.constant 1 : index
    %c0_148 = arith.constant 0 : index
    %c0_149 = arith.constant 0 : index
    %315 = vector.load %arg19[%c1_147, %c0_148, %c0_149] : memref<2x1x128xf32, #tpu.memory_space<vmem>>, vector<1x1x128xf32>
    %316 = vector.shape_cast %315 : vector<1x1x128xf32> to vector<1x128xf32>
    %317 = vector.broadcast %316 : vector<1x128xf32> to vector<32x128xf32>
    %318 = arith.addf %314, %317 : vector<32x128xf32>
    %319 = vector.extract_strided_slice %318 {offsets = [0, 0], sizes = [8, 128], strides = [1, 1]} : vector<32x128xf32> to vector<8x128xf32>
    %c0_150 = arith.constant 0 : index
    %c0_151 = arith.constant 0 : index
    %320 = vector.load %arg20[%c0_150, %c0_151] : memref<1x128xf32, #tpu.memory_space<vmem>>, vector<1x128xf32>
    %c0_152 = arith.constant 0 : index
    %c0_153 = arith.constant 0 : index
    %321 = vector.load %arg21[%c0_152, %c0_153] : memref<1x128xf32, #tpu.memory_space<vmem>>, vector<1x128xf32>
    %cst_154 = arith.constant dense<0.000000e+00> : vector<8xf32>
    %322 = vector.multi_reduction <add>, %319, %cst_154 [1] : vector<8x128xf32> to vector<8xf32>
    %323 = vector.shape_cast %322 : vector<8xf32> to vector<8x1xf32>
    %cst_155 = arith.constant 1.280000e+02 : f32
    %324 = vector.broadcast %cst_155 : f32 to vector<8x1xf32>
    %325 = arith.divf %323, %324 : vector<8x1xf32>
    %326 = vector.broadcast %325 : vector<8x1xf32> to vector<8x128xf32>
    %327 = arith.subf %319, %326 : vector<8x128xf32>
    %328 = arith.mulf %327, %327 : vector<8x128xf32>
    %cst_156 = arith.constant dense<0.000000e+00> : vector<8xf32>
    %329 = vector.multi_reduction <add>, %328, %cst_156 [1] : vector<8x128xf32> to vector<8xf32>
    %330 = vector.shape_cast %329 : vector<8xf32> to vector<8x1xf32>
    %cst_157 = arith.constant 1.280000e+02 : f32
    %331 = vector.broadcast %cst_157 : f32 to vector<8x1xf32>
    %332 = arith.divf %330, %331 : vector<8x1xf32>
    %333 = vector.broadcast %325 : vector<8x1xf32> to vector<8x128xf32>
    %334 = arith.subf %319, %333 : vector<8x128xf32>
    %cst_158 = arith.constant 9.99999974E-6 : f32
    %335 = vector.broadcast %cst_158 : f32 to vector<8x1xf32>
    %336 = arith.addf %332, %335 : vector<8x1xf32>
    %337 = math.rsqrt %336 : vector<8x1xf32>
    %338 = vector.broadcast %337 : vector<8x1xf32> to vector<8x128xf32>
    %339 = arith.mulf %334, %338 : vector<8x128xf32>
    %340 = vector.broadcast %320 : vector<1x128xf32> to vector<8x128xf32>
    %341 = arith.mulf %339, %340 : vector<8x128xf32>
    %342 = vector.broadcast %321 : vector<1x128xf32> to vector<8x128xf32>
    %343 = arith.addf %341, %342 : vector<8x128xf32>
    %c0_159 = arith.constant 0 : index
    %c0_160 = arith.constant 0 : index
    %344 = vector.load %arg22[%c0_159, %c0_160] : memref<128x64xf32, #tpu.memory_space<vmem>>, vector<128x64xf32>
    %cst_161 = arith.constant dense<0.000000e+00> : vector<8x64xf32>
    %345 = tpu.matmul %343, %344, %cst_161 {dimension_numbers = #tpu.dot_dimension_numbers<[1], [0], [0], [1], [0, 0, 1, 1], [], []>} : vector<8x128xf32>, vector<128x64xf32>, vector<8x64xf32> -> vector<8x64xf32>
    %c0_162 = arith.constant 0 : index
    %c0_163 = arith.constant 0 : index
    %c0_164 = arith.constant 0 : index
    %346 = vector.load %arg25[%c0_162, %c0_163, %c0_164] : memref<1x8x64xf32, #tpu.memory_space<vmem>>, vector<1x8x64xf32>
    %347 = vector.shape_cast %346 : vector<1x8x64xf32> to vector<8x64xf32>
    %348 = vector.shape_cast %345 : vector<8x64xf32> to vector<1x8x64xf32>
    tpu.vector_store %arg25[%c0_162, %c0_163, %c0_164], %348 {strides = array<i32>} : memref<1x8x64xf32, #tpu.memory_space<vmem>>, vector<1x8x64xf32>,
    %349 = arith.mulf %345, %345 : vector<8x64xf32>
    %cst_165 = arith.constant dense<0.000000e+00> : vector<8xf32>
    %350 = vector.multi_reduction <add>, %349, %cst_165 [1] : vector<8x64xf32> to vector<8xf32>
    %351 = vector.shape_cast %350 : vector<8xf32> to vector<8x1xf32>
    %352 = math.sqrt %351 : vector<8x1xf32>
    %cst_166 = arith.constant 9.99999996E-13 : f32
    %353 = vector.broadcast %cst_166 : f32 to vector<8x1xf32>
    %354 = arith.maximumf %352, %353 : vector<8x1xf32>
    %cst_167 = arith.constant 1.000000e+00 : f32
    %355 = vector.broadcast %cst_167 : f32 to vector<8x1xf32>
    %356 = arith.divf %355, %354 : vector<8x1xf32>
    %357 = vector.broadcast %356 : vector<8x1xf32> to vector<8x64xf32>
    %358 = arith.mulf %345, %357 : vector<8x64xf32>
    %c0_168 = arith.constant 0 : index
    %c0_169 = arith.constant 0 : index
    %359 = vector.load %arg23[%c0_168, %c0_169] : memref<8x64xf32, #tpu.memory_space<vmem>>, vector<8x64xf32>
    %cst_170 = arith.constant dense<0.000000e+00> : vector<8x8xf32>
    %360 = tpu.matmul %358, %359, %cst_170 {dimension_numbers = #tpu.dot_dimension_numbers<[1], [1], [0], [0], [0, 0, 1, 0], [], []>} : vector<8x64xf32>, vector<8x64xf32>, vector<8x8xf32> -> vector<8x8xf32>
    %c0_171 = arith.constant 0 : index
    %c0_172 = arith.constant 0 : index
    %361 = memref.load %arg24[%c0_171, %c0_172] : memref<1x1xf32, #tpu.memory_space<smem>>
    %362 = vector.broadcast %361 : f32 to vector<8x8xf32>
    %363 = arith.mulf %360, %362 : vector<8x8xf32>
    %c0_173 = arith.constant 0 : index
    %c0_174 = arith.constant 0 : index
    %c0_175 = arith.constant 0 : index
    %364 = vector.load %arg26[%c0_173, %c0_174, %c0_175] : memref<1x8x8xf32, #tpu.memory_space<vmem>>, vector<1x8x8xf32>
    %365 = vector.shape_cast %364 : vector<1x8x8xf32> to vector<8x8xf32>
    %366 = vector.shape_cast %363 : vector<8x8xf32> to vector<1x8x8xf32>
    tpu.vector_store %arg26[%c0_173, %c0_174, %c0_175], %366 {strides = array<i32>} : memref<1x8x8xf32, #tpu.memory_space<vmem>>, vector<1x8x8xf32>,
    return
  }
  func.func @transform_0(%arg0: i32) -> (i32, i32, i32) {
    %c0_i32 = arith.constant 0 : i32
    %c0_i32_0 = arith.constant 0 : i32
    %c0_i32_1 = arith.constant 0 : i32
    return %arg0, %c0_i32, %c0_i32_0 : i32, i32, i32
  }
  func.func @transform_1(%arg0: i32) -> (i32, i32, i32) {
    %c0_i32 = arith.constant 0 : i32
    %c0_i32_0 = arith.constant 0 : i32
    %c0_i32_1 = arith.constant 0 : i32
    return %arg0, %c0_i32, %c0_i32_0 : i32, i32, i32
  }
  func.func @transform_2(%arg0: i32) -> (i32, i32) {
    %c0_i32 = arith.constant 0 : i32
    %c0_i32_0 = arith.constant 0 : i32
    %c0_i32_1 = arith.constant 0 : i32
    return %c0_i32, %c0_i32_0 : i32, i32
  }
  func.func @transform_3(%arg0: i32) -> (i32, i32) {
    %c0_i32 = arith.constant 0 : i32
    %c0_i32_0 = arith.constant 0 : i32
    %c0_i32_1 = arith.constant 0 : i32
    return %c0_i32, %c0_i32_0 : i32, i32
  }
  func.func @transform_4(%arg0: i32) -> (i32, i32) {
    %c0_i32 = arith.constant 0 : i32
    %c0_i32_0 = arith.constant 0 : i32
    %c0_i32_1 = arith.constant 0 : i32
    return %c0_i32, %c0_i32_0 : i32, i32
  }
  func.func @transform_5(%arg0: i32) -> (i32, i32) {
    %c0_i32 = arith.constant 0 : i32
    %c0_i32_0 = arith.constant 0 : i32
    %c0_i32_1 = arith.constant 0 : i32
    return %c0_i32, %c0_i32_0 : i32, i32
  }
  func.func @transform_6(%arg0: i32) -> (i32, i32) {
    %c0_i32 = arith.constant 0 : i32
    %c0_i32_0 = arith.constant 0 : i32
    %c0_i32_1 = arith.constant 0 : i32
    return %c0_i32, %c0_i32_0 : i32, i32
  }
  func.func @transform_7(%arg0: i32) -> (i32, i32, i32) {
    %c0_i32 = arith.constant 0 : i32
    %c0_i32_0 = arith.constant 0 : i32
    %c0_i32_1 = arith.constant 0 : i32
    %c0_i32_2 = arith.constant 0 : i32
    return %c0_i32, %c0_i32_0, %c0_i32_1 : i32, i32, i32
  }
  func.func @transform_8(%arg0: i32) -> (i32, i32, i32) {
    %c0_i32 = arith.constant 0 : i32
    %c0_i32_0 = arith.constant 0 : i32
    %c0_i32_1 = arith.constant 0 : i32
    %c0_i32_2 = arith.constant 0 : i32
    return %c0_i32, %c0_i32_0, %c0_i32_1 : i32, i32, i32
  }
  func.func @transform_9(%arg0: i32) -> (i32, i32, i32) {
    %c0_i32 = arith.constant 0 : i32
    %c0_i32_0 = arith.constant 0 : i32
    %c0_i32_1 = arith.constant 0 : i32
    %c0_i32_2 = arith.constant 0 : i32
    return %c0_i32, %c0_i32_0, %c0_i32_1 : i32, i32, i32
  }
  func.func @transform_10(%arg0: i32) -> (i32, i32, i32) {
    %c0_i32 = arith.constant 0 : i32
    %c0_i32_0 = arith.constant 0 : i32
    %c0_i32_1 = arith.constant 0 : i32
    %c0_i32_2 = arith.constant 0 : i32
    return %c0_i32, %c0_i32_0, %c0_i32_1 : i32, i32, i32
  }
  func.func @transform_11(%arg0: i32) -> (i32, i32, i32) {
    %c0_i32 = arith.constant 0 : i32
    %c0_i32_0 = arith.constant 0 : i32
    %c0_i32_1 = arith.constant 0 : i32
    %c0_i32_2 = arith.constant 0 : i32
    return %c0_i32, %c0_i32_0, %c0_i32_1 : i32, i32, i32
  }
  func.func @transform_12(%arg0: i32) -> (i32, i32, i32) {
    %c0_i32 = arith.constant 0 : i32
    %c0_i32_0 = arith.constant 0 : i32
    %c0_i32_1 = arith.constant 0 : i32
    %c0_i32_2 = arith.constant 0 : i32
    return %c0_i32, %c0_i32_0, %c0_i32_1 : i32, i32, i32
  }
  func.func @transform_13(%arg0: i32) -> (i32, i32, i32) {
    %c0_i32 = arith.constant 0 : i32
    %c0_i32_0 = arith.constant 0 : i32
    %c0_i32_1 = arith.constant 0 : i32
    %c0_i32_2 = arith.constant 0 : i32
    return %c0_i32, %c0_i32_0, %c0_i32_1 : i32, i32, i32
  }
  func.func @transform_14(%arg0: i32) -> (i32, i32, i32) {
    %c0_i32 = arith.constant 0 : i32
    %c0_i32_0 = arith.constant 0 : i32
    %c0_i32_1 = arith.constant 0 : i32
    %c0_i32_2 = arith.constant 0 : i32
    return %c0_i32, %c0_i32_0, %c0_i32_1 : i32, i32, i32
  }
  func.func @transform_15(%arg0: i32) -> (i32, i32, i32) {
    %c0_i32 = arith.constant 0 : i32
    %c0_i32_0 = arith.constant 0 : i32
    %c0_i32_1 = arith.constant 0 : i32
    %c0_i32_2 = arith.constant 0 : i32
    return %c0_i32, %c0_i32_0, %c0_i32_1 : i32, i32, i32
  }
  func.func @transform_16(%arg0: i32) -> (i32, i32, i32) {
    %c0_i32 = arith.constant 0 : i32
    %c0_i32_0 = arith.constant 0 : i32
    %c0_i32_1 = arith.constant 0 : i32
    %c0_i32_2 = arith.constant 0 : i32
    return %c0_i32, %c0_i32_0, %c0_i32_1 : i32, i32, i32
  }
  func.func @transform_17(%arg0: i32) -> (i32, i32, i32) {
    %c0_i32 = arith.constant 0 : i32
    %c0_i32_0 = arith.constant 0 : i32
    %c0_i32_1 = arith.constant 0 : i32
    %c0_i32_2 = arith.constant 0 : i32
    return %c0_i32, %c0_i32_0, %c0_i32_1 : i32, i32, i32
  }
  func.func @transform_18(%arg0: i32) -> (i32, i32, i32) {
    %c0_i32 = arith.constant 0 : i32
    %c0_i32_0 = arith.constant 0 : i32
    %c0_i32_1 = arith.constant 0 : i32
    %c0_i32_2 = arith.constant 0 : i32
    return %c0_i32, %c0_i32_0, %c0_i32_1 : i32, i32, i32
  }
  func.func @transform_19(%arg0: i32) -> (i32, i32) {
    %c0_i32 = arith.constant 0 : i32
    %c0_i32_0 = arith.constant 0 : i32
    %c0_i32_1 = arith.constant 0 : i32
    return %c0_i32, %c0_i32_0 : i32, i32
  }
  func.func @transform_20(%arg0: i32) -> (i32, i32) {
    %c0_i32 = arith.constant 0 : i32
    %c0_i32_0 = arith.constant 0 : i32
    %c0_i32_1 = arith.constant 0 : i32
    return %c0_i32, %c0_i32_0 : i32, i32
  }
  func.func @transform_21(%arg0: i32) -> (i32, i32) {
    %c0_i32 = arith.constant 0 : i32
    %c0_i32_0 = arith.constant 0 : i32
    %c0_i32_1 = arith.constant 0 : i32
    return %c0_i32, %c0_i32_0 : i32, i32
  }
  func.func @transform_22(%arg0: i32) -> (i32, i32) {
    %c0_i32 = arith.constant 0 : i32
    %c0_i32_0 = arith.constant 0 : i32
    %c0_i32_1 = arith.constant 0 : i32
    return %c0_i32, %c0_i32_0 : i32, i32
  }
  func.func @transform_23(%arg0: i32) -> (i32, i32) {
    %c0_i32 = arith.constant 0 : i32
    %c0_i32_0 = arith.constant 0 : i32
    %c0_i32_1 = arith.constant 0 : i32
    return %c0_i32, %c0_i32_0 : i32, i32
  }
  func.func @transform_24(%arg0: i32) -> (i32, i32, i32) {
    %c0_i32 = arith.constant 0 : i32
    %c0_i32_0 = arith.constant 0 : i32
    %c0_i32_1 = arith.constant 0 : i32
    return %arg0, %c0_i32, %c0_i32_0 : i32, i32, i32
  }
  func.func @transform_25(%arg0: i32) -> (i32, i32, i32) {
    %c0_i32 = arith.constant 0 : i32
    %c0_i32_0 = arith.constant 0 : i32
    %c0_i32_1 = arith.constant 0 : i32
    return %arg0, %c0_i32, %c0_i32_0 : i32, i32, i32
  }
}

</mosaic_0001>

<bundles_post_ra>
// kernel: mask_clip_forward.1
= control target key start
LH: loop header
LB: loop body
LE: loop exit
PB: predicated region body
PF: predicated region fallthrough
CT: control target
= control target key end

     0   :  { %s7842_s0 = inlined_call_operand.vmem [shape: f32[2,16,192], index: 0, kind: input, shape index: {}]   ;;  %s7843_s1 = inlined_call_operand.vmem [shape: f32[2,32,32], index: 1, kind: input, shape index: {}]   ;;  %s7844_s2 = inlined_call_operand.vmem [shape: bf16[192,128], index: 2, kind: input, shape index: {}]   ;;  %s7845_s3 = inlined_call_operand.vmem [shape: f32[1,128], index: 3, kind: input, shape index: {}]   ;;  %s7846_s4 = inlined_call_operand.vmem [shape: f32[16,128], index: 4, kind: input, shape index: {}]   ;;  %s7847_s5 = inlined_call_operand.vmem [shape: f32[1,128], index: 5, kind: input, shape index: {}]   ;;  %s7848_s6 = inlined_call_operand.vmem [shape: f32[1,128], index: 6, kind: input, shape index: {}]   ;;  %s7849_s7 = inlined_call_operand.vmem [shape: f32[2,1,128], index: 7, kind: input, shape index: {}]   ;;  %s7850_s8 = inlined_call_operand.vmem [shape: f32[2,1,128], index: 8, kind: input, shape index: {}]   ;;  %s7851_s9 = inlined_call_operand.vmem [shape: bf16[2,128,384], index: 9, kind: input, shape index: {}]   ;;  %s7852_s10 = inlined_call_operand.vmem [shape: f32[2,1,384], index: 10, kind: input, shape index: {}]   ;;  %s7853_s11 = inlined_call_operand.vmem [shape: bf16[2,128,128], index: 11, kind: input, shape index: {}]   ;;  %s7854_s12 = inlined_call_operand.vmem [shape: f32[2,1,128], index: 12, kind: input, shape index: {}]   ;;  %s7855_s13 = inlined_call_operand.vmem [shape: f32[2,1,128], index: 13, kind: input, shape index: {}]   ;;  %s7856_s14 = inlined_call_operand.vmem [shape: f32[2,1,128], index: 14, kind: input, shape index: {}]   ;;  %s7857_s15 = inlined_call_operand.vmem [shape: bf16[2,128,512], index: 15, kind: input, shape index: {}]   ;;  %s7858_s16 = inlined_call_operand.vmem [shape: f32[2,1,512], index: 16, kind: input, shape index: {}]   ;;  %s7859_s17 = inlined_call_operand.vmem [shape: bf16[2,512,128], index: 17, kind: input, shape index: {}]   ;;  %s7860_s18 = inlined_call_operand.vmem [shape: f32[2,1,128], index: 18, kind: input, shape index: {}]   ;;  %s7861_s19 = inlined_call_operand.vmem [shape: f32[1,128], index: 19, kind: input, shape index: {}]   ;;  %s7862_s20 = inlined_call_operand.vmem [shape: f32[1,128], index: 20, kind: input, shape index: {}]   ;;  %s7863_s21 = inlined_call_operand.vmem [shape: f32[128,64], index: 21, kind: input, shape index: {}]   ;;  %s7864_s22 = inlined_call_operand.vmem [shape: f32[8,64], index: 22, kind: input, shape index: {}]   ;;  %s7865_s23 = inlined_call_operand.<no memory space> [shape: f32[1,1], index: 23, kind: input, shape index: {}]   ;;  %s7866_s24 = inlined_call_operand.hbm [shape: f32[2,8,64], index: 24, kind: output, shape index: {0}]   ;;  %s7867_s25 = inlined_call_operand.vmem [shape: f32[2,8,8], index: 25, kind: output, shape index: {1}]  }
   0x1   :  { %7890 = sst [smem:[#allocation15_spill]] %s7842_s0 }
   0x2   :  { %7891 = sst [smem:[#allocation16_spill]] %s7843_s1 }
   0x3   :  { %7892 = sst [smem:[#allocation17_spill]] %s7844_s2 }
   0x4   :  { %7893 = sst [smem:[#allocation18_spill]] %s7845_s3 }
   0x5   :  { %7894 = sst [smem:[#allocation19_spill]] %s7846_s4 }
   0x6   :  { %7895 = sst [smem:[#allocation20_spill]] %s7847_s5 }
   0x7   :  { %7896 = sst [smem:[#allocation21_spill]] %s7848_s6 }
   0x8   :  { %7897 = sst [smem:[#allocation22_spill]] %s7849_s7 }
   0x9   :  { %7898 = sst [smem:[#allocation23_spill]] %s7850_s8 }
   0xa   :  { %7899 = sst [smem:[#allocation24_spill]] %s7851_s9 }
   0xb   :  { %7900 = sst [smem:[#allocation25_spill]] %s7866_s24 }
   0xc   :  { %7901 = sst [smem:[#allocation26_spill]] %s7867_s25 }
   0xd   :  { %31 = sst [smem:[#allocation3]] %s7865_s23 }
   0xe   :  { %32 = vsyncpa [#allocation5], 0 }
   0xf   :  { %34 = vsyncpa [#allocation5 + $0x1], 0  ;;  %s6492_s6 = smov 0   ;;  %s6494_s30 = smov 0  }
  0x10   :  { %s6496_s7 = smov 0   ;;  %s6498_s3 = smov 0  }
  0x11 LB: > { %7902 = sst [smem:[#allocation7_spill]] %s6339_s6  ;;  %s6513_s23 = sadd.s32 4294967295, %s6351_s3   ;;  %s6351_s3 = sphi %s6498_s3, %s7931_s3   ;;  %s6347_s7 = sphi %s6496_s7, %s7933_s7   ;;  %s6343_s30 = sphi %s6494_s30, %s7935_s30   ;;  %s6339_s6 = sphi %s6492_s6, %s7934_s6  }
  0x12   : > { %7903 = sst [smem:[#allocation8_spill]] %s6347_s7  ;;  %s4872_s26 = sadd.s32 4294967294, %s6351_s3  }
  0x13   : > { %7904 = sst [smem:[#allocation9_spill]] %s6351_s3  ;;  %s6517_s1 = sadd.s32 1, %s6351_s3  }
  0x14   : > { %7905 = sst [smem:[#allocation10_spill]] %s6517_s1  ;;  %s561_s8 = sadd.s32 1, %s6347_s7 }
  0x15   : > { %s558_s27 = ssub.s32 %s6351_s3, %s6517_s1  ;;  %p571_p0 = scmp.ne.s32.totalorder %s6347_s7, %s6343_s30 }
  0x16   : > { %p559_p1 = scmp.eq.s32.totalorder %s558_s27, 0  ;;  %p572_p2 = scmp.eq.s32.totalorder %s6513_s23, 1 }
  0x17   : > { %p577_p3 = scmp.ne.s32.totalorder %s6343_s30, %s6339_s6  ;;  %p578_p4 = scmp.eq.s32.totalorder %s4872_s26, 1 }
  0x18   : > { %s6528_s4 = scalar_select %p559_p1, %s6347_s7, %s561_s8  }
  0x19   : > { %p6530_p5 = por %p572_p2, %p571_p0  ;;  %p6534_p6 = por %p578_p4, %p577_p3 }
  0x1a   : > { %7906 = sst [smem:[#allocation11_spill]] %s6528_s4  ;;  %p4875_p7 = scmp.ge.s32.totalorder %s6351_s3, 1 }
  0x1b   : > { %s7907_s28 = scalar_select %p6530_p5, 1, 0 }
  0x1c   : > { %s7909_s9 = scalar_select %p6534_p6, 1, 0 }
  0x1d   : > { %7908 = sst [smem:[#allocation12_spill]] %s7907_s28  ;;  %p704_p8 = scmp.lt.s32.totalorder %s6351_s3, 3 }
  0x1e   : > { %7910 = sst [smem:[#allocation13_spill]] %s7909_s9 }
  0x1f   : > { %p705_p9 = pnand %p4875_p7, %p704_p8 }
  0x21   : > { %708 = sbr.rel (%p705_p9) target bundleno = 7111 (0x1bc7), region = 116 }
  0x28   : > { %s7911_s29 = sld [smem:[#allocation17_spill]]  ;;  %v6353_v1 = vmov 0   ;;  %p781_p10 = scmp.lt.s32.totalorder %s6513_s23, 1  ;;  %vm900_vm0 = vcmask 523264   ;;  %v6354_v20 = vmov 0.0   ;;  %vm1452_vm1 = vcmask 261120  }
  0x29   : > { %904 = vmatprep.subr.bf16.mxu0 %v6353_v1  ;;  %1309 = vmatprep.mubr.bf16.mxu1 %v6353_v1  ;;  %s7913_s1 = sld [smem:[#allocation15_spill]]  ;;  %s7914_s4 = sld [smem:[#allocation18_spill]]  ;;  %956 = vst [vmem:[#allocation2 + $0x19] sm:$0x7f] %v6354_v20  ;;  %vm6357_vm2 = vmmov 0  }
  0x2a   : > { %s6551_s8 = scalar_select %p781_p10, %s6513_s23, 1 }
  0x2b   : > { %s7915_s27 = sld [smem:[#allocation19_spill]]  ;;  %s7917_s5 = sld [smem:[#allocation21_spill]] }
  0x2c   : > { %7912 = sst [smem:[#allocation14_spill]] %s6551_s8  ;;  %s7877_s0 = sshll.u32 %s6551_s8, 5 }
  0x2d   : > { %s7881_s7 = smov 64   ;;  %s7923_s26 = smov 64  }
  0x2e   : > { %v5795_v0 = vld [vmem:[%s7911_s29] sm:$0xff]   ;;  %v5796_v2 = vld [vmem:[%s7911_s29 + $0x8] sm:$0xff]   ;;  %v5797_v3 = vld [vmem:[%s7911_s29 + $0x10] sm:$0xff]   ;;  %s5307_s25 = sshll.u32 %s6513_s23, 7 }
  0x2f   : > { %905 = vmatpush1.bf16.msra.mxu0 %v5795_v0  ;;  %s6563_s2 = scalar_lea.vmem %s7913_s1, %s7877_s0  ;;  %v5798_v4 = vld [vmem:[%s7911_s29 + $0x18] sm:$0xff]   ;;  %v5799_v7 = vld [vmem:[%s7911_s29 + $0x20] sm:$0xff]   ;;  %v5800_v10 = vld [vmem:[%s7911_s29 + $0x28] sm:$0xff]   ;;  %s7918_s1 = sld [smem:[#allocation24_spill]] }
  0x30   : > { %906 = vmatprep.subr.bf16.mxu0 %v6353_v1  ;;  %v797_v5 = vld [vmem:[%s6563_s2 + $0x8] sm:$0xff]  ;;  %v799_v6 = vld [vmem:[%s6563_s2 + $0x18] sm:$0xff]  ;;  %v4895_v9 = vld [vmem:[%s7914_s4] ss:$0 sm:$0xff]  ;;  %s7916_s4 = sld [smem:[#allocation20_spill]]  ;;  %s7922_s0 = sld [smem:[#allocation16_spill]] }
  0x31   : > { %v801_v8 = vpack.c.bf16 %v799_v6, %v797_v5  ;;  %963 = vadd.xlane.f32.xlu0 %v4895_v9  ;;  %953 = vst [vmem:[#allocation2 + $0x8] sm:$0x1] %v4895_v9  ;;  %v5801_v11 = vld [vmem:[%s7911_s29 + $0x30] sm:$0xff]   ;;  %v5802_v12 = vld [vmem:[%s7911_s29 + $0x38] sm:$0xff]   ;;  %v5803_v13 = vld [vmem:[%s7911_s29 + $0x40] sm:$0xff]  }
  0x32   : > { %v5804_v14 = vld [vmem:[%s7911_s29 + $0x48] sm:$0xff]   ;;  %v5805_v15 = vld [vmem:[%s7911_s29 + $0x50] sm:$0xff]   ;;  %v5806_v16 = vld [vmem:[%s7911_s29 + $0x58] sm:$0xff]  }
  0x33   : > { %907 = vmatpush1.bf16.msra.mxu0 %v5796_v2  ;;  %4894 = vmatprep.mubr.msk.bf16.mxu0 %vm900_vm0, %v801_v8  ;;  %v796_v17 = vld [vmem:[%s6563_s2] sm:$0xff]  ;;  %v798_v18 = vld [vmem:[%s6563_s2 + $0x10] sm:$0xff]  ;;  %v827_v23 = vld [vmem:[%s7915_s27 + $0x8] sm:$0xff]  ;;  %s7921_s2 = sshll.u32 %s6551_s8, 5  ;;  %s7925_s8 = sld [smem:[#allocation25_spill]] }
  0x34   : > { %908 = vmatprep.subr.bf16.mxu0 %v6353_v1  ;;  %v800_v19 = vpack.c.bf16 %v798_v18, %v796_v17  ;;  %v826_v21 = vld [vmem:[%s7915_s27] sm:$0xff] }
  0x35   : > { %v4897_v54 = vld [vmem:[%s7917_s5] ss:$0 sm:$0xff]  ;;  %s7920_s5 = sld [smem:[#allocation23_spill]] }
  0x36   : > { %v4896_v52 = vld [vmem:[%s7916_s4] ss:$0 sm:$0xff]  ;;  %s7919_s4 = sld [smem:[#allocation22_spill]]  ;;  %s6769_s27 = scalar_lea.vmem %s7922_s0, %s7921_s2 }
  0x37   : > { %909 = vmatpush1.bf16.msra.mxu0 %v5797_v3  ;;  %s772_s2 = sand.u32 1, %s6343_s30   ;;  %s6358_s0 = smov [#allocation4]  }
  0x38   : > { %910 = vmatprep.subr.bf16.mxu0 %v6353_v1  ;;  %s4876_s6 = sshll.u32 %s772_s2, 3  ;;  %s4757_s3 = scalar_lea.sflag [#allocation5], %s772_s2 }
  0x39   : > { %s774_s29 = scalar_lea.vmem [#allocation4], %s4876_s6  ;;  %s7802_s9 = scalar_lea.hbm %s7925_s8, %s5307_s25 }
  0x3a   : > { %s4774_s24 = sshll.u32 %s774_s29, 4  ;;  %s4775_s24 = int_to_ptr.vmem [resolvable:$true] %s4774_s24 }
  0x3b   : > { %911 = vmatpush1.bf16.msra.mxu0 %v5798_v4  ;;  %s6289_s6 = scalar_lea.vmem %s4775_s24, 128 }
  0x3c   : > { %912 = vmatprep.subr.bf16.mxu0 %v6353_v1  ;;  %p6290_p11 = scmp.ne.s32.totalorder %s4775_s24, %s6289_s6 }
  0x3e   : > { %p6291_p12 = pnand %p6290_p11, %p6530_p5 }
  0x3f   : > { %913 = vmatpush1.bf16.msra.mxu0 %v5799_v7 }
  0x40   : > { %914 = vmatprep.subr.bf16.mxu0 %v6353_v1  ;;  %p6292_p13 = pneg %p6291_p12 }
  0x43   : > { %915 = vmatpush1.bf16.msra.mxu0 %v5800_v10 }
  0x44   : > { %916 = vmatprep.subr.bf16.mxu0 %v6353_v1 }
  0x47   : > { %917 = vmatpush1.bf16.msra.mxu0 %v5801_v11 }
  0x48   : > { %918 = vmatprep.subr.bf16.mxu0 %v6353_v1 }
  0x4b   : > { %919 = vmatpush1.bf16.msra.mxu0 %v5802_v12 }
  0x4c   : > { %920 = vmatprep.subr.bf16.mxu0 %v6353_v1 }
  0x4f   : > { %921 = vmatpush1.bf16.msra.mxu0 %v5803_v13 }
  0x50   : > { %922 = vmatprep.subr.bf16.mxu0 %v6353_v1 }
  0x53   : > { %923 = vmatpush1.bf16.msra.mxu0 %v5804_v14 }
  0x54   : > { %924 = vmatprep.subr.bf16.mxu0 %v6353_v1 }
  0x57   : > { %925 = vmatpush1.bf16.msra.mxu0 %v5805_v15 }
  0x58   : > { %926 = vmatprep.subr.bf16.mxu0 %v6353_v1 }
  0x5b   : > { %927 = vmatpush1.bf16.msra.mxu0 %v5806_v16 }
  0x5e   : > { %937 = vmatmul.mubr.bf16.vlgmr.msra.gmra.mrb[0].mxu0 %v800_v19  ;;  %v5807_v19 = vld [vmem:[%s7918_s1 + $0x4] ss:$12 sps:$4 sm:$0xff]  }
  0x5f   : > { %1277 = vmatprep.subr.bf16.mxu1 %v5807_v19 }
  0xbe   : > { %v964_v24 = vpop.xlane.xlu0 %963 }
  0xbf   : > { %v972_v30 = vmul.f32 0.0078125, %v964_v24  ;;  %v5813_v24 = vld [vmem:[%s7918_s1 + $0x34] ss:$12 sps:$4 sm:$0xff]  }
  0xc1   : > { %v976_v31 = vsub.f32 %v4895_v9, %v972_v30 }
  0xc3   : > { %v980_v33 = vmul.f32 %v976_v31, %v976_v31 }
 0x131   : > { %v938_v22 = vpop.f32.mrb[0].mxu0 }
 0x132   : > { %v939_v25 = vadd.f32 %v938_v22, %v826_v21  ;;  %v940_v26 = vpop.f32.mrb[1].mxu0  ;;  %v5809_v21 = vld [vmem:[%s7918_s1] ss:$12 sps:$4 sm:$0xff]   ;;  %v5810_v22 = vld [vmem:[%s7918_s1 + $0x1c] ss:$12 sps:$4 sm:$0xff]  }
 0x133   : > { %v941_v27 = vpop.f32.mrb[2].mxu0  ;;  %1278 = vmatpush1.bf16.msra.mxu1 %v5809_v21  ;;  %v5833_v21 = vld [vmem:[%s7918_s1 + $0x38] ss:$12 sps:$4 sm:$0xff]  }
 0x134   : > { %954 = vst [vmem:[#allocation2 + $0x9] sm:$0xff] %v939_v25  ;;  %v942_v28 = vadd.f32 %v941_v27, %v827_v23  ;;  %v943_v29 = vpop.f32.mrb[3].mxu0  ;;  %v5812_v23 = vld [vmem:[%s7918_s1 + $0x18] ss:$12 sps:$4 sm:$0xff]   ;;  %1279 = vmatprep.subr.bf16.mxu1 %v5810_v22  ;;  %v5815_v25 = vld [vmem:[%s7918_s1 + $0x30] ss:$12 sps:$4 sm:$0xff]  }
 0x136   : > { %955 = vst [vmem:[#allocation2 + $0x11] sm:$0xff] %v942_v28 }
 0x137   : > { %1280 = vmatpush1.bf16.msra.mxu1 %v5812_v23 }
 0x138   : > { %1281 = vmatprep.subr.bf16.mxu1 %v5813_v24 }
 0x13b   : > { %v958_v32 = vld [vmem:[#allocation2 + $0x8] sm:$0xff]  ;;  %1282 = vmatpush1.bf16.msra.mxu1 %v5815_v25  ;;  %v5834_v25 = vld [vmem:[%s7918_s1 + $0x50] ss:$12 sps:$4 sm:$0xff]  }
 0x13c   : > { %965 = vadd.xlane.f32.xlu0 %v958_v32 }
 0x13d   : > { %v959_v34 = vld [vmem:[#allocation2 + $0x10] sm:$0xff]  ;;  %v960_v35 = vld [vmem:[#allocation2 + $0x18] sm:$0xff] }
 0x13e   : > { %967 = vadd.xlane.f32.xlu1 %v959_v34 }
 0x140   : > { %984 = vadd.xlane.f32.xlu0 %v980_v33 }
 0x142   : > { %969 = vadd.xlane.f32.xlu1 %v960_v35 }
 0x1c9   : > { %v966_v36 = vpop.xlane.xlu0 %965 }
 0x1ca   : > { %v973_v37 = vmul.f32 0.0078125, %v966_v36 }
 0x1cb   : > { %v968_v38 = vpop.xlane.xlu1 %967 }
 0x1cc   : > { %v977_v39 = vsub.f32 %v958_v32, %v973_v37  ;;  %v974_v40 = vmul.f32 0.0078125, %v968_v38  ;;  %v5816_v38 = vld [vmem:[%s7918_s1 + $0x4c] ss:$12 sps:$4 sm:$0xff]  }
 0x1cd   : > { %v985_v41 = vpop.xlane.xlu0 %984  ;;  %1283 = vmatprep.subr.bf16.mxu1 %v5816_v38 }
 0x1ce   : > { %v978_v42 = vsub.f32 %v959_v34, %v974_v40  ;;  %v992_v43 = vmul.f32 0.0078125, %v985_v41  ;;  %v981_v44 = vmul.f32 %v977_v39, %v977_v39  ;;  %v5819_v40 = vld [vmem:[%s7918_s1 + $0x64] ss:$12 sps:$4 sm:$0xff]   ;;  %v5821_v41 = vld [vmem:[%s7918_s1 + $0x60] ss:$12 sps:$4 sm:$0xff]  }
 0x1cf   : > { %v970_v45 = vpop.xlane.xlu1 %969 }
 0x1d0   : > { %v996_v46 = vadd.f32 1e-05, %v992_v43  ;;  %v975_v47 = vmul.f32 0.0078125, %v970_v45  ;;  %986 = vadd.xlane.f32.xlu1 %v981_v44  ;;  %v982_v48 = vmul.f32 %v978_v42, %v978_v42  ;;  %v5824_v43 = vld [vmem:[%s7918_s1 + $0x78] ss:$12 sps:$4 sm:$0xff]  }
 0x1d1   : > { %v5825_v44 = vld [vmem:[%s7918_s1 + $0x94] ss:$12 sps:$4 sm:$0xff]   ;;  %v5827_v45 = vld [vmem:[%s7918_s1 + $0x90] ss:$12 sps:$4 sm:$0xff]  }
 0x1d2   : > { %6047 = vrsqrt.f32 %v996_v46  ;;  %v979_v49 = vsub.f32 %v960_v35, %v975_v47  ;;  %988 = vadd.xlane.f32.xlu0 %v982_v48  ;;  %v5828_v46 = vld [vmem:[%s7918_s1 + $0xac] ss:$12 sps:$4 sm:$0xff]   ;;  %v5830_v47 = vld [vmem:[%s7918_s1 + $0xa8] ss:$12 sps:$4 sm:$0xff]  }
 0x1d3   : > { %v5831_v48 = vld [vmem:[%s7918_s1 + $0x8] ss:$12 sps:$4 sm:$0xff]  }
 0x1d4   : > { %v983_v50 = vmul.f32 %v979_v49, %v979_v49 }
 0x1d6   : > { %990 = vadd.xlane.f32.xlu1 %v983_v50 }
 0x1dc   : > { %v6048_v51 = vpop.eup %6047 }
 0x1dd   : > { %v1004_v53 = vmul.f32 %v6048_v51, %v976_v31 }
 0x1df   : > { %v1014_v55 = vmul.f32 %v4896_v52, %v1004_v53 }
 0x1e1   : > { %v6622_v56 = vadd.f32 %v4897_v54, %v1014_v55 }
 0x1e3   : > { %1034 = vadd.xlane.f32.xlu0 %v6622_v56 }
 0x25d   : > { %v987_v57 = vpop.xlane.xlu1 %986 }
 0x25e   : > { %v993_v58 = vmul.f32 0.0078125, %v987_v57 }
 0x25f   : > { %v989_v59 = vpop.xlane.xlu0 %988 }
 0x260   : > { %v997_v60 = vadd.f32 1e-05, %v993_v58  ;;  %v994_v61 = vmul.f32 0.0078125, %v989_v59 }
 0x262   : > { %6049 = vrsqrt.f32 %v997_v60  ;;  %v998_v62 = vadd.f32 1e-05, %v994_v61 }
 0x263   : > { %v991_v63 = vpop.xlane.xlu1 %990 }
 0x264   : > { %6051 = vrsqrt.f32 %v998_v62  ;;  %v995_v0 = vmul.f32 0.0078125, %v991_v63 }
 0x266   : > { %v999_v2 = vadd.f32 1e-05, %v995_v0  ;;  %v4898_v0 = vld [vmem:[%s7919_s4] ss:$0 sm:$0xff] }
 0x268   : > { %6053 = vrsqrt.f32 %v999_v2 }
 0x26c   : > { %v6050_v3 = vpop.eup %6049 }
 0x26d   : > { %v1005_v4 = vmul.f32 %v6050_v3, %v977_v39  ;;  %v5818_v39 = vld [vmem:[%s7918_s1 + $0x48] ss:$12 sps:$4 sm:$0xff]  }
 0x26e   : > { %v6052_v5 = vpop.eup %6051  ;;  %1284 = vmatpush1.bf16.msra.mxu1 %v5818_v39 }
 0x26f   : > { %v1015_v6 = vmul.f32 %v4896_v52, %v1005_v4  ;;  %v1006_v7 = vmul.f32 %v6052_v5, %v978_v42  ;;  %1285 = vmatprep.subr.bf16.mxu1 %v5819_v40  ;;  %v5822_v42 = vld [vmem:[%s7918_s1 + $0x7c] ss:$12 sps:$4 sm:$0xff]  }
 0x270   : > { %v1035_v8 = vpop.xlane.xlu0 %1034 }
 0x271   : > { %v1042_v9 = vmul.f32 0.0078125, %v1035_v8  ;;  %v6625_v10 = vadd.f32 %v4897_v54, %v1015_v6  ;;  %v1016_v11 = vmul.f32 %v4896_v52, %v1006_v7  ;;  %v4899_v6 = vld [vmem:[%s7920_s5] ss:$0 sm:$0xff] }
 0x272   : > { %v6054_v12 = vpop.eup %6053  ;;  %1286 = vmatpush1.bf16.msra.mxu1 %v5821_v41 }
 0x273   : > { %v6628_v13 = vsub.f32 %v6622_v56, %v1042_v9  ;;  %1036 = vadd.xlane.f32.xlu1 %v6625_v10  ;;  %v6631_v14 = vadd.f32 %v4897_v54, %v1016_v11  ;;  %v1007_v15 = vmul.f32 %v6054_v12, %v979_v49  ;;  %1287 = vmatprep.subr.bf16.mxu1 %v5822_v42 }
 0x275   : > { %1038 = vadd.xlane.f32.xlu0 %v6631_v14  ;;  %v1017_v16 = vmul.f32 %v4896_v52, %v1007_v15  ;;  %v1050_v18 = vmul.f32 %v6628_v13, %v6628_v13 }
 0x276   : > { %1288 = vmatpush1.bf16.msra.mxu1 %v5824_v43 }
 0x277   : > { %v6634_v17 = vadd.f32 %v4897_v54, %v1017_v16  ;;  %1289 = vmatprep.subr.bf16.mxu1 %v5825_v44 }
 0x279   : > { %1040 = vadd.xlane.f32.xlu1 %v6634_v17  ;;  %1054 = vadd.xlane.f32.xlu0 %v1050_v18 }
 0x27a   : > { %1290 = vmatpush1.bf16.msra.mxu1 %v5827_v45 }
 0x27b   : > { %1291 = vmatprep.subr.bf16.mxu1 %v5828_v46 }
 0x27e   : > { %1292 = vmatpush1.bf16.msra.mxu1 %v5830_v47 }
 0x27f   : > { %5515 = vmatprep.subr.bf16.mxu1 %v5831_v48 }
 0x300   : > { %v1037_v26 = vpop.xlane.xlu1 %1036 }
 0x301   : > { %v1043_v27 = vmul.f32 0.0078125, %v1037_v26  ;;  %v5835_v26 = vld [vmem:[%s7918_s1 + $0x68] ss:$12 sps:$4 sm:$0xff]  }
 0x302   : > { %v1039_v28 = vpop.xlane.xlu0 %1038 }
 0x303   : > { %v1047_v29 = vsub.f32 %v6625_v10, %v1043_v27  ;;  %v1044_v30 = vmul.f32 0.0078125, %v1039_v28  ;;  %v5836_v27 = vld [vmem:[%s7918_s1 + $0x80] ss:$12 sps:$4 sm:$0xff]   ;;  %v5837_v28 = vld [vmem:[%s7918_s1 + $0x98] ss:$12 sps:$4 sm:$0xff]  }
 0x305   : > { %v1048_v31 = vsub.f32 %v6631_v14, %v1044_v30  ;;  %v1051_v32 = vmul.f32 %v1047_v29, %v1047_v29  ;;  %v1134_v30 = vlaneseq }
 0x306   : > { %v1041_v33 = vpop.xlane.xlu1 %1040  ;;  %v1055_v49 = vpop.xlane.xlu0 %1054 }
 0x307   : > { %v1045_v34 = vmul.f32 0.0078125, %v1041_v33  ;;  %1056 = vadd.xlane.f32.xlu1 %v1051_v32  ;;  %v1052_v35 = vmul.f32 %v1048_v31, %v1048_v31  ;;  %v1062_v50 = vmul.f32 0.0078125, %v1055_v49  ;;  %v1132_v33 = vld [vmem:[%s7852_s10] sm:$0x7] }
 0x309   : > { %v1049_v36 = vsub.f32 %v6634_v17, %v1045_v34  ;;  %1058 = vadd.xlane.f32.xlu0 %v1052_v35  ;;  %v1066_v51 = vadd.f32 1e-05, %v1062_v50 }
 0x30b   : > { %v1053_v37 = vmul.f32 %v1049_v36, %v1049_v36  ;;  %6055 = vrsqrt.f32 %v1066_v51 }
 0x30d   : > { %1060 = vadd.xlane.f32.xlu1 %v1053_v37 }
 0x315   : > { %v6056_v61 = vpop.eup %6055 }
 0x316   : > { %v1074_v63 = vmul.f32 %v6056_v61, %v6628_v13  ;;  %v5832_v13 = vld [vmem:[%s7918_s1 + $0x20] ss:$12 sps:$4 sm:$0xff]  }
 0x318   : > { %v1084_v4 = vmul.f32 %v4898_v0, %v1074_v63 }
 0x31a   : > { %v1094_v8 = vadd.f32 %v4899_v6, %v1084_v4 }
 0x394   : > { %v1057_v52 = vpop.xlane.xlu1 %1056 }
 0x395   : > { %v1063_v53 = vmul.f32 0.0078125, %v1057_v52 }
 0x396   : > { %v1059_v54 = vpop.xlane.xlu0 %1058 }
 0x397   : > { %v1067_v55 = vadd.f32 1e-05, %v1063_v53  ;;  %v1064_v57 = vmul.f32 0.0078125, %v1059_v54 }
 0x399   : > { %6057 = vrsqrt.f32 %v1067_v55  ;;  %v1068_v58 = vadd.f32 1e-05, %v1064_v57 }
 0x39a   : > { %v1061_v59 = vpop.xlane.xlu1 %1060 }
 0x39b   : > { %6059 = vrsqrt.f32 %v1068_v58  ;;  %v1065_v60 = vmul.f32 0.0078125, %v1061_v59 }
 0x39d   : > { %v1069_v62 = vadd.f32 1e-05, %v1065_v60 }
 0x39f   : > { %6061 = vrsqrt.f32 %v1069_v62 }
 0x3a3   : > { %v6058_v2 = vpop.eup %6057 }
 0x3a4   : > { %v1075_v3 = vmul.f32 %v6058_v2, %v1047_v29  ;;  %v5838_v29 = vld [vmem:[%s7918_s1 + $0xb0] ss:$12 sps:$4 sm:$0xff]  }
 0x3a5   : > { %v6060_v5 = vpop.eup %6059 }
 0x3a6   : > { %v1085_v7 = vmul.f32 %v4898_v0, %v1075_v3  ;;  %v1076_v11 = vmul.f32 %v6060_v5, %v1048_v31  ;;  %v6722_v31 = vshrl.u32 %v1134_v30, 7 }
 0x3a8   : > { %v1095_v9 = vadd.f32 %v4899_v6, %v1085_v7  ;;  %v1086_v18 = vmul.f32 %v4898_v0, %v1076_v11  ;;  %v6725_v32 = vsub.s32 0, %v6722_v31  ;;  %v6731_v34 = vsub.s32 1, %v6722_v31 }
 0x3a9   : > { %v6062_v12 = vpop.eup %6061  ;;  %v6746_v60 = vsub.s32 2, %v6722_v31 }
 0x3aa   : > { %v1098_v15 = vpack.c.bf16 %v1095_v9, %v1094_v8  ;;  %v1077_v16 = vmul.f32 %v6062_v12, %v1049_v36  ;;  %v1096_v23 = vadd.f32 %v4899_v6, %v1086_v18  ;;  %v1137_v35 = vrot.slane %v1132_v33, %v6725_v32 }
 0x3ab   : > { %v1141_v37 = vrot.slane %v1132_v33, %v6731_v34  ;;  %v1145_v61 = vrot.slane %v1132_v33, %v6746_v60 }
 0x3ac   : > { %1310 = vmatmul.mubr.bf16.vlgmr.msra.gmra.mrb[0].mxu1 %v1098_v15  ;;  %v1087_v19 = vmul.f32 %v4898_v0, %v1077_v16 }
 0x3ad   : > { %5516 = vmatpush3.bf16.msra.mxu1 %v5831_v48  ;;  %1319 = vmatprep.mubr.bf16.mxu1 %v6353_v1 }
 0x3ae   : > { %5517 = vmatprep.subr.bf16.mxu1 %v5832_v13  ;;  %v1097_v22 = vadd.f32 %v4899_v6, %v1087_v19 }
 0x3b0   : > { %v1099_v24 = vpack.c.bf16 %v1097_v22, %v1096_v23 }
 0x3b1   : > { %5518 = vmatpush3.bf16.msra.mxu1 %v5832_v13 }
 0x3b2   : > { %5519 = vmatprep.subr.bf16.mxu1 %v5833_v21 }
 0x3b4   : > { %1320 = vmatmul.mubr.bf16.gmra.mrb[4].mxu1 %v1099_v24 }
 0x3b5   : > { %5520 = vmatpush3.bf16.msra.mxu1 %v5833_v21  ;;  %5531 = vmatprep.mubr.bf16.mxu1 %v1098_v15  ;;  %v1028_v21 = vld [vmem:[%s6769_s27] sm:$0xff] }
 0x3b6   : > { %5521 = vmatprep.subr.bf16.mxu1 %v5834_v25 }
 0x3b9   : > { %5522 = vmatpush3.bf16.msra.mxu1 %v5834_v25 }
 0x3ba   : > { %5523 = vmatprep.subr.bf16.mxu1 %v5835_v26 }
 0x3bd   : > { %5524 = vmatpush3.bf16.msra.mxu1 %v5835_v26  ;;  %v1029_v26 = vld [vmem:[%s6769_s27 + $0x8] sm:$0xff] }
 0x3be   : > { %5525 = vmatprep.subr.bf16.mxu1 %v5836_v27 }
 0x3c1   : > { %5526 = vmatpush3.bf16.msra.mxu1 %v5836_v27  ;;  %v1030_v27 = vld [vmem:[%s6769_s27 + $0x10] sm:$0xff] }
 0x3c2   : > { %5527 = vmatprep.subr.bf16.mxu1 %v5837_v28 }
 0x3c5   : > { %5528 = vmatpush3.bf16.msra.mxu1 %v5837_v28 }
 0x3c6   : > { %5529 = vmatprep.subr.bf16.mxu1 %v5838_v29 }
 0x3c9   : > { %5530 = vmatpush3.bf16.msra.mxu1 %v5838_v29 }
 0x3cc   : > { %5532 = vmatmul.mubr.bf16.vlgmr.msra.gmra.mrb[8].mxu1 %v1099_v24 }
 0x47f   : > { %v1311_v36 = vpop.f32.mrb[0].mxu1 }
 0x480   : > { %v1313_v38 = vpop.f32.mrb[1].mxu1  ;;  %v1312_v40 = vadd.f32 %v1311_v36, %v1137_v35 }
 0x481   : > { %v1315_v39 = vpop.f32.mrb[2].mxu1  ;;  %v1314_v43 = vadd.f32 %v1313_v38, %v1141_v37 }
 0x482   : > { %v1316_v41 = vadd.f32 %v1315_v39, %v1137_v35  ;;  %v1317_v42 = vpop.f32.mrb[3].mxu1 }
 0x483   : > { %v1318_v44 = vadd.f32 %v1317_v42, %v1141_v37 }
 0x484   : > { %v1379_v45 = vpack.c.bf16 %v1316_v41, %v1312_v40 }
 0x485   : > { %v1381_v46 = vpack.c.bf16 %v1318_v44, %v1314_v43 }
 0x486   : > { %5539 = vmatprep.mubr.msk.bf16.mxu0 %vm900_vm0, %v1379_v45 }
 0x487   : > { %1564 = vrot.lane.b32.xlu0 %v1381_v46, %s7881_s7  ;;  %v1321_v47 = vpop.f32.mrb[4].mxu1  ;;  %5723 = vmatprep.subr.msk.bf16.mxu0 %vm900_vm0, %v1381_v46  ;;  %v1390_v48 = vsel %vm900_vm0, %v1381_v46, 0 }
 0x488   : > { %v1323_v49 = vpop.f32.mrb[5].mxu1  ;;  %5536 = vmatpush3.bf16.xpose.msra.mxu0 %v1390_v48  ;;  %v1322_v51 = vadd.f32 %v1321_v47, %v1137_v35 }
 0x489   : > { %v1325_v50 = vpop.f32.mrb[6].mxu1  ;;  %v1324_v54 = vadd.f32 %v1323_v49, %v1141_v37 }
 0x48a   : > { %v1326_v52 = vadd.f32 %v1325_v50, %v1137_v35  ;;  %v1327_v53 = vpop.f32.mrb[7].mxu1 }
 0x48b   : > { %v1328_v55 = vadd.f32 %v1327_v53, %v1141_v37  ;;  %v1031_v37 = vld [vmem:[%s6769_s27 + $0x18] sm:$0xff] }
 0x48c   : > { %v1380_v57 = vpack.c.bf16 %v1326_v52, %v1322_v51 }
 0x48d   : > { %v1382_v58 = vpack.c.bf16 %v1328_v55, %v1324_v54 }
 0x48f   : > { %1566 = vrot.lane.b32.xlu1 %v1382_v58, %s7881_s7  ;;  %5724 = vmatprep.subr.msk.bf16.mxu0 %vm900_vm0, %v1382_v58  ;;  %v1393_v59 = vsel %vm900_vm0, %v1382_v58, 0 }
 0x490   : > { %5538 = vmatpush3.bf16.xpose.msra.mxu0 %v1393_v59 }
 0x493   : > { %1558 = vrot.lane.b32.xlu1 %v1379_v45, %s7881_s7 }
 0x497   : > { %1560 = vrot.lane.b32.xlu1 %v1380_v57, %s7881_s7  ;;  %5540 = vmatmul.mubr.msk.bf16.vlgmr.msra.gmra.mrb[4].mxu0 %vm900_vm0, %v1380_v57 }
 0x49f   : > { %v5533_v62 = vpop.f32.mrb[8].mxu1 }
 0x4a0   : > { %v1364_v63 = vpop.f32.mrb[9].mxu1  ;;  %v1373_v2 = vadd.f32 %v5533_v62, %v1145_v61 }
 0x4a1   : > { %v5534_v0 = vpop.f32.mrb[10].mxu1  ;;  %v1365_v5 = vadd.f32 %v1364_v63, %v1145_v61 }
 0x4a2   : > { %v1376_v3 = vadd.f32 %v5534_v0, %v1145_v61  ;;  %v1367_v4 = vpop.f32.mrb[11].mxu1 }
 0x4a3   : > { %v1368_v6 = vadd.f32 %v1367_v4, %v1145_v61 }
 0x4a4   : > { %v6749_v7 = vpack.c.bf16 %v1376_v3, %v1373_v2 }
 0x4a5   : > { %v6751_v8 = vpack.c.bf16 %v1368_v6, %v1365_v5 }
 0x4a7   : > { %5543 = vmatprep.subr.bf16.mxu0 %v6751_v8 }
 0x4a8   : > { %5544 = vmatpush3.bf16.msra.mxu0 %v6751_v8 }
 0x4a9   : > { %5545 = vmatprep.subr.bf16.mxu0 %v6749_v7 }
 0x4ac   : > { %5546 = vmatpush3.bf16.msra.mxu0 %v6749_v7 }
 0x4f9   : > { %v1565_v9 = vpop.permute.xlu0 %1564 }
 0x4fa   : > { %v1575_v11 = vsel %vm900_vm0, %v1565_v9, 0  ;;  %5725 = vmatprep.subr.msk.bf16.mxu1 %vm900_vm0, %v1565_v9 }
 0x4fb   : > { %5552 = vmatpush3.bf16.xpose.msra.mxu1 %v1575_v11 }
 0x501   : > { %v1567_v12 = vpop.permute.xlu1 %1566 }
 0x502   : > { %v1578_v15 = vsel %vm900_vm0, %v1567_v12, 0  ;;  %5726 = vmatprep.subr.msk.bf16.mxu1 %vm900_vm0, %v1567_v12 }
 0x503   : > { %5554 = vmatpush3.bf16.xpose.msra.mxu1 %v1578_v15 }
 0x505   : > { %v1559_v13 = vpop.permute.xlu1 %1558 }
 0x506   : > { %5555 = vmatprep.mubr.msk.bf16.mxu1 %vm900_vm0, %v1559_v13 }
 0x509   : > { %v1561_v16 = vpop.permute.xlu1 %1560 }
 0x50a   : > { %5556 = vmatmul.mubr.msk.bf16.vlgmr.msra.gmra.mrb[12].mxu1 %vm900_vm0, %v1561_v16 }
 0x50b   : > { %2210 = vmatprep.mubr.bf16.mxu1 %v6353_v1 }
 0x56a   : > { %v5541_v18 = vpop.f32.mrb[4].mxu0 }
 0x56b   : > { %v1429_v19 = vpop.f32.mrb[5].mxu0  ;;  %v1446_v22 = vmul.f32 0.125, %v5541_v18 }
 0x56c   : > { %v1444_v23 = vmul.f32 0.125, %v1429_v19  ;;  %v5542_v24 = vpop.f32.mrb[6].mxu0 }
 0x56d   : > { %v1432_v25 = vpop.f32.mrb[7].mxu0  ;;  %v1447_v30 = vmul.f32 0.125, %v5542_v24  ;;  %v1450_v36 = vadd.f32 %v1446_v22, %v1030_v27 }
 0x56e   : > { %v1445_v28 = vmul.f32 0.125, %v1432_v25  ;;  %v1448_v29 = vadd.f32 %v1444_v23, %v1028_v21 }
 0x56f   : > { %v1459_v39 = vsel %vm1452_vm1, %v1450_v36, -inf  ;;  %v1451_v40 = vadd.f32 %v1447_v30, %v1031_v37 }
 0x570   : > { %v1453_v33 = vsel %vm1452_vm1, %v1448_v29, -inf  ;;  %v1449_v35 = vadd.f32 %v1445_v28, %v1029_v26 }
 0x571   : > { %1454 = vmax.xlane.f32.xlu0 %v1453_v33  ;;  %v1462_v41 = vsel %vm1452_vm1, %v1451_v40, -inf }
 0x572   : > { %v1456_v38 = vsel %vm1452_vm1, %v1449_v35, -inf }
 0x573   : > { %1457 = vmax.xlane.f32.xlu1 %v1456_v38 }
 0x575   : > { %1460 = vmax.xlane.f32.xlu0 %v1459_v39 }
 0x579   : > { %1463 = vmax.xlane.f32.xlu0 %v1462_v41 }
 0x5dd   : > { %v5557_v42 = vpop.f32.mrb[12].mxu1 }
 0x5de   : > { %v1614_v43 = vpop.f32.mrb[13].mxu1  ;;  %v1631_v44 = vmul.f32 0.125, %v5557_v42 }
 0x5df   : > { %v1629_v45 = vmul.f32 0.125, %v1614_v43  ;;  %v5558_v46 = vpop.f32.mrb[14].mxu1 }
 0x5e0   : > { %v1617_v47 = vpop.f32.mrb[15].mxu1  ;;  %v1632_v48 = vmul.f32 0.125, %v5558_v46  ;;  %v1635_v53 = vadd.f32 %v1631_v44, %v1030_v27 }
 0x5e1   : > { %v1630_v49 = vmul.f32 0.125, %v1617_v47  ;;  %v1633_v50 = vadd.f32 %v1629_v45, %v1028_v21 }
 0x5e2   : > { %v1636_v55 = vadd.f32 %v1632_v48, %v1031_v37  ;;  %v1643_v57 = vsel %vm1452_vm1, %v1635_v53, -inf }
 0x5e3   : > { %v1637_v51 = vsel %vm1452_vm1, %v1633_v50, -inf  ;;  %v1634_v52 = vadd.f32 %v1630_v49, %v1029_v26 }
 0x5e4   : > { %1638 = vmax.xlane.f32.xlu0 %v1637_v51  ;;  %v1646_v58 = vsel %vm1452_vm1, %v1636_v55, -inf }
 0x5e5   : > { %v1640_v54 = vsel %vm1452_vm1, %v1634_v52, -inf }
 0x5e6   : > { %1641 = vmax.xlane.f32.xlu1 %v1640_v54 }
 0x5e8   : > { %1644 = vmax.xlane.f32.xlu0 %v1643_v57 }
 0x5ea   : > { %1647 = vmax.xlane.f32.xlu1 %v1646_v58 }
 0x5fe   : > { %v1455_v59 = vpop.xlane.xlu0 %1454 }
 0x5ff   : > { %v1465_v61 = vsub.f32 %v1448_v29, %v1455_v59 }
 0x600   : > { %v1458_v62 = vpop.xlane.xlu1 %1457 }
 0x601   : > { %v1469_v2 = vmul.f32 1.442695, %v1465_v61  ;;  %v1466_v3 = vsub.f32 %v1449_v35, %v1458_v62 }
 0x602   : > { %v1461_v63 = vpop.xlane.xlu0 %1460 }
 0x603   : > { %v1467_v0 = vsub.f32 %v1450_v36, %v1461_v63  ;;  %v1471_v9 = vmul.f32 1.442695, %v1466_v3 }
 0x605   : > { %v1473_v4 = vmul.f32 1.442695, %v1467_v0 }
 0x606   : > { %v1464_v5 = vpop.xlane.xlu0 %1463 }
 0x607   : > { %6063 = vpow2.f32 %v1473_v4  ;;  %v1468_v6 = vsub.f32 %v1451_v40, %v1464_v5 }
 0x608   : > { %6065 = vpow2.f32 %v1469_v2 }
 0x609   : > { %v1475_v11 = vmul.f32 1.442695, %v1468_v6 }
 0x60b   : > { %6067 = vpow2.f32 %v1475_v11 }
 0x60c   : > { %6069 = vpow2.f32 %v1471_v9 }
 0x611   : > { %v6064_v12 = vpop.eup %6063 }
 0x612   : > { %v1483_v15 = vsel %vm1452_vm1, %v6064_v12, 0.0  ;;  %v6066_v13 = vpop.eup %6065 }
 0x613   : > { %1484 = vadd.xlane.f32.xlu0 %v1483_v15  ;;  %v1477_v18 = vsel %vm1452_vm1, %v6066_v13, 0.0 }
 0x615   : > { %v6068_v16 = vpop.eup %6067 }
 0x616   : > { %v1486_v19 = vsel %vm1452_vm1, %v6068_v16, 0.0  ;;  %v6070_v21 = vpop.eup %6069 }
 0x617   : > { %1478 = vadd.xlane.f32.xlu0 %v1477_v18  ;;  %1487 = vadd.xlane.f32.xlu1 %v1486_v19  ;;  %v1480_v22 = vsel %vm1452_vm1, %v6070_v21, 0.0  ;;  %v5839_v18 = vld [vmem:[%s7853_s11] sm:$0xff]   ;;  %v5840_v19 = vld [vmem:[%s7853_s11 + $0x8] sm:$0xff]  }
 0x61b   : > { %1481 = vadd.xlane.f32.xlu1 %v1480_v22 }
 0x671   : > { %v1639_v23 = vpop.xlane.xlu0 %1638 }
 0x672   : > { %v1649_v24 = vsub.f32 %v1633_v50, %v1639_v23 }
 0x673   : > { %v1642_v25 = vpop.xlane.xlu1 %1641 }
 0x674   : > { %v1650_v27 = vsub.f32 %v1634_v52, %v1642_v25  ;;  %v1653_v29 = vmul.f32 1.442695, %v1649_v24 }
 0x675   : > { %v1645_v26 = vpop.xlane.xlu0 %1644 }
 0x676   : > { %v1651_v28 = vsub.f32 %v1635_v53, %v1645_v26  ;;  %v1655_v36 = vmul.f32 1.442695, %v1650_v27  ;;  %v5842_v26 = vld [vmem:[%s7853_s11 + $0x18] sm:$0xff]   ;;  %v5843_v27 = vld [vmem:[%s7853_s11 + $0x20] sm:$0xff]  }
 0x677   : > { %v1648_v30 = vpop.xlane.xlu1 %1647 }
 0x678   : > { %v1657_v33 = vmul.f32 1.442695, %v1651_v28  ;;  %v1652_v35 = vsub.f32 %v1636_v55, %v1648_v30  ;;  %v5844_v28 = vld [vmem:[%s7853_s11 + $0x28] sm:$0xff]   ;;  %v5846_v30 = vld [vmem:[%s7853_s11 + $0x38] sm:$0xff]  }
 0x67a   : > { %6071 = vpow2.f32 %v1657_v33  ;;  %v1659_v37 = vmul.f32 1.442695, %v1652_v35 }
 0x67b   : > { %6073 = vpow2.f32 %v1653_v29  ;;  %v5845_v29 = vld [vmem:[%s7853_s11 + $0x30] sm:$0xff]  }
 0x67c   : > { %6075 = vpow2.f32 %v1659_v37 }
 0x67d   : > { %6077 = vpow2.f32 %v1655_v36 }
 0x684   : > { %v6072_v38 = vpop.eup %6071 }
 0x685   : > { %v6074_v39 = vpop.eup %6073  ;;  %v1667_v40 = vsel %vm1452_vm1, %v6072_v38, 0.0 }
 0x686   : > { %v6076_v41 = vpop.eup %6075  ;;  %1668 = vadd.xlane.f32.xlu0 %v1667_v40  ;;  %v1661_v44 = vsel %vm1452_vm1, %v6074_v39, 0.0 }
 0x687   : > { %v1670_v42 = vsel %vm1452_vm1, %v6076_v41, 0.0  ;;  %v6078_v43 = vpop.eup %6077 }
 0x688   : > { %1671 = vadd.xlane.f32.xlu1 %v1670_v42  ;;  %v1664_v45 = vsel %vm1452_vm1, %v6078_v43, 0.0 }
 0x68a   : > { %1662 = vadd.xlane.f32.xlu0 %v1661_v44 }
 0x68c   : > { %1665 = vadd.xlane.f32.xlu1 %v1664_v45 }
 0x69d   : > { %1687 = vrot.lane.b32.xlu1 %v6749_v7, %s7881_s7 }
 0x6a0   : > { %1685 = vrot.lane.b32.xlu0 %v6751_v8, %s7881_s7  ;;  %v1485_v46 = vpop.xlane.xlu0 %1484 }
 0x6a4   : > { %v1488_v47 = vpop.xlane.xlu1 %1487  ;;  %v1479_v48 = vpop.xlane.xlu0 %1478 }
 0x6a5   : > { %6079 = vrcp.f32 %v1488_v47 }
 0x6a6   : > { %6081 = vrcp.f32 %v1479_v48 }
 0x6a7   : > { %6083 = vrcp.f32 %v1485_v46 }
 0x6a8   : > { %v1482_v49 = vpop.xlane.xlu1 %1481 }
 0x6a9   : > { %6085 = vrcp.f32 %v1482_v49 }
 0x6af   : > { %v6080_v50 = vpop.eup %6079 }
 0x6b0   : > { %v6082_v51 = vpop.eup %6081  ;;  %v1496_v54 = vmul.f32 %v6080_v50, %v6068_v16 }
 0x6b1   : > { %v6084_v52 = vpop.eup %6083  ;;  %v1493_v55 = vmul.f32 %v6082_v51, %v6066_v13 }
 0x6b2   : > { %v1495_v58 = vmul.f32 %v6084_v52, %v6064_v12 }
 0x6b3   : > { %v6086_v53 = vpop.eup %6085 }
 0x6b4   : > { %v1494_v57 = vmul.f32 %v6086_v53, %v6070_v21  ;;  %v1498_v59 = vpack.c.bf16 %v1496_v54, %v1495_v58  ;;  %v5841_v21 = vld [vmem:[%s7853_s11 + $0x10] sm:$0xff]   ;;  %v4940_v53 = vld [vmem:[%s7854_s12] ss:$0 sm:$0xff] }
 0x6b6   : > { %v1497_v7 = vpack.c.bf16 %v1494_v57, %v1493_v55 }
 0x6b8   : > { %5547 = vmatprep.mubr.msk.bf16.mxu0 %vm1452_vm1, %v1497_v7 }
 0x6b9   : > { %5548 = vmatmul.mubr.msk.bf16.vlgmr.msra.gmra.mrb[8].mxu0 %vm1452_vm1, %v1498_v59 }
 0x713   : > { %v1669_v8 = vpop.xlane.xlu0 %1668 }
 0x715   : > { %v1672_v61 = vpop.xlane.xlu1 %1671 }
 0x716   : > { %6087 = vrcp.f32 %v1672_v61 }
 0x717   : > { %v1663_v62 = vpop.xlane.xlu0 %1662 }
 0x718   : > { %6089 = vrcp.f32 %v1663_v62 }
 0x719   : > { %6091 = vrcp.f32 %v1669_v8  ;;  %v1666_v63 = vpop.xlane.xlu1 %1665 }
 0x71a   : > { %6093 = vrcp.f32 %v1666_v63 }
 0x71b   : > { %v1686_v0 = vpop.permute.xlu0 %1685 }
 0x71c   : > { %5559 = vmatprep.subr.bf16.mxu0 %v1686_v0 }
 0x71d   : > { %v1688_v2 = vpop.permute.xlu1 %1687  ;;  %5560 = vmatpush3.bf16.msra.mxu0 %v1686_v0  ;;  %v5852_v0 = vld [vmem:[%s7857_s15 + $0xc] ss:$16 sps:$4 sm:$0xff]  }
 0x71e   : > { %5561 = vmatprep.subr.bf16.mxu0 %v1688_v2 }
 0x720   : > { %v6088_v3 = vpop.eup %6087 }
 0x721   : > { %5562 = vmatpush3.bf16.msra.mxu0 %v1688_v2  ;;  %v1680_v9 = vmul.f32 %v6088_v3, %v6076_v41  ;;  %v5855_v2 = vld [vmem:[%s7857_s15 + $0x24] ss:$16 sps:$4 sm:$0xff]   ;;  %v5858_v3 = vld [vmem:[%s7857_s15 + $0x2c] ss:$16 sps:$4 sm:$0xff]  }
 0x722   : > { %v6090_v4 = vpop.eup %6089  ;;  %5567 = vmatprep.subr.bf16.mxu0 %v5839_v18 }
 0x723   : > { %v6092_v5 = vpop.eup %6091  ;;  %v1677_v11 = vmul.f32 %v6090_v4, %v6074_v39  ;;  %v5853_v4 = vld [vmem:[%s7857_s15 + $0x20] ss:$16 sps:$4 sm:$0xff]  }
 0x724   : > { %v6094_v6 = vpop.eup %6093  ;;  %v1679_v15 = vmul.f32 %v6092_v5, %v6072_v38  ;;  %v5856_v5 = vld [vmem:[%s7857_s15 + $0x28] ss:$16 sps:$4 sm:$0xff]  }
 0x725   : > { %v1678_v12 = vmul.f32 %v6094_v6, %v6078_v43 }
 0x726   : > { %v1682_v16 = vpack.c.bf16 %v1680_v9, %v1679_v15 }
 0x727   : > { %v1681_v13 = vpack.c.bf16 %v1678_v12, %v1677_v11 }
 0x729   : > { %5563 = vmatprep.mubr.msk.bf16.mxu0 %vm1452_vm1, %v1681_v13 }
 0x72a   : > { %5564 = vmatmul.mubr.msk.bf16.vlgmr.msra.gmra.mrb[12].mxu0 %vm1452_vm1, %v1682_v16 }
 0x72b   : > { %5568 = vmatpush3.bf16.msra.mxu0 %v5839_v18 }
 0x72c   : > { %5569 = vmatprep.subr.bf16.mxu0 %v5840_v19 }
 0x72f   : > { %5570 = vmatpush3.bf16.msra.mxu0 %v5840_v19 }
 0x730   : > { %5571 = vmatprep.subr.bf16.mxu0 %v5841_v21 }
 0x733   : > { %5572 = vmatpush3.bf16.msra.mxu0 %v5841_v21 }
 0x734   : > { %5573 = vmatprep.subr.bf16.mxu0 %v5842_v26 }
 0x737   : > { %5574 = vmatpush3.bf16.msra.mxu0 %v5842_v26 }
 0x738   : > { %5575 = vmatprep.subr.bf16.mxu0 %v5843_v27 }
 0x73b   : > { %5576 = vmatpush3.bf16.msra.mxu0 %v5843_v27 }
 0x73c   : > { %5577 = vmatprep.subr.bf16.mxu0 %v5844_v28 }
 0x73f   : > { %5578 = vmatpush3.bf16.msra.mxu0 %v5844_v28  ;;  %v5861_v28 = vld [vmem:[%s7857_s15 + $0x44] ss:$16 sps:$4 sm:$0xff]  }
 0x740   : > { %5579 = vmatprep.subr.bf16.mxu0 %v5845_v29 }
 0x743   : > { %5580 = vmatpush3.bf16.msra.mxu0 %v5845_v29  ;;  %v5864_v29 = vld [vmem:[%s7857_s15 + $0x4c] ss:$16 sps:$4 sm:$0xff]  }
 0x744   : > { %5581 = vmatprep.subr.bf16.mxu0 %v5846_v30 }
 0x747   : > { %5582 = vmatpush3.bf16.msra.mxu0 %v5846_v30  ;;  %v5859_v30 = vld [vmem:[%s7857_s15 + $0x40] ss:$16 sps:$4 sm:$0xff]  }
 0x748   : > { %2231 = vmatprep.subr.bf16.mxu0 %v5852_v0 }
 0x78c   : > { %v5549_v22 = vpop.f32.mrb[8].mxu0 }
 0x78d   : > { %v1541_v23 = vpop.f32.mrb[9].mxu0 }
 0x78e   : > { %v5550_v24 = vpop.f32.mrb[10].mxu0 }
 0x78f   : > { %v1544_v25 = vpop.f32.mrb[11].mxu0 }
 0x7fd   : > { %v5565_v33 = vpop.f32.mrb[12].mxu0 }
 0x7fe   : > { %v1731_v35 = vpop.f32.mrb[13].mxu0 }
 0x7ff   : > { %v5566_v36 = vpop.f32.mrb[14].mxu0 }
 0x800   : > { %v5780_v37 = vpack.i.bf16 %v5566_v36, %v5565_v33  ;;  %v1734_v38 = vpop.f32.mrb[15].mxu0  ;;  %v5862_v33 = vld [vmem:[%s7857_s15 + $0x48] ss:$16 sps:$4 sm:$0xff]   ;;  %v5870_v36 = vld [vmem:[%s7857_s15 + $0x6c] ss:$16 sps:$4 sm:$0xff]  }
 0x801   : > { %v5775_v39 = vpack.i.bf16 %v1734_v38, %v1731_v35  ;;  %v5867_v35 = vld [vmem:[%s7857_s15 + $0x64] ss:$16 sps:$4 sm:$0xff]   ;;  %v5868_v38 = vld [vmem:[%s7857_s15 + $0x68] ss:$16 sps:$4 sm:$0xff]  }
 0x803   : > { %5776 = vrot.lane.b32.xlu1 %v5775_v39, %s7923_s26  ;;  %v5873_v39 = vld [vmem:[%s7857_s15 + $0x84] ss:$16 sps:$4 sm:$0xff]  }
 0x807   : > { %5781 = vrot.lane.b32.xlu1 %v5780_v37, %s7923_s26  ;;  %v5865_v37 = vld [vmem:[%s7857_s15 + $0x60] ss:$16 sps:$4 sm:$0xff]  }
 0x875   : > { %v5777_v40 = vpop.permute.xlu1 %5776 }
 0x876   : > { %v5779_v41 = vunpack.i.h.bf16 %v5777_v40  ;;  %v5778_v42 = vunpack.i.l.bf16 %v5777_v40  ;;  %v5876_v40 = vld [vmem:[%s7857_s15 + $0x8c] ss:$16 sps:$4 sm:$0xff]  }
 0x878   : > { %v1762_v43 = vsel %vm900_vm0, %v1541_v23, %v5778_v42  ;;  %v1763_v44 = vsel %vm900_vm0, %v1544_v25, %v5779_v41  ;;  %v5871_v41 = vld [vmem:[%s7857_s15 + $0x80] ss:$16 sps:$4 sm:$0xff]   ;;  %v5874_v42 = vld [vmem:[%s7857_s15 + $0x88] ss:$16 sps:$4 sm:$0xff]  }
 0x879   : > { %v5782_v45 = vpop.permute.xlu1 %5781  ;;  %v1766_v46 = vpack.c.bf16 %v1763_v44, %v1762_v43  ;;  %v5879_v43 = vld [vmem:[%s7857_s15 + $0xa4] ss:$16 sps:$4 sm:$0xff]   ;;  %v5882_v44 = vld [vmem:[%s7857_s15 + $0xac] ss:$16 sps:$4 sm:$0xff]  }
 0x87a   : > { %v5784_v47 = vunpack.i.h.bf16 %v5782_v45  ;;  %v5783_v48 = vunpack.i.l.bf16 %v5782_v45  ;;  %v5877_v45 = vld [vmem:[%s7857_s15 + $0xa0] ss:$16 sps:$4 sm:$0xff]  }
 0x87b   : > { %5583 = vmatprep.mubr.bf16.mxu0 %v1766_v46  ;;  %v5880_v46 = vld [vmem:[%s7857_s15 + $0xa8] ss:$16 sps:$4 sm:$0xff]  }
 0x87c   : > { %v1765_v49 = vsel %vm900_vm0, %v5550_v24, %v5784_v47  ;;  %v1764_v50 = vsel %vm900_vm0, %v5549_v22, %v5783_v48  ;;  %v5885_v47 = vld [vmem:[%s7857_s15 + $0xc4] ss:$16 sps:$4 sm:$0xff]   ;;  %v5888_v48 = vld [vmem:[%s7857_s15 + $0xcc] ss:$16 sps:$4 sm:$0xff]  }
 0x87d   : > { %v1767_v51 = vpack.c.bf16 %v1765_v49, %v1764_v50  ;;  %v5883_v49 = vld [vmem:[%s7857_s15 + $0xc0] ss:$16 sps:$4 sm:$0xff]   ;;  %v5886_v50 = vld [vmem:[%s7857_s15 + $0xc8] ss:$16 sps:$4 sm:$0xff]  }
 0x87f   : > { %5584 = vmatmul.mubr.bf16.vlgmr.msra.gmra.mrb[16].mxu0 %v1767_v51  ;;  %v5891_v51 = vld [vmem:[%s7857_s15 + $0xe4] ss:$16 sps:$4 sm:$0xff]  }
 0x880   : > { %2263 = vmatprep.mubr.bf16.mxu0 %v6353_v1 }
 0x952   : > { %v5585_v52 = vpop.f32.mrb[16].mxu0 }
 0x953   : > { %v1866_v54 = vpop.f32.mrb[17].mxu0  ;;  %v1883_v7 = vadd.f32 %v5585_v52, %v6631_v14  ;;  %v5849_v14 = vld [vmem:[%s7857_s15 + $0x4] ss:$16 sps:$4 sm:$0xff]   ;;  %v5894_v52 = vld [vmem:[%s7857_s15 + $0xec] ss:$16 sps:$4 sm:$0xff]  }
 0x954   : > { %v1881_v55 = vadd.f32 %v1866_v54, %v6622_v56  ;;  %v5586_v57 = vpop.f32.mrb[18].mxu0  ;;  %2178 = vmatprep.subr.bf16.mxu1 %v5849_v14  ;;  %v5892_v54 = vld [vmem:[%s7857_s15 + $0xe8] ss:$16 sps:$4 sm:$0xff]  }
 0x955   : > { %v1869_v58 = vpop.f32.mrb[19].mxu0  ;;  %v6841_v62 = vadd.f32 %v4940_v53, %v1883_v7  ;;  %v1884_v63 = vadd.f32 %v5586_v57, %v6634_v17  ;;  %v5850_v17 = vld [vmem:[%s7857_s15 + $0x8] ss:$16 sps:$4 sm:$0xff]  }
 0x956   : > { %v6835_v59 = vadd.f32 %v4940_v53, %v1881_v55  ;;  %v1882_v8 = vadd.f32 %v1869_v58, %v6625_v10  ;;  %v5847_v10 = vld [vmem:[%s7857_s15] ss:$16 sps:$4 sm:$0xff]   ;;  %2232 = vmatpush1.bf16.msra.mxu0 %v5850_v17 }
 0x957   : > { %v6846_v56 = vadd.f32 %v4940_v53, %v1884_v63  ;;  %2179 = vmatpush1.bf16.msra.mxu1 %v5847_v10  ;;  %2233 = vmatprep.subr.bf16.mxu0 %v5858_v3 }
 0x958   : > { %v6838_v61 = vadd.f32 %v4940_v53, %v1882_v8  ;;  %1898 = vadd.xlane.f32.xlu0 %v6835_v59  ;;  %2180 = vmatprep.subr.bf16.mxu1 %v5855_v2  ;;  %v5889_v53 = vld [vmem:[%s7857_s15 + $0xe0] ss:$16 sps:$4 sm:$0xff]  }
 0x95a   : > { %1900 = vadd.xlane.f32.xlu1 %v6838_v61  ;;  %2234 = vmatpush1.bf16.msra.mxu0 %v5856_v5  ;;  %v4941_v5 = vld [vmem:[%s7855_s13] ss:$0 sm:$0xff] }
 0x95b   : > { %2181 = vmatpush1.bf16.msra.mxu1 %v5853_v4  ;;  %2235 = vmatprep.subr.bf16.mxu0 %v5864_v29 }
 0x95c   : > { %1902 = vadd.xlane.f32.xlu0 %v6841_v62  ;;  %2182 = vmatprep.subr.bf16.mxu1 %v5861_v28 }
 0x95e   : > { %2236 = vmatpush1.bf16.msra.mxu0 %v5862_v33 }
 0x95f   : > { %2183 = vmatpush1.bf16.msra.mxu1 %v5859_v30  ;;  %2237 = vmatprep.subr.bf16.mxu0 %v5870_v36  ;;  %v5898_v36 = vld [vmem:[%s7859_s17 + $0x80] sm:$0xff]  }
 0x960   : > { %1904 = vadd.xlane.f32.xlu0 %v6846_v56  ;;  %2184 = vmatprep.subr.bf16.mxu1 %v5867_v35  ;;  %v5897_v35 = vld [vmem:[%s7859_s17] sm:$0xff]  }
 0x962   : > { %2238 = vmatpush1.bf16.msra.mxu0 %v5868_v38  ;;  %v5900_v38 = vld [vmem:[%s7859_s17 + $0xc8] sm:$0xff]  }
 0x963   : > { %2185 = vmatpush1.bf16.msra.mxu1 %v5865_v37  ;;  %2239 = vmatprep.subr.bf16.mxu0 %v5876_v40  ;;  %v5899_v37 = vld [vmem:[%s7859_s17 + $0x48] sm:$0xff]  }
 0x964   : > { %2186 = vmatprep.subr.bf16.mxu1 %v5873_v39  ;;  %v5901_v39 = vld [vmem:[%s7859_s17 + $0x8] sm:$0xff]  }
 0x965   : > { %v5902_v40 = vld [vmem:[%s7859_s17 + $0x88] sm:$0xff]  }
 0x966   : > { %2240 = vmatpush1.bf16.msra.mxu0 %v5874_v42  ;;  %v5904_v42 = vld [vmem:[%s7859_s17 + $0xd0] sm:$0xff]  }
 0x967   : > { %2187 = vmatpush1.bf16.msra.mxu1 %v5871_v41  ;;  %2241 = vmatprep.subr.bf16.mxu0 %v5882_v44  ;;  %v5903_v41 = vld [vmem:[%s7859_s17 + $0x50] sm:$0xff]  }
 0x968   : > { %2188 = vmatprep.subr.bf16.mxu1 %v5879_v43  ;;  %v5905_v43 = vld [vmem:[%s7859_s17 + $0x10] sm:$0xff]  }
 0x969   : > { %v5906_v44 = vld [vmem:[%s7859_s17 + $0x90] sm:$0xff]  }
 0x96a   : > { %2242 = vmatpush1.bf16.msra.mxu0 %v5880_v46  ;;  %v5908_v46 = vld [vmem:[%s7859_s17 + $0xd8] sm:$0xff]  }
 0x96b   : > { %2189 = vmatpush1.bf16.msra.mxu1 %v5877_v45  ;;  %2243 = vmatprep.subr.bf16.mxu0 %v5888_v48  ;;  %v5907_v45 = vld [vmem:[%s7859_s17 + $0x58] sm:$0xff]  }
 0x96c   : > { %2190 = vmatprep.subr.bf16.mxu1 %v5885_v47  ;;  %v5909_v47 = vld [vmem:[%s7859_s17 + $0x18] sm:$0xff]  }
 0x96d   : > { %v5910_v48 = vld [vmem:[%s7859_s17 + $0x98] sm:$0xff]  }
 0x96e   : > { %2244 = vmatpush1.bf16.msra.mxu0 %v5886_v50  ;;  %v5912_v50 = vld [vmem:[%s7859_s17 + $0xe0] sm:$0xff]  }
 0x96f   : > { %2191 = vmatpush1.bf16.msra.mxu1 %v5883_v49  ;;  %2245 = vmatprep.subr.bf16.mxu0 %v5894_v52  ;;  %v5911_v49 = vld [vmem:[%s7859_s17 + $0x60] sm:$0xff]  }
 0x970   : > { %2192 = vmatprep.subr.bf16.mxu1 %v5891_v51  ;;  %v5913_v51 = vld [vmem:[%s7859_s17 + $0x20] sm:$0xff]  }
 0x971   : > { %v5914_v52 = vld [vmem:[%s7859_s17 + $0xa0] sm:$0xff]  }
 0x972   : > { %2246 = vmatpush1.bf16.msra.mxu0 %v5892_v54  ;;  %v5916_v54 = vld [vmem:[%s7859_s17 + $0xe8] sm:$0xff]  }
 0x973   : > { %2193 = vmatpush1.bf16.msra.mxu1 %v5889_v53  ;;  %v5915_v53 = vld [vmem:[%s7859_s17 + $0x68] sm:$0xff]  }
 0x9e5   : > { %v1899_v6 = vpop.xlane.xlu0 %1898 }
 0x9e6   : > { %v1906_v9 = vmul.f32 0.0078125, %v1899_v6 }
 0x9e7   : > { %v1901_v11 = vpop.xlane.xlu1 %1900 }
 0x9e8   : > { %v6874_v12 = vsub.f32 %v6835_v59, %v1906_v9  ;;  %v1907_v15 = vmul.f32 0.0078125, %v1901_v11 }
 0x9e9   : > { %v1903_v13 = vpop.xlane.xlu0 %1902 }
 0x9ea   : > { %v6877_v16 = vsub.f32 %v6838_v61, %v1907_v15  ;;  %v1908_v18 = vmul.f32 0.0078125, %v1903_v13  ;;  %v1914_v19 = vmul.f32 %v6874_v12, %v6874_v12 }
 0x9ec   : > { %v6882_v21 = vsub.f32 %v6841_v62, %v1908_v18  ;;  %1918 = vadd.xlane.f32.xlu0 %v1914_v19  ;;  %v1915_v22 = vmul.f32 %v6877_v16, %v6877_v16  ;;  %v4942_v18 = vld [vmem:[%s7856_s14] ss:$0 sm:$0xff] }
 0x9ed   : > { %v1905_v23 = vpop.xlane.xlu0 %1904 }
 0x9ee   : > { %v1909_v24 = vmul.f32 0.0078125, %v1905_v23  ;;  %1920 = vadd.xlane.f32.xlu1 %v1915_v22  ;;  %v1916_v25 = vmul.f32 %v6882_v21, %v6882_v21 }
 0x9f0   : > { %v6889_v26 = vsub.f32 %v6846_v56, %v1909_v24  ;;  %1922 = vadd.xlane.f32.xlu0 %v1916_v25 }
 0x9f2   : > { %v1917_v27 = vmul.f32 %v6889_v26, %v6889_v26 }
 0x9f4   : > { %1924 = vadd.xlane.f32.xlu1 %v1917_v27 }
 0xa79   : > { %v1919_v55 = vpop.xlane.xlu0 %1918 }
 0xa7a   : > { %v1926_v57 = vmul.f32 0.0078125, %v1919_v55  ;;  %v5917_v55 = vld [vmem:[%s7859_s17 + $0x28] sm:$0xff]  }
 0xa7b   : > { %v1921_v58 = vpop.xlane.xlu1 %1920 }
 0xa7c   : > { %v1930_v7 = vadd.f32 1e-05, %v1926_v57  ;;  %v1927_v8 = vmul.f32 0.0078125, %v1921_v58  ;;  %v5918_v57 = vld [vmem:[%s7859_s17 + $0xa8] sm:$0xff]   ;;  %v5919_v58 = vld [vmem:[%s7859_s17 + $0x70] sm:$0xff]  }
 0xa7d   : > { %v1923_v63 = vpop.xlane.xlu0 %1922 }
 0xa7e   : > { %6095 = vrsqrt.f32 %v1930_v7  ;;  %v1931_v10 = vadd.f32 1e-05, %v1927_v8  ;;  %v1928_v14 = vmul.f32 0.0078125, %v1923_v63  ;;  %v5920_v7 = vld [vmem:[%s7859_s17 + $0xf0] sm:$0xff]  }
 0xa7f   : > { %v5921_v8 = vld [vmem:[%s7859_s17 + $0x30] sm:$0xff]  }
 0xa80   : > { %6097 = vrsqrt.f32 %v1931_v10  ;;  %v1932_v17 = vadd.f32 1e-05, %v1928_v14  ;;  %v5922_v63 = vld [vmem:[%s7859_s17 + $0xb0] sm:$0xff]   ;;  %v5923_v10 = vld [vmem:[%s7859_s17 + $0x78] sm:$0xff]  }
 0xa81   : > { %v1925_v0 = vpop.xlane.xlu1 %1924  ;;  %v5924_v14 = vld [vmem:[%s7859_s17 + $0xf8] sm:$0xff]  }
 0xa82   : > { %6099 = vrsqrt.f32 %v1932_v17  ;;  %v1929_v2 = vmul.f32 0.0078125, %v1925_v0  ;;  %v5925_v17 = vld [vmem:[%s7859_s17 + $0x38] sm:$0xff]  }
 0xa83   : > { %v5926_v0 = vld [vmem:[%s7859_s17 + $0xb8] sm:$0xff]  }
 0xa84   : > { %v1933_v3 = vadd.f32 1e-05, %v1929_v2  ;;  %v1996_v2 = vld [vmem:[%s7858_s16] sm:$0xf] }
 0xa86   : > { %6101 = vrsqrt.f32 %v1933_v3  ;;  %v2012_v3 = vsub.s32 3, %v6722_v31 }
 0xa88   : > { %v6096_v4 = vpop.eup %6095 }
 0xa89   : > { %v1938_v6 = vmul.f32 %v6096_v4, %v6874_v12  ;;  %v2001_v4 = vrot.slane %v1996_v2, %v6725_v32 }
 0xa8a   : > { %v6098_v9 = vpop.eup %6097 }
 0xa8b   : > { %v1939_v11 = vmul.f32 %v6098_v9, %v6877_v16  ;;  %v1948_v15 = vmul.f32 %v4941_v5, %v1938_v6  ;;  %v7082_v6 = vrot.slane %v1996_v2, %v6731_v34  ;;  %v7086_v9 = vrot.slane %v1996_v2, %v2012_v3 }
 0xa8c   : > { %v6100_v13 = vpop.eup %6099 }
 0xa8d   : > { %v1949_v19 = vmul.f32 %v4941_v5, %v1939_v11  ;;  %v1958_v22 = vadd.f32 %v4942_v18, %v1948_v15  ;;  %v1940_v24 = vmul.f32 %v6100_v13, %v6882_v21  ;;  %v5895_v21 = vld [vmem:[%s7859_s17 + $0x40] sm:$0xff]  }
 0xa8e   : > { %5348 = vmatprep.subr.bf16.mxu1 %v5895_v21 }
 0xa8f   : > { %v1959_v23 = vadd.f32 %v4942_v18, %v1949_v19  ;;  %v1950_v12 = vmul.f32 %v4941_v5, %v1940_v24 }
 0xa90   : > { %v6102_v25 = vpop.eup %6101 }
 0xa91   : > { %v1962_v27 = vpack.c.bf16 %v1959_v23, %v1958_v22  ;;  %v1941_v28 = vmul.f32 %v6102_v25, %v6889_v26  ;;  %v1960_v30 = vadd.f32 %v4942_v18, %v1950_v12  ;;  %v5896_v26 = vld [vmem:[%s7859_s17 + $0xc0] sm:$0xff]  }
 0xa92   : > { %5376 = vmatprep.subr.bf16.mxu0 %v5896_v26 }
 0xa93   : > { %2211 = vmatmul.mubr.bf16.vlgmr.msra.gmra.mrb[16].mxu1 %v1962_v27  ;;  %2264 = vmatmul.mubr.bf16.vlgmr.msra.gmra.mrb[20].mxu0 %v1962_v27  ;;  %v1951_v29 = vmul.f32 %v4941_v5, %v1941_v28  ;;  %v7079_v5 = vrot.slane %v1996_v2, %v6746_v60 }
 0xa94   : > { %2220 = vmatprep.mubr.bf16.mxu1 %v6353_v1  ;;  %2273 = vmatprep.mubr.bf16.mxu0 %v6353_v1 }
 0xa95   : > { %v1961_v16 = vadd.f32 %v4942_v18, %v1951_v29  ;;  %5349 = vmatpush3.bf16.msra.mxu1 %v5897_v35  ;;  %5377 = vmatpush3.bf16.msra.mxu0 %v5898_v36 }
 0xa96   : > { %5350 = vmatprep.subr.bf16.mxu1 %v5899_v37  ;;  %5378 = vmatprep.subr.bf16.mxu0 %v5900_v38 }
 0xa97   : > { %v1963_v33 = vpack.c.bf16 %v1961_v16, %v1960_v30 }
 0xa99   : > { %5351 = vmatpush3.bf16.msra.mxu1 %v5901_v39  ;;  %5379 = vmatpush3.bf16.msra.mxu0 %v5902_v40 }
 0xa9a   : > { %5352 = vmatprep.subr.bf16.mxu1 %v5903_v41  ;;  %5380 = vmatprep.subr.bf16.mxu0 %v5904_v42 }
 0xa9b   : > { %2221 = vmatmul.mubr.bf16.gmra.mrb[20].mxu1 %v1963_v33  ;;  %2274 = vmatmul.mubr.bf16.gmra.mrb[24].mxu0 %v1963_v33 }
 0xa9d   : > { %5353 = vmatpush3.bf16.msra.mxu1 %v5905_v43  ;;  %5381 = vmatpush3.bf16.msra.mxu0 %v5906_v44 }
 0xa9e   : > { %5354 = vmatprep.subr.bf16.mxu1 %v5907_v45  ;;  %5382 = vmatprep.subr.bf16.mxu0 %v5908_v46 }
 0xaa1   : > { %5355 = vmatpush3.bf16.msra.mxu1 %v5909_v47  ;;  %5383 = vmatpush3.bf16.msra.mxu0 %v5910_v48 }
 0xaa2   : > { %5356 = vmatprep.subr.bf16.mxu1 %v5911_v49  ;;  %5384 = vmatprep.subr.bf16.mxu0 %v5912_v50 }
 0xaa5   : > { %5357 = vmatpush3.bf16.msra.mxu1 %v5913_v51  ;;  %5385 = vmatpush3.bf16.msra.mxu0 %v5914_v52 }
 0xaa6   : > { %5358 = vmatprep.subr.bf16.mxu1 %v5915_v53  ;;  %5386 = vmatprep.subr.bf16.mxu0 %v5916_v54 }
 0xaa9   : > { %5359 = vmatpush3.bf16.msra.mxu1 %v5917_v55  ;;  %5387 = vmatpush3.bf16.msra.mxu0 %v5918_v57 }
 0xaaa   : > { %5360 = vmatprep.subr.bf16.mxu1 %v5919_v58  ;;  %5388 = vmatprep.subr.bf16.mxu0 %v5920_v7 }
 0xaad   : > { %5361 = vmatpush3.bf16.msra.mxu1 %v5921_v8  ;;  %5389 = vmatpush3.bf16.msra.mxu0 %v5922_v63 }
 0xaae   : > { %5362 = vmatprep.subr.bf16.mxu1 %v5923_v10  ;;  %5390 = vmatprep.subr.bf16.mxu0 %v5924_v14 }
 0xab1   : > { %5363 = vmatpush3.bf16.msra.mxu1 %v5925_v17  ;;  %5391 = vmatpush3.bf16.msra.mxu0 %v5926_v0 }
 0xb66   : > { %v2212_v11 = vpop.f32.mrb[16].mxu1  ;;  %v2265_v15 = vpop.f32.mrb[20].mxu0 }
 0xb67   : > { %v7088_v13 = vadd.f32 %v2212_v11, %v2001_v4  ;;  %v7091_v18 = vadd.f32 %v2265_v15, %v7079_v5  ;;  %v2214_v19 = vpop.f32.mrb[17].mxu1  ;;  %v2267_v22 = vpop.f32.mrb[21].mxu0 }
 0xb68   : > { %v7094_v23 = vadd.f32 %v2214_v19, %v7082_v6  ;;  %v7097_v24 = vadd.f32 %v2267_v22, %v7086_v9  ;;  %v2216_v25 = vpop.f32.mrb[18].mxu1  ;;  %v2269_v27 = vpop.f32.mrb[22].mxu0 }
 0xb69   : > { %v4975_v28 = vmul.f32 -1.702, %v7088_v13  ;;  %v4977_v12 = vmul.f32 -1.702, %v7091_v18  ;;  %v7101_v29 = vadd.f32 %v2216_v25, %v2001_v4  ;;  %v7104_v16 = vadd.f32 %v2269_v27, %v7079_v5  ;;  %v2218_v30 = vpop.f32.mrb[19].mxu1  ;;  %v2271_v33 = vpop.f32.mrb[23].mxu0 }
 0xb6a   : > { %v4976_v21 = vmul.f32 -1.702, %v7094_v23  ;;  %v4978_v26 = vmul.f32 -1.702, %v7097_v24  ;;  %v7109_v35 = vadd.f32 %v2218_v30, %v7082_v6  ;;  %v7112_v36 = vadd.f32 %v2271_v33, %v7086_v9 }
 0xb6b   : > { %v2316_v37 = vmul.f32 1.442695, %v4975_v28  ;;  %v2320_v38 = vmul.f32 1.442695, %v4977_v12  ;;  %v4979_v39 = vmul.f32 -1.702, %v7101_v29 }
 0xb6c   : > { %v2318_v40 = vmul.f32 1.442695, %v4976_v21  ;;  %v2322_v41 = vmul.f32 1.442695, %v4978_v26  ;;  %v4981_v42 = vmul.f32 -1.702, %v7104_v16 }
 0xb6d   : > { %6103 = vpow2.f32 %v2316_v37  ;;  %v2324_v43 = vmul.f32 1.442695, %v4979_v39  ;;  %v4980_v44 = vmul.f32 -1.702, %v7109_v35  ;;  %v4982_v45 = vmul.f32 -1.702, %v7112_v36 }
 0xb6e   : > { %6105 = vpow2.f32 %v2320_v38  ;;  %v2328_v46 = vmul.f32 1.442695, %v4981_v42  ;;  %v2222_v47 = vpop.f32.mrb[20].mxu1  ;;  %v2275_v48 = vpop.f32.mrb[24].mxu0 }
 0xb6f   : > { %6107 = vpow2.f32 %v2318_v40  ;;  %v2326_v49 = vmul.f32 1.442695, %v4980_v44  ;;  %v7118_v50 = vadd.f32 %v2222_v47, %v2001_v4  ;;  %v2224_v51 = vpop.f32.mrb[21].mxu1  ;;  %v2277_v52 = vpop.f32.mrb[25].mxu0  ;;  %v2330_v53 = vmul.f32 1.442695, %v4982_v45 }
 0xb70   : > { %6109 = vpow2.f32 %v2322_v41  ;;  %v7121_v54 = vadd.f32 %v2275_v48, %v7079_v5  ;;  %v7124_v55 = vadd.f32 %v2224_v51, %v7082_v6  ;;  %v2226_v57 = vpop.f32.mrb[22].mxu1  ;;  %v2279_v58 = vpop.f32.mrb[26].mxu0  ;;  %v7133_v22 = vadd.f32 %v2277_v52, %v7086_v9 }
 0xb71   : > { %6111 = vpow2.f32 %v2324_v43  ;;  %v4983_v7 = vmul.f32 -1.702, %v7118_v50  ;;  %v7127_v8 = vadd.f32 %v2226_v57, %v2001_v4  ;;  %v2228_v63 = vpop.f32.mrb[23].mxu1  ;;  %v2281_v10 = vpop.f32.mrb[27].mxu0  ;;  %v7137_v38 = vadd.f32 %v2279_v58, %v7079_v5 }
 0xb72   : > { %6113 = vpow2.f32 %v2328_v46  ;;  %v4985_v14 = vmul.f32 -1.702, %v7121_v54  ;;  %v4984_v17 = vmul.f32 -1.702, %v7124_v55  ;;  %v4986_v21 = vmul.f32 -1.702, %v7133_v22 }
 0xb73   : > { %6115 = vpow2.f32 %v2326_v49  ;;  %v2332_v0 = vmul.f32 1.442695, %v4983_v7  ;;  %v4987_v2 = vmul.f32 -1.702, %v7127_v8  ;;  %v7140_v41 = vadd.f32 %v2228_v63, %v7082_v6 }
 0xb74   : > { %6117 = vpow2.f32 %v2330_v53  ;;  %v2336_v11 = vmul.f32 1.442695, %v4985_v14  ;;  %v2334_v15 = vmul.f32 1.442695, %v4984_v17  ;;  %v7143_v44 = vadd.f32 %v2281_v10, %v7086_v9 }
 0xb75   : > { %6119 = vpow2.f32 %v2332_v0  ;;  %v2340_v19 = vmul.f32 1.442695, %v4987_v2  ;;  %v2338_v47 = vmul.f32 1.442695, %v4986_v21  ;;  %v4989_v49 = vmul.f32 -1.702, %v7137_v38 }
 0xb76   : > { %6121 = vpow2.f32 %v2336_v11  ;;  %v4988_v6 = vmul.f32 -1.702, %v7140_v41  ;;  %v4990_v53 = vmul.f32 -1.702, %v7143_v44 }
 0xb77   : > { %v6104_v4 = vpop.eup %6103  ;;  %6123 = vpow2.f32 %v2334_v15  ;;  %v2344_v58 = vmul.f32 1.442695, %v4989_v49 }
 0xb78   : > { %v6106_v25 = vpop.eup %6105  ;;  %v2348_v27 = vadd.f32 1.0, %v6104_v4  ;;  %6125 = vpow2.f32 %v2340_v19  ;;  %v2342_v10 = vmul.f32 1.442695, %v4988_v6  ;;  %v2346_v17 = vmul.f32 1.442695, %v4990_v53 }
 0xb79   : > { %v6108_v28 = vpop.eup %6107  ;;  %v2350_v12 = vadd.f32 1.0, %v6106_v25 }
 0xb7a   : > { %v6110_v30 = vpop.eup %6109  ;;  %6127 = vrcp.f32 %v2348_v27  ;;  %v2349_v33 = vadd.f32 1.0, %v6108_v28 }
 0xb7b   : > { %v6112_v26 = vpop.eup %6111  ;;  %6129 = vrcp.f32 %v2350_v12  ;;  %v2351_v37 = vadd.f32 1.0, %v6110_v30 }
 0xb7c   : > { %v6114_v39 = vpop.eup %6113  ;;  %6131 = vrcp.f32 %v2349_v33  ;;  %v2352_v40 = vadd.f32 1.0, %v6112_v26 }
 0xb7d   : > { %v6116_v42 = vpop.eup %6115  ;;  %6133 = vrcp.f32 %v2351_v37  ;;  %v2354_v43 = vadd.f32 1.0, %v6114_v39 }
 0xb7e   : > { %v6118_v45 = vpop.eup %6117  ;;  %6135 = vrcp.f32 %v2352_v40  ;;  %v2353_v46 = vadd.f32 1.0, %v6116_v42 }
 0xb7f   : > { %v6120_v48 = vpop.eup %6119  ;;  %6137 = vrcp.f32 %v2354_v43  ;;  %v2355_v5 = vadd.f32 1.0, %v6118_v45 }
 0xb80   : > { %6139 = vrcp.f32 %v2353_v46  ;;  %v2356_v51 = vadd.f32 1.0, %v6120_v48  ;;  %v6122_v52 = vpop.eup %6121 }
 0xb81   : > { %6141 = vrcp.f32 %v2355_v5  ;;  %v6124_v57 = vpop.eup %6123  ;;  %v2358_v40 = vadd.f32 1.0, %v6122_v52 }
 0xb82   : > { %6143 = vpow2.f32 %v2338_v47  ;;  %v6126_v9 = vpop.eup %6125  ;;  %v2357_v43 = vadd.f32 1.0, %v6124_v57 }
 0xb83   : > { %6145 = vrcp.f32 %v2356_v51  ;;  %v2360_v63 = vadd.f32 1.0, %v6126_v9 }
 0xb84   : > { %v6128_v7 = vpop.eup %6127 }
 0xb85   : > { %v6130_v14 = vpop.eup %6129  ;;  %6147 = vrcp.f32 %v2360_v63  ;;  %v2396_v19 = vmul.f32 %v6128_v7, %v7088_v13 }
 0xb86   : > { %v6132_v0 = vpop.eup %6131  ;;  %6149 = vpow2.f32 %v2344_v58  ;;  %v2398_v27 = vmul.f32 %v6130_v14, %v7091_v18 }
 0xb87   : > { %v6134_v2 = vpop.eup %6133  ;;  %6151 = vpow2.f32 %v2342_v10  ;;  %v2397_v30 = vmul.f32 %v6132_v0, %v7094_v23 }
 0xb88   : > { %v6136_v11 = vpop.eup %6135  ;;  %6153 = vpow2.f32 %v2346_v17  ;;  %v2399_v37 = vmul.f32 %v6134_v2, %v7097_v24 }
 0xb89   : > { %v6138_v15 = vpop.eup %6137  ;;  %v2400_v4 = vmul.f32 %v6136_v11, %v7101_v29  ;;  %6155 = vrcp.f32 %v2358_v40 }
 0xb8a   : > { %v6140_v25 = vpop.eup %6139  ;;  %v2402_v28 = vmul.f32 %v6138_v15, %v7104_v16  ;;  %6157 = vrcp.f32 %v2357_v43 }
 0xb8b   : > { %v6142_v12 = vpop.eup %6141  ;;  %v2412_v33 = vpack.c.bf16 %v2400_v4, %v2396_v19  ;;  %v2401_v21 = vmul.f32 %v6140_v25, %v7109_v35 }
 0xb8c   : > { %v6144_v26 = vpop.eup %6143  ;;  %v2414_v39 = vpack.c.bf16 %v2402_v28, %v2398_v27  ;;  %v2403_v13 = vmul.f32 %v6142_v12, %v7112_v36  ;;  %v5023_v28 = vld [vmem:[%s7860_s18] ss:$0 sm:$0xff] }
 0xb8d   : > { %v2413_v29 = vpack.c.bf16 %v2401_v21, %v2397_v30  ;;  %v6146_v42 = vpop.eup %6145  ;;  %v2359_v18 = vadd.f32 1.0, %v6144_v26 }
 0xb8e   : > { %v2415_v45 = vpack.c.bf16 %v2403_v13, %v2399_v37  ;;  %v2404_v46 = vmul.f32 %v6146_v42, %v7118_v50 }
 0xb8f   : > { %2708 = vmatprep.mubr.bf16.mxu1 %v2413_v29  ;;  %v6148_v16 = vpop.eup %6147  ;;  %6159 = vrcp.f32 %v2359_v18 }
 0xb90   : > { %2757 = vmatprep.mubr.bf16.mxu0 %v2415_v45  ;;  %2709 = vmatmul.mubr.bf16.vlgmr.msra.gmra.mrb[24].mxu1 %v2412_v33  ;;  %v6150_v23 = vpop.eup %6149  ;;  %v2408_v35 = vmul.f32 %v6148_v16, %v7127_v8 }
 0xb91   : > { %2758 = vmatmul.mubr.bf16.vlgmr.msra.gmra.mrb[28].mxu0 %v2414_v39  ;;  %v6152_v24 = vpop.eup %6151  ;;  %v2362_v36 = vadd.f32 1.0, %v6150_v23 }
 0xb92   : > { %v6154_v47 = vpop.eup %6153  ;;  %v2361_v48 = vadd.f32 1.0, %v6152_v24  ;;  %v2416_v5 = vpack.c.bf16 %v2408_v35, %v2404_v46 }
 0xb93   : > { %6161 = vrcp.f32 %v2362_v36  ;;  %v2363_v49 = vadd.f32 1.0, %v6154_v47  ;;  %v6156_v51 = vpop.eup %6155 }
 0xb94   : > { %6163 = vrcp.f32 %v2361_v48  ;;  %v6158_v6 = vpop.eup %6157  ;;  %v2406_v57 = vmul.f32 %v6156_v51, %v7121_v54  ;;  %v5927_v48 = vld [vmem:[%s7918_s1 + $0xc0] ss:$12 sps:$4 sm:$0xff]  }
 0xb95   : > { %6165 = vrcp.f32 %v2363_v49  ;;  %v2405_v58 = vmul.f32 %v6158_v6, %v7124_v55 }
 0xb99   : > { %v6160_v52 = vpop.eup %6159 }
 0xb9a   : > { %v2407_v63 = vmul.f32 %v6160_v52, %v7133_v22 }
 0xb9d   : > { %v6162_v53 = vpop.eup %6161 }
 0xb9e   : > { %v6164_v50 = vpop.eup %6163  ;;  %v2410_v8 = vmul.f32 %v6162_v53, %v7137_v38 }
 0xb9f   : > { %v6166_v9 = vpop.eup %6165  ;;  %v2409_v7 = vmul.f32 %v6164_v50, %v7140_v41 }
 0xba0   : > { %v2411_v10 = vmul.f32 %v6166_v9, %v7143_v44  ;;  %v2418_v14 = vpack.c.bf16 %v2410_v8, %v2406_v57 }
 0xba1   : > { %v2417_v17 = vpack.c.bf16 %v2409_v7, %v2405_v58 }
 0xba2   : > { %v2419_v0 = vpack.c.bf16 %v2411_v10, %v2407_v63 }
 0xba3   : > { %2716 = vmatprep.mubr.bf16.mxu1 %v2417_v17 }
 0xba4   : > { %2765 = vmatprep.mubr.bf16.mxu0 %v2419_v0  ;;  %2717 = vmatmul.mubr.bf16.gmra.mrb[28].mxu1 %v2416_v5  ;;  %v5929_v5 = vld [vmem:[%s7918_s1 + $0xc4] ss:$12 sps:$4 sm:$0xff]  }
 0xba5   : > { %2766 = vmatmul.mubr.bf16.gmra.mrb[32].mxu0 %v2418_v14  ;;  %3070 = vmatprep.mubr.bf16.mxu1 %v6353_v1 }
 0xba6   : > { %3038 = vmatprep.subr.bf16.mxu1 %v5929_v5 }
 0xba7   : > { %3039 = vmatpush1.bf16.msra.mxu1 %v5927_v48 }
 0xc63   : > { %v5364_v54 = vpop.f32.mrb[24].mxu1 }
 0xc64   : > { %v5392_v38 = vpop.f32.mrb[28].mxu0  ;;  %v5365_v2 = vpop.f32.mrb[25].mxu1 }
 0xc65   : > { %v5366_v11 = vadd.f32 %v5365_v2, %v5364_v54  ;;  %v5393_v55 = vpop.f32.mrb[29].mxu0  ;;  %v5367_v15 = vpop.f32.mrb[26].mxu1  ;;  %v5935_v54 = vld [vmem:[%s7918_s1 + $0xf4] ss:$12 sps:$4 sm:$0xff]   ;;  %v5933_v2 = vld [vmem:[%s7918_s1 + $0xf0] ss:$12 sps:$4 sm:$0xff]  }
 0xc66   : > { %v5394_v41 = vadd.f32 %v5393_v55, %v5392_v38  ;;  %v5395_v19 = vpop.f32.mrb[30].mxu0  ;;  %v5368_v22 = vpop.f32.mrb[27].mxu1  ;;  %v5936_v38 = vld [vmem:[%s7918_s1 + $0xc8] ss:$12 sps:$4 sm:$0xff]   ;;  %v5940_v55 = vld [vmem:[%s7918_s1 + $0xe0] ss:$12 sps:$4 sm:$0xff]  }
 0xc67   : > { %v5369_v4 = vadd.f32 %v5368_v22, %v5367_v15  ;;  %v5396_v44 = vpop.f32.mrb[31].mxu0  ;;  %5587 = vmatprep.subr.bf16.mxu0 %v5936_v38  ;;  %v5937_v15 = vld [vmem:[%s7918_s1 + $0x108] ss:$12 sps:$4 sm:$0xff]   ;;  %v5941_v22 = vld [vmem:[%s7918_s1 + $0x120] ss:$12 sps:$4 sm:$0xff]  }
 0xc68   : > { %v2760_v25 = vadd.f32 %v5394_v41, %v5366_v11  ;;  %v5397_v27 = vadd.f32 %v5396_v44, %v5395_v19  ;;  %5588 = vmatpush3.bf16.msra.mxu0 %v5936_v38  ;;  %v5939_v11 = vld [vmem:[%s7918_s1 + $0x10c] ss:$12 sps:$4 sm:$0xff]   ;;  %v5943_v41 = vld [vmem:[%s7918_s1 + $0x124] ss:$12 sps:$4 sm:$0xff]  }
 0xc69   : > { %5589 = vmatprep.subr.bf16.mxu0 %v5940_v55  ;;  %v5944_v19 = vld [vmem:[%s7918_s1 + $0xf8] ss:$12 sps:$4 sm:$0xff]   ;;  %v5948_v44 = vld [vmem:[%s7918_s1 + $0x110] ss:$12 sps:$4 sm:$0xff]  }
 0xc6a   : > { %v2774_v12 = vadd.f32 %v2760_v25, %v6835_v59  ;;  %v2763_v30 = vadd.f32 %v5397_v27, %v5369_v4  ;;  %v5947_v4 = vld [vmem:[%s7918_s1 + $0x13c] ss:$12 sps:$4 sm:$0xff]   ;;  %v5945_v25 = vld [vmem:[%s7918_s1 + $0x138] ss:$12 sps:$4 sm:$0xff]  }
 0xc6b   : > { %v5949_v27 = vld [vmem:[%s7918_s1 + $0x150] ss:$12 sps:$4 sm:$0xff]   ;;  %v5060_v38 = vld [vmem:[%s7852_s10 + $0x3] sm:$0x7] }
 0xc6c   : > { %v2775_v33 = vadd.f32 %v2763_v30, %v6838_v61  ;;  %v7170_v21 = vadd.f32 %v5023_v28, %v2774_v12  ;;  %5590 = vmatpush3.bf16.msra.mxu0 %v5940_v55  ;;  %v5952_v12 = vld [vmem:[%s7918_s1 + $0x128] ss:$12 sps:$4 sm:$0xff]   ;;  %v5955_v30 = vld [vmem:[%s7918_s1 + $0x16c] ss:$12 sps:$4 sm:$0xff]   ;;  %v2902_v55 = vrot.slane %v5060_v38, %v6731_v34 }
 0xc6d   : > { %5591 = vmatprep.subr.bf16.mxu0 %v5944_v19 }
 0xc6e   : > { %2793 = vadd.xlane.f32.xlu0 %v7170_v21  ;;  %v7173_v26 = vadd.f32 %v5023_v28, %v2775_v33  ;;  %v5956_v33 = vld [vmem:[%s7918_s1 + $0x140] ss:$12 sps:$4 sm:$0xff]  }
 0xc70   : > { %2795 = vadd.xlane.f32.xlu1 %v7173_v26  ;;  %5592 = vmatpush3.bf16.msra.mxu0 %v5944_v19 }
 0xc71   : > { %5593 = vmatprep.subr.bf16.mxu0 %v5948_v44 }
 0xc74   : > { %5594 = vmatpush3.bf16.msra.mxu0 %v5948_v44 }
 0xc75   : > { %5595 = vmatprep.subr.bf16.mxu0 %v5952_v12 }
 0xc77   : > { %v5370_v37 = vpop.f32.mrb[28].mxu1 }
 0xc78   : > { %v5398_v39 = vpop.f32.mrb[32].mxu0  ;;  %v5371_v13 = vpop.f32.mrb[29].mxu1  ;;  %5596 = vmatpush3.bf16.msra.mxu0 %v5952_v12 }
 0xc79   : > { %v5372_v40 = vadd.f32 %v5371_v13, %v5370_v37  ;;  %v5399_v29 = vpop.f32.mrb[33].mxu0  ;;  %v5373_v42 = vpop.f32.mrb[30].mxu1  ;;  %v5953_v37 = vld [vmem:[%s7918_s1 + $0x168] ss:$12 sps:$4 sm:$0xff]   ;;  %5597 = vmatprep.subr.bf16.mxu0 %v5956_v33  ;;  %v5958_v13 = vld [vmem:[%s7918_s1 + $0x170] ss:$12 sps:$4 sm:$0xff]  }
 0xc7a   : > { %v5400_v43 = vadd.f32 %v5399_v29, %v5398_v39  ;;  %v5401_v45 = vpop.f32.mrb[34].mxu0  ;;  %v5374_v59 = vpop.f32.mrb[31].mxu1  ;;  %v5957_v39 = vld [vmem:[%s7918_s1 + $0x158] ss:$12 sps:$4 sm:$0xff]  }
 0xc7b   : > { %v5375_v18 = vadd.f32 %v5374_v59, %v5373_v42  ;;  %v5402_v16 = vpop.f32.mrb[35].mxu0 }
 0xc7c   : > { %v2768_v61 = vadd.f32 %v5400_v43, %v5372_v40  ;;  %v5403_v23 = vadd.f32 %v5402_v16, %v5401_v45  ;;  %5598 = vmatpush3.bf16.msra.mxu0 %v5956_v33  ;;  %v5026_v16 = vld [vmem:[%s7919_s4 + $0x1] ss:$0 sm:$0xff] }
 0xc7d   : > { %5599 = vmatprep.subr.bf16.mxu0 %v5957_v39 }
 0xc7e   : > { %v2776_v46 = vadd.f32 %v2768_v61, %v6841_v62  ;;  %v2771_v35 = vadd.f32 %v5403_v23, %v5375_v18  ;;  %v5932_v62 = vld [vmem:[%s7918_s1 + $0xdc] ss:$12 sps:$4 sm:$0xff]  }
 0xc7f   : > { %3040 = vmatprep.subr.bf16.mxu1 %v5932_v62 }
 0xc80   : > { %v2777_v24 = vadd.f32 %v2771_v35, %v6846_v56  ;;  %v7178_v36 = vadd.f32 %v5023_v28, %v2776_v46  ;;  %v5930_v56 = vld [vmem:[%s7918_s1 + $0xd8] ss:$12 sps:$4 sm:$0xff]   ;;  %5600 = vmatpush3.bf16.msra.mxu0 %v5957_v39 }
 0xc81   : > { %3041 = vmatpush1.bf16.msra.mxu1 %v5930_v56  ;;  %5601 = vmatprep.subr.bf16.mxu0 %v5958_v13 }
 0xc82   : > { %2797 = vadd.xlane.f32.xlu0 %v7178_v36  ;;  %v7181_v47 = vadd.f32 %v5023_v28, %v2777_v24  ;;  %3042 = vmatprep.subr.bf16.mxu1 %v5935_v54  ;;  %v5951_v28 = vld [vmem:[%s7918_s1 + $0x154] ss:$12 sps:$4 sm:$0xff]  }
 0xc83   : > { %v5027_v24 = vld [vmem:[%s7920_s5 + $0x1] ss:$0 sm:$0xff] }
 0xc84   : > { %2799 = vadd.xlane.f32.xlu1 %v7181_v47  ;;  %5602 = vmatpush3.bf16.msra.mxu0 %v5958_v13 }
 0xc85   : > { %3043 = vmatpush1.bf16.msra.mxu1 %v5933_v2  ;;  %v2898_v2 = vrot.slane %v5060_v38, %v6725_v32 }
 0xc86   : > { %3044 = vmatprep.subr.bf16.mxu1 %v5939_v11 }
 0xc89   : > { %3045 = vmatpush1.bf16.msra.mxu1 %v5937_v15 }
 0xc8a   : > { %3046 = vmatprep.subr.bf16.mxu1 %v5943_v41 }
 0xc8d   : > { %3047 = vmatpush1.bf16.msra.mxu1 %v5941_v22 }
 0xc8e   : > { %3048 = vmatprep.subr.bf16.mxu1 %v5947_v4 }
 0xc91   : > { %3049 = vmatpush1.bf16.msra.mxu1 %v5945_v25 }
 0xc92   : > { %3050 = vmatprep.subr.bf16.mxu1 %v5951_v28  ;;  %v2906_v28 = vrot.slane %v5060_v38, %v6746_v60 }
 0xc95   : > { %3051 = vmatpush1.bf16.msra.mxu1 %v5949_v27 }
 0xc96   : > { %3052 = vmatprep.subr.bf16.mxu1 %v5955_v30 }
 0xc99   : > { %3053 = vmatpush1.bf16.msra.mxu1 %v5953_v37 }
 0xcfb   : > { %v2794_v49 = vpop.xlane.xlu0 %2793 }
 0xcfc   : > { %v2801_v51 = vmul.f32 0.0078125, %v2794_v49 }
 0xcfd   : > { %v2796_v6 = vpop.xlane.xlu1 %2795 }
 0xcfe   : > { %v7197_v52 = vsub.f32 %v7170_v21, %v2801_v51  ;;  %v2802_v53 = vmul.f32 0.0078125, %v2796_v6 }
 0xd00   : > { %v7200_v50 = vsub.f32 %v7173_v26, %v2802_v53  ;;  %v2809_v57 = vmul.f32 %v7197_v52, %v7197_v52 }
 0xd02   : > { %2813 = vadd.xlane.f32.xlu0 %v2809_v57  ;;  %v2810_v8 = vmul.f32 %v7200_v50, %v7200_v50 }
 0xd04   : > { %2815 = vadd.xlane.f32.xlu1 %v2810_v8 }
 0xd0f   : > { %v2798_v9 = vpop.xlane.xlu0 %2797 }
 0xd10   : > { %v2803_v58 = vmul.f32 0.0078125, %v2798_v9 }
 0xd11   : > { %v2800_v7 = vpop.xlane.xlu1 %2799 }
 0xd12   : > { %v7207_v63 = vsub.f32 %v7178_v36, %v2803_v58  ;;  %v2804_v10 = vmul.f32 0.0078125, %v2800_v7 }
 0xd14   : > { %v7210_v14 = vsub.f32 %v7181_v47, %v2804_v10  ;;  %v2811_v17 = vmul.f32 %v7207_v63, %v7207_v63 }
 0xd16   : > { %2817 = vadd.xlane.f32.xlu0 %v2811_v17  ;;  %v2812_v0 = vmul.f32 %v7210_v14, %v7210_v14 }
 0xd18   : > { %2819 = vadd.xlane.f32.xlu1 %v2812_v0 }
 0xd8f   : > { %v2814_v40 = vpop.xlane.xlu0 %2813 }
 0xd90   : > { %v2821_v29 = vmul.f32 0.0078125, %v2814_v40 }
 0xd91   : > { %v2816_v42 = vpop.xlane.xlu1 %2815 }
 0xd92   : > { %v2825_v43 = vadd.f32 1e-05, %v2821_v29  ;;  %v2822_v45 = vmul.f32 0.0078125, %v2816_v42 }
 0xd94   : > { %6167 = vrsqrt.f32 %v2825_v43  ;;  %v2826_v59 = vadd.f32 1e-05, %v2822_v45 }
 0xd96   : > { %6169 = vrsqrt.f32 %v2826_v59 }
 0xd9e   : > { %v6168_v18 = vpop.eup %6167 }
 0xd9f   : > { %v2833_v61 = vmul.f32 %v6168_v18, %v7197_v52 }
 0xda0   : > { %v6170_v23 = vpop.eup %6169 }
 0xda1   : > { %v2843_v46 = vmul.f32 %v5026_v16, %v2833_v61  ;;  %v2834_v35 = vmul.f32 %v6170_v23, %v7200_v50 }
 0xda3   : > { %v2844_v48 = vmul.f32 %v5026_v16, %v2834_v35  ;;  %v2818_v5 = vpop.xlane.xlu0 %2817  ;;  %v2853_v56 = vadd.f32 %v5027_v24, %v2843_v46 }
 0xda4   : > { %v2823_v62 = vmul.f32 0.0078125, %v2818_v5 }
 0xda5   : > { %v2854_v49 = vadd.f32 %v5027_v24, %v2844_v48  ;;  %v2820_v51 = vpop.xlane.xlu1 %2819 }
 0xda6   : > { %v2827_v6 = vadd.f32 1e-05, %v2823_v62  ;;  %v2824_v53 = vmul.f32 0.0078125, %v2820_v51 }
 0xda7   : > { %v2857_v57 = vpack.c.bf16 %v2854_v49, %v2853_v56 }
 0xda8   : > { %6171 = vrsqrt.f32 %v2827_v6  ;;  %v2828_v8 = vadd.f32 1e-05, %v2824_v53 }
 0xda9   : > { %3071 = vmatmul.mubr.bf16.vlgmr.msra.gmra.mrb[32].mxu1 %v2857_v57  ;;  %5603 = vmatprep.mubr.bf16.mxu0 %v2857_v57 }
 0xdaa   : > { %3080 = vmatprep.mubr.bf16.mxu1 %v6353_v1  ;;  %6173 = vrsqrt.f32 %v2828_v8 }
 0xdb2   : > { %v6172_v52 = vpop.eup %6171 }
 0xdb3   : > { %v2835_v50 = vmul.f32 %v6172_v52, %v7207_v63  ;;  %v7318_v52 = vld [vmem:[%s6769_s27] sm:$0xff] }
 0xdb4   : > { %v6174_v9 = vpop.eup %6173 }
 0xdb5   : > { %v2836_v58 = vmul.f32 %v6174_v9, %v7210_v14  ;;  %v2845_v7 = vmul.f32 %v5026_v16, %v2835_v50 }
 0xdb7   : > { %v2846_v10 = vmul.f32 %v5026_v16, %v2836_v58  ;;  %v2855_v17 = vadd.f32 %v5027_v24, %v2845_v7  ;;  %v7323_v58 = vld [vmem:[%s6769_s27 + $0x8] sm:$0xff] }
 0xdb9   : > { %v2856_v0 = vadd.f32 %v5027_v24, %v2846_v10  ;;  %v7327_v10 = vld [vmem:[%s6769_s27 + $0x10] sm:$0xff] }
 0xdbb   : > { %v2858_v54 = vpack.c.bf16 %v2856_v0, %v2855_v17 }
 0xdbd   : > { %3081 = vmatmul.mubr.bf16.gmra.mrb[36].mxu1 %v2858_v54  ;;  %5604 = vmatmul.mubr.bf16.vlgmr.msra.gmra.mrb[36].mxu0 %v2858_v54  ;;  %v7332_v54 = vld [vmem:[%s6769_s27 + $0x18] sm:$0xff]  ;;  %s6293_s27 = sshll.u32 %s6358_s0, 4  ;;  %s6294_s27 = int_to_ptr.vmem [resolvable:$false] %s6293_s27 }
 0xdbe   : > { %s6295_s1 = scalar_lea.vmem %s6294_s27, 256  ;;  %p6296_p0 = scmp.lt.s32.totalorder %s4775_s24, %s6294_s27 }
 0xdbf   : > { %p6297_p1 = scmp.lt.s32.totalorder %s6295_s1, %s6289_s6 }
 0xdc1   : > { %p6298_p2 = por %p6297_p1, %p6296_p0 }
 0xdc3   : > { %p6299_p3 = pnand %p6298_p2, %p6292_p13 }
 0xe7c   : > { %v3072_v11 = vpop.f32.mrb[32].mxu1 }
 0xe7d   : > { %v3074_v63 = vpop.f32.mrb[33].mxu1  ;;  %v3073_v41 = vadd.f32 %v3072_v11, %v2898_v2 }
 0xe7e   : > { %v3076_v15 = vpop.f32.mrb[34].mxu1  ;;  %v3075_v22 = vadd.f32 %v3074_v63, %v2902_v55 }
 0xe7f   : > { %v3077_v14 = vadd.f32 %v3076_v15, %v2898_v2  ;;  %v3078_v19 = vpop.f32.mrb[35].mxu1 }
 0xe80   : > { %v3079_v4 = vadd.f32 %v3078_v19, %v2902_v55 }
 0xe81   : > { %v7292_v44 = vpack.c.bf16 %v3077_v14, %v3073_v41 }
 0xe82   : > { %v7294_v25 = vpack.c.bf16 %v3079_v4, %v3075_v22 }
 0xe83   : > { %5611 = vmatprep.mubr.msk.bf16.mxu1 %vm900_vm0, %v7292_v44 }
 0xe84   : > { %5727 = vmatprep.subr.msk.bf16.mxu1 %vm900_vm0, %v7294_v25  ;;  %v3151_v27 = vsel %vm900_vm0, %v7294_v25, 0 }
 0xe85   : > { %5608 = vmatpush3.bf16.xpose.msra.mxu1 %v3151_v27 }
 0xe90   : > { %v3082_v12 = vpop.f32.mrb[36].mxu1  ;;  %v5605_v30 = vpop.f32.mrb[36].mxu0 }
 0xe91   : > { %v3084_v33 = vpop.f32.mrb[37].mxu1  ;;  %v3125_v37 = vpop.f32.mrb[37].mxu0  ;;  %v3083_v40 = vadd.f32 %v3082_v12, %v2898_v2  ;;  %v3134_v29 = vadd.f32 %v5605_v30, %v2906_v28 }
 0xe92   : > { %v3086_v39 = vpop.f32.mrb[38].mxu1  ;;  %v5606_v13 = vpop.f32.mrb[38].mxu0  ;;  %v3085_v18 = vadd.f32 %v3084_v33, %v2902_v55  ;;  %v3126_v16 = vadd.f32 %v3125_v37, %v2906_v28 }
 0xe93   : > { %v3087_v42 = vadd.f32 %v3086_v39, %v2898_v2  ;;  %v3137_v43 = vadd.f32 %v5606_v13, %v2906_v28  ;;  %v3088_v45 = vpop.f32.mrb[39].mxu1  ;;  %v3128_v59 = vpop.f32.mrb[39].mxu0 }
 0xe94   : > { %v3089_v61 = vadd.f32 %v3088_v45, %v2902_v55  ;;  %v3129_v23 = vadd.f32 %v3128_v59, %v2906_v28 }
 0xe95   : > { %v7303_v46 = vpack.c.bf16 %v3087_v42, %v3083_v40  ;;  %v7305_v35 = vpack.c.bf16 %v3137_v43, %v3134_v29 }
 0xe96   : > { %v3143_v24 = vpack.c.bf16 %v3089_v61, %v3085_v18  ;;  %v7307_v48 = vpack.c.bf16 %v3129_v23, %v3126_v16 }
 0xe98   : > { %5728 = vmatprep.subr.msk.bf16.mxu1 %vm900_vm0, %v3143_v24  ;;  %v3154_v5 = vsel %vm900_vm0, %v3143_v24, 0 }
 0xe99   : > { %5610 = vmatpush3.bf16.xpose.msra.mxu1 %v3154_v5 }
 0xe9a   : > { %5615 = vmatprep.subr.bf16.mxu1 %v7307_v48 }
 0xea0   : > { %5612 = vmatmul.mubr.msk.bf16.vlgmr.msra.gmra.mrb[40].mxu1 %vm900_vm0, %v7303_v46 }
 0xea1   : > { %5616 = vmatpush3.bf16.msra.mxu1 %v7307_v48 }
 0xea2   : > { %5617 = vmatprep.subr.bf16.mxu1 %v7305_v35 }
 0xea5   : > { %5618 = vmatpush3.bf16.msra.mxu1 %v7305_v35 }
 0xf73   : > { %v5613_v62 = vpop.f32.mrb[40].mxu1 }
 0xf74   : > { %v3190_v56 = vpop.f32.mrb[41].mxu1  ;;  %v3207_v49 = vmul.f32 0.125, %v5613_v62 }
 0xf75   : > { %v3205_v51 = vmul.f32 0.125, %v3190_v56  ;;  %v5614_v6 = vpop.f32.mrb[42].mxu1 }
 0xf76   : > { %v3193_v53 = vpop.f32.mrb[43].mxu1  ;;  %v3208_v57 = vmul.f32 0.125, %v5614_v6  ;;  %v3211_v17 = vadd.f32 %v7327_v10, %v3207_v49 }
 0xf77   : > { %v3206_v8 = vmul.f32 0.125, %v3193_v53  ;;  %v3209_v50 = vadd.f32 %v7318_v52, %v3205_v51 }
 0xf78   : > { %v3212_v38 = vadd.f32 %v7332_v54, %v3208_v57  ;;  %v3219_v2 = vsel %vm1452_vm1, %v3211_v17, -inf }
 0xf79   : > { %v3213_v9 = vsel %vm1452_vm1, %v3209_v50, -inf  ;;  %v3210_v7 = vadd.f32 %v7323_v58, %v3206_v8 }
 0xf7a   : > { %3214 = vmax.xlane.f32.xlu0 %v3213_v9  ;;  %v3222_v11 = vsel %vm1452_vm1, %v3212_v38, -inf }
 0xf7b   : > { %v3216_v0 = vsel %vm1452_vm1, %v3210_v7, -inf }
 0xf7c   : > { %3217 = vmax.xlane.f32.xlu1 %v3216_v0 }
 0xf7e   : > { %3220 = vmax.xlane.f32.xlu0 %v3219_v2 }
 0xf80   : > { %3223 = vmax.xlane.f32.xlu1 %v3222_v11 }
0x1007   : > { %v3215_v55 = vpop.xlane.xlu0 %3214 }
0x1008   : > { %v3225_v63 = vsub.f32 %v3209_v50, %v3215_v55 }
0x1009   : > { %v3218_v15 = vpop.xlane.xlu1 %3217 }
0x100a   : > { %v3226_v41 = vsub.f32 %v3210_v7, %v3218_v15  ;;  %v3229_v4 = vmul.f32 1.442695, %v3225_v63 }
0x100b   : > { %v3221_v14 = vpop.xlane.xlu0 %3220 }
0x100c   : > { %v3231_v19 = vmul.f32 1.442695, %v3226_v41  ;;  %v3227_v22 = vsub.f32 %v3211_v17, %v3221_v14 }
0x100d   : > { %v3224_v27 = vpop.xlane.xlu1 %3223 }
0x100e   : > { %6175 = vpow2.f32 %v3231_v19  ;;  %v3233_v28 = vmul.f32 1.442695, %v3227_v22  ;;  %v3228_v12 = vsub.f32 %v3212_v38, %v3224_v27 }
0x1010   : > { %6177 = vpow2.f32 %v3233_v28  ;;  %v3235_v30 = vmul.f32 1.442695, %v3228_v12 }
0x1011   : > { %6179 = vpow2.f32 %v3229_v4 }
0x1012   : > { %6181 = vpow2.f32 %v3235_v30 }
0x1018   : > { %v6176_v33 = vpop.eup %6175 }
0x1019   : > { %v3240_v37 = vsel %vm1452_vm1, %v6176_v33, 0.0 }
0x101a   : > { %v6178_v39 = vpop.eup %6177  ;;  %3241 = vadd.xlane.f32.xlu1 %v3240_v37 }
0x101b   : > { %v6180_v13 = vpop.eup %6179  ;;  %v3243_v40 = vsel %vm1452_vm1, %v6178_v39, 0.0 }
0x101c   : > { %v6182_v29 = vpop.eup %6181  ;;  %3244 = vadd.xlane.f32.xlu0 %v3243_v40  ;;  %v3237_v43 = vsel %vm1452_vm1, %v6180_v13, 0.0 }
0x101d   : > { %v3246_v42 = vsel %vm1452_vm1, %v6182_v29, 0.0 }
0x101e   : > { %3247 = vadd.xlane.f32.xlu1 %v3246_v42 }
0x1020   : > { %3238 = vadd.xlane.f32.xlu0 %v3237_v43 }
0x102f   : > { %3326 = vrot.lane.b32.xlu1 %v3143_v24, %s7923_s26 }
0x1033   : > { %3318 = vrot.lane.b32.xlu1 %v7292_v44, %s7923_s26 }
0x1036   : > { %3324 = vrot.lane.b32.xlu0 %v7294_v25, %s7923_s26 }
0x1037   : > { %3320 = vrot.lane.b32.xlu1 %v7303_v46, %s7923_s26 }
0x10a7   : > { %v3242_v45 = vpop.xlane.xlu1 %3241 }
0x10a8   : > { %6183 = vrcp.f32 %v3242_v45 }
0x10a9   : > { %v3245_v59 = vpop.xlane.xlu0 %3244 }
0x10ab   : > { %v3248_v18 = vpop.xlane.xlu1 %3247 }
0x10ac   : > { %6185 = vrcp.f32 %v3248_v18 }
0x10ad   : > { %6187 = vrcp.f32 %v3245_v59  ;;  %v3239_v16 = vpop.xlane.xlu0 %3238 }
0x10ae   : > { %6189 = vrcp.f32 %v3239_v16 }
0x10af   : > { %v3327_v25 = vpop.permute.xlu1 %3326 }
0x10b0   : > { %v3338_v8 = vsel %vm900_vm0, %v3327_v25, 0 }
0x10b1   : > { %v3325_v61 = vpop.permute.xlu0 %3324 }
0x10b2   : > { %5729 = vmatprep.subr.msk.bf16.mxu1 %vm900_vm0, %v3325_v61  ;;  %v6184_v23 = vpop.eup %6183  ;;  %v3335_v53 = vsel %vm900_vm0, %v3325_v61, 0 }
0x10b3   : > { %v3254_v49 = vmul.f32 %v6184_v23, %v6176_v33  ;;  %v3319_v57 = vpop.permute.xlu1 %3318 }
0x10b6   : > { %v6186_v24 = vpop.eup %6185 }
0x10b7   : > { %v6188_v44 = vpop.eup %6187  ;;  %v3256_v62 = vmul.f32 %v6186_v24, %v6182_v29  ;;  %v3321_v50 = vpop.permute.xlu1 %3320 }
0x10b8   : > { %v6190_v5 = vpop.eup %6189  ;;  %v3255_v46 = vmul.f32 %v6188_v44, %v6178_v39 }
0x10b9   : > { %v3253_v56 = vmul.f32 %v6190_v5, %v6180_v13 }
0x10ba   : > { %v3258_v6 = vpack.c.bf16 %v3256_v62, %v3255_v46 }
0x10bb   : > { %v3257_v51 = vpack.c.bf16 %v3254_v49, %v3253_v56 }
0x10bd   : > { %5619 = vmatprep.mubr.msk.bf16.mxu1 %vm1452_vm1, %v3257_v51 }
0x10be   : > { %5620 = vmatmul.mubr.msk.bf16.vlgmr.msra.gmra.mrb[44].mxu1 %vm1452_vm1, %v3258_v6 }
0x10bf   : > { %5624 = vmatpush3.bf16.xpose.msra.mxu1 %v3335_v53  ;;  %5627 = vmatprep.mubr.msk.bf16.mxu1 %vm900_vm0, %v3319_v57 }
0x10c0   : > { %5730 = vmatprep.subr.msk.bf16.mxu1 %vm900_vm0, %v3327_v25 }
0x10c7   : > { %5626 = vmatpush3.bf16.xpose.msra.mxu1 %v3338_v8 }
0x10ce   : > { %5628 = vmatmul.mubr.msk.bf16.vlgmr.msra.gmra.mrb[48].mxu1 %vm900_vm0, %v3321_v50 }
0x10cf   : > { %3976 = vmatprep.mubr.bf16.mxu1 %v6353_v1 }
0x1191   : > { %v7357_v9 = vpop.f32.mrb[44].mxu1 }
0x1192   : > { %v7359_v7 = vpop.f32.mrb[45].mxu1 }
0x1193   : > { %v7361_v17 = vpop.f32.mrb[46].mxu1 }
0x1194   : > { %v7363_v0 = vpop.f32.mrb[47].mxu1 }
0x11a1   : > { %v5629_v38 = vpop.f32.mrb[48].mxu1 }
0x11a2   : > { %v3374_v2 = vpop.f32.mrb[49].mxu1  ;;  %v3391_v11 = vmul.f32 0.125, %v5629_v38 }
0x11a3   : > { %v3389_v55 = vmul.f32 0.125, %v3374_v2  ;;  %v5630_v63 = vpop.f32.mrb[50].mxu1 }
0x11a4   : > { %v3377_v15 = vpop.f32.mrb[51].mxu1  ;;  %v3392_v19 = vmul.f32 0.125, %v5630_v63  ;;  %v3395_v27 = vadd.f32 %v7327_v10, %v3391_v11  ;;  %v5960_v63 = vld [vmem:[%s7853_s11 + $0x48] sm:$0xff]  }
0x11a5   : > { %v3390_v41 = vmul.f32 0.125, %v3377_v15  ;;  %v3393_v14 = vadd.f32 %v7318_v52, %v3389_v55  ;;  %v5959_v55 = vld [vmem:[%s7853_s11 + $0x40] sm:$0xff]   ;;  %v5961_v15 = vld [vmem:[%s7853_s11 + $0x50] sm:$0xff]  }
0x11a6   : > { %v3403_v12 = vsel %vm1452_vm1, %v3395_v27, -inf  ;;  %v3396_v30 = vadd.f32 %v7332_v54, %v3392_v19  ;;  %v5964_v19 = vld [vmem:[%s7853_s11 + $0x68] sm:$0xff]  }
0x11a7   : > { %v3397_v22 = vsel %vm1452_vm1, %v3393_v14, -inf  ;;  %v3394_v4 = vadd.f32 %v7323_v58, %v3390_v41  ;;  %v5962_v41 = vld [vmem:[%s7853_s11 + $0x58] sm:$0xff]  }
0x11a8   : > { %3398 = vmax.xlane.f32.xlu0 %v3397_v22  ;;  %v3406_v33 = vsel %vm1452_vm1, %v3396_v30, -inf  ;;  %v5965_v22 = vld [vmem:[%s7853_s11 + $0x70] sm:$0xff]  }
0x11a9   : > { %v3400_v28 = vsel %vm1452_vm1, %v3394_v4, -inf }
0x11aa   : > { %3401 = vmax.xlane.f32.xlu1 %v3400_v28 }
0x11ac   : > { %3404 = vmax.xlane.f32.xlu0 %v3403_v12 }
0x11b0   : > { %3407 = vmax.xlane.f32.xlu0 %v3406_v33 }
0x1235   : > { %v3399_v52 = vpop.xlane.xlu0 %3398 }
0x1236   : > { %v3409_v37 = vsub.f32 %v3393_v14, %v3399_v52  ;;  %v5963_v14 = vld [vmem:[%s7853_s11 + $0x60] sm:$0xff]  }
0x1237   : > { %v3402_v39 = vpop.xlane.xlu1 %3401 }
0x1238   : > { %v3413_v58 = vmul.f32 1.442695, %v3409_v37  ;;  %v3410_v29 = vsub.f32 %v3394_v4, %v3402_v39  ;;  %v5966_v4 = vld [vmem:[%s7853_s11 + $0x78] sm:$0xff]  }
0x1239   : > { %v3405_v13 = vpop.xlane.xlu0 %3404 }
0x123a   : > { %v3411_v40 = vsub.f32 %v3395_v27, %v3405_v13  ;;  %v3415_v45 = vmul.f32 1.442695, %v3410_v29 }
0x123c   : > { %v3417_v10 = vmul.f32 1.442695, %v3411_v40 }
0x123d   : > { %v3408_v42 = vpop.xlane.xlu0 %3407 }
0x123e   : > { %6191 = vpow2.f32 %v3417_v10  ;;  %v3412_v43 = vsub.f32 %v3396_v30, %v3408_v42 }
0x123f   : > { %6193 = vpow2.f32 %v3413_v58 }
0x1240   : > { %v3419_v59 = vmul.f32 1.442695, %v3412_v43 }
0x1242   : > { %6195 = vpow2.f32 %v3419_v59 }
0x1243   : > { %6197 = vpow2.f32 %v3415_v45 }
0x1248   : > { %v6192_v54 = vpop.eup %6191 }
0x1249   : > { %v3427_v18 = vsel %vm1452_vm1, %v6192_v54, 0.0  ;;  %v6194_v16 = vpop.eup %6193 }
0x124a   : > { %3428 = vadd.xlane.f32.xlu0 %v3427_v18  ;;  %v3421_v23 = vsel %vm1452_vm1, %v6194_v16, 0.0 }
0x124c   : > { %v6196_v61 = vpop.eup %6195 }
0x124d   : > { %v3430_v24 = vsel %vm1452_vm1, %v6196_v61, 0.0  ;;  %v6198_v44 = vpop.eup %6197 }
0x124e   : > { %3422 = vadd.xlane.f32.xlu0 %v3421_v23  ;;  %3431 = vadd.xlane.f32.xlu1 %v3430_v24  ;;  %v3424_v5 = vsel %vm1452_vm1, %v6198_v44, 0.0 }
0x1252   : > { %3425 = vadd.xlane.f32.xlu1 %v3424_v5 }
0x1263   : > { %3447 = vrot.lane.b32.xlu1 %v7305_v35, %s7923_s26 }
0x1264   : > { %3445 = vrot.lane.b32.xlu0 %v7307_v48, %s7923_s26 }
0x12d7   : > { %v3429_v62 = vpop.xlane.xlu0 %3428 }
0x12db   : > { %v3423_v25 = vpop.xlane.xlu0 %3422  ;;  %v3432_v56 = vpop.xlane.xlu1 %3431 }
0x12dc   : > { %6199 = vrcp.f32 %v3432_v56  ;;  %v5975_v56 = vld [vmem:[%s7857_s15 + $0x124] ss:$16 sps:$4 sm:$0xff]  }
0x12dd   : > { %6201 = vrcp.f32 %v3423_v25 }
0x12de   : > { %6203 = vrcp.f32 %v3429_v62 }
0x12df   : > { %v3446_v49 = vpop.permute.xlu0 %3445  ;;  %v3426_v46 = vpop.xlane.xlu1 %3425 }
0x12e0   : > { %6205 = vrcp.f32 %v3426_v46  ;;  %5631 = vmatprep.subr.bf16.mxu0 %v3446_v49  ;;  %v5973_v46 = vld [vmem:[%s7857_s15 + $0x120] ss:$16 sps:$4 sm:$0xff]  }
0x12e1   : > { %5632 = vmatpush3.bf16.msra.mxu0 %v3446_v49  ;;  %v5978_v49 = vld [vmem:[%s7857_s15 + $0x12c] ss:$16 sps:$4 sm:$0xff]  }
0x12e3   : > { %v3448_v51 = vpop.permute.xlu1 %3447 }
0x12e4   : > { %5633 = vmatprep.subr.bf16.mxu0 %v3448_v51 }
0x12e5   : > { %5634 = vmatpush3.bf16.msra.mxu0 %v3448_v51  ;;  %v5976_v51 = vld [vmem:[%s7857_s15 + $0x128] ss:$16 sps:$4 sm:$0xff]  }
0x12e6   : > { %v6200_v6 = vpop.eup %6199  ;;  %5639 = vmatprep.subr.bf16.mxu0 %v5959_v55 }
0x12e7   : > { %v6202_v53 = vpop.eup %6201  ;;  %v3440_v8 = vmul.f32 %v6200_v6, %v6196_v61 }
0x12e8   : > { %v6204_v35 = vpop.eup %6203  ;;  %v3437_v48 = vmul.f32 %v6202_v53, %v6194_v16 }
0x12e9   : > { %v3439_v38 = vmul.f32 %v6204_v35, %v6192_v54 }
0x12ea   : > { %v6206_v57 = vpop.eup %6205 }
0x12eb   : > { %v3438_v50 = vmul.f32 %v6206_v57, %v6198_v44  ;;  %v3442_v11 = vpack.c.bf16 %v3440_v8, %v3439_v38 }
0x12ed   : > { %v3441_v2 = vpack.c.bf16 %v3438_v50, %v3437_v48 }
0x12ef   : > { %5635 = vmatprep.mubr.msk.bf16.mxu0 %vm1452_vm1, %v3441_v2 }
0x12f0   : > { %5636 = vmatmul.mubr.msk.bf16.vlgmr.msra.gmra.mrb[40].mxu0 %vm1452_vm1, %v3442_v11 }
0x12f1   : > { %5640 = vmatpush3.bf16.msra.mxu0 %v5959_v55 }
0x12f2   : > { %5641 = vmatprep.subr.bf16.mxu0 %v5960_v63 }
0x12f5   : > { %5642 = vmatpush3.bf16.msra.mxu0 %v5960_v63 }
0x12f6   : > { %5643 = vmatprep.subr.bf16.mxu0 %v5961_v15 }
0x12f9   : > { %5644 = vmatpush3.bf16.msra.mxu0 %v5961_v15  ;;  %v5981_v15 = vld [vmem:[%s7857_s15 + $0x144] ss:$16 sps:$4 sm:$0xff]  }
0x12fa   : > { %5645 = vmatprep.subr.bf16.mxu0 %v5962_v41 }
0x12fd   : > { %5646 = vmatpush3.bf16.msra.mxu0 %v5962_v41  ;;  %v5984_v41 = vld [vmem:[%s7857_s15 + $0x14c] ss:$16 sps:$4 sm:$0xff]  }
0x12fe   : > { %5647 = vmatprep.subr.bf16.mxu0 %v5963_v14 }
0x1301   : > { %5648 = vmatpush3.bf16.msra.mxu0 %v5963_v14  ;;  %v5979_v14 = vld [vmem:[%s7857_s15 + $0x140] ss:$16 sps:$4 sm:$0xff]  }
0x1302   : > { %5649 = vmatprep.subr.bf16.mxu0 %v5964_v19 }
0x1305   : > { %5650 = vmatpush3.bf16.msra.mxu0 %v5964_v19  ;;  %v5982_v19 = vld [vmem:[%s7857_s15 + $0x148] ss:$16 sps:$4 sm:$0xff]  }
0x1306   : > { %5651 = vmatprep.subr.bf16.mxu0 %v5965_v22 }
0x1309   : > { %5652 = vmatpush3.bf16.msra.mxu0 %v5965_v22  ;;  %v5987_v22 = vld [vmem:[%s7857_s15 + $0x164] ss:$16 sps:$4 sm:$0xff]  }
0x130a   : > { %5653 = vmatprep.subr.bf16.mxu0 %v5966_v4 }
0x130d   : > { %5654 = vmatpush3.bf16.msra.mxu0 %v5966_v4  ;;  %v5990_v4 = vld [vmem:[%s7857_s15 + $0x16c] ss:$16 sps:$4 sm:$0xff]  }
0x13c3   : > { %v5637_v27 = vpop.f32.mrb[40].mxu0 }
0x13c4   : > { %v3491_v28 = vpop.f32.mrb[41].mxu0 }
0x13c5   : > { %v5638_v12 = vpop.f32.mrb[42].mxu0 }
0x13c6   : > { %v5790_v30 = vpack.i.bf16 %v5638_v12, %v5637_v27  ;;  %v3494_v33 = vpop.f32.mrb[43].mxu0  ;;  %v5985_v27 = vld [vmem:[%s7857_s15 + $0x160] ss:$16 sps:$4 sm:$0xff]   ;;  %v5993_v12 = vld [vmem:[%s7857_s15 + $0x184] ss:$16 sps:$4 sm:$0xff]  }
0x13c7   : > { %v5785_v52 = vpack.i.bf16 %v3494_v33, %v3491_v28  ;;  %v5988_v28 = vld [vmem:[%s7857_s15 + $0x168] ss:$16 sps:$4 sm:$0xff]   ;;  %v5991_v33 = vld [vmem:[%s7857_s15 + $0x180] ss:$16 sps:$4 sm:$0xff]  }
0x13c9   : > { %5786 = vrot.lane.b32.xlu1 %v5785_v52, %s7923_s26  ;;  %v5994_v52 = vld [vmem:[%s7857_s15 + $0x188] ss:$16 sps:$4 sm:$0xff]  }
0x13cd   : > { %5791 = vrot.lane.b32.xlu1 %v5790_v30, %s7923_s26  ;;  %v5996_v30 = vld [vmem:[%s7857_s15 + $0x18c] ss:$16 sps:$4 sm:$0xff]  }
0x143b   : > { %v5787_v37 = vpop.permute.xlu1 %5786 }
0x143c   : > { %v5789_v39 = vunpack.i.h.bf16 %v5787_v37  ;;  %v5788_v13 = vunpack.i.l.bf16 %v5787_v37  ;;  %v5999_v37 = vld [vmem:[%s7857_s15 + $0x1a4] ss:$16 sps:$4 sm:$0xff]  }
0x143e   : > { %v3522_v40 = vsel %vm900_vm0, %v7359_v7, %v5788_v13  ;;  %v3523_v58 = vsel %vm900_vm0, %v7363_v0, %v5789_v39  ;;  %v5118_v7 = vld [vmem:[%s7854_s12 + $0x1] ss:$0 sm:$0xff]  ;;  %v6002_v39 = vld [vmem:[%s7857_s15 + $0x1ac] ss:$16 sps:$4 sm:$0xff]  }
0x143f   : > { %v5792_v29 = vpop.permute.xlu1 %5791  ;;  %v3526_v10 = vpack.c.bf16 %v3523_v58, %v3522_v40  ;;  %v5997_v13 = vld [vmem:[%s7857_s15 + $0x1a0] ss:$16 sps:$4 sm:$0xff]   ;;  %v6000_v40 = vld [vmem:[%s7857_s15 + $0x1a8] ss:$16 sps:$4 sm:$0xff]   ;;  %v6005_v58 = vld [vmem:[%s7857_s15 + $0x1c4] ss:$16 sps:$4 sm:$0xff]  }
0x1440   : > { %v5794_v42 = vunpack.i.h.bf16 %v5792_v29  ;;  %v5793_v43 = vunpack.i.l.bf16 %v5792_v29  ;;  %v6008_v29 = vld [vmem:[%s7857_s15 + $0x1cc] ss:$16 sps:$4 sm:$0xff]  }
0x1441   : > { %5655 = vmatprep.mubr.bf16.mxu0 %v3526_v10  ;;  %v6003_v10 = vld [vmem:[%s7857_s15 + $0x1c0] ss:$16 sps:$4 sm:$0xff]  }
0x1442   : > { %v3525_v45 = vsel %vm900_vm0, %v7361_v17, %v5794_v42  ;;  %v3524_v59 = vsel %vm900_vm0, %v7357_v9, %v5793_v43  ;;  %v6006_v42 = vld [vmem:[%s7857_s15 + $0x1c8] ss:$16 sps:$4 sm:$0xff]   ;;  %v6011_v43 = vld [vmem:[%s7857_s15 + $0x1e4] ss:$16 sps:$4 sm:$0xff]  }
0x1443   : > { %v3527_v54 = vpack.c.bf16 %v3525_v45, %v3524_v59  ;;  %v6014_v45 = vld [vmem:[%s7857_s15 + $0x1ec] ss:$16 sps:$4 sm:$0xff]   ;;  %v6009_v59 = vld [vmem:[%s7857_s15 + $0x1e0] ss:$16 sps:$4 sm:$0xff]  }
0x1445   : > { %5656 = vmatmul.mubr.bf16.vlgmr.msra.gmra.mrb[44].mxu0 %v3527_v54  ;;  %v6012_v54 = vld [vmem:[%s7857_s15 + $0x1e8] ss:$16 sps:$4 sm:$0xff]  }
0x1446   : > { %4029 = vmatprep.mubr.bf16.mxu0 %v6353_v1 }
0x1518   : > { %v5657_v18 = vpop.f32.mrb[44].mxu0 }
0x1519   : > { %v3644_v0 = vadd.f32 %v5657_v18, %v7178_v36  ;;  %v3627_v16 = vpop.f32.mrb[45].mxu0  ;;  %v5969_v36 = vld [vmem:[%s7857_s15 + $0x104] ss:$16 sps:$4 sm:$0xff]  }
0x151a   : > { %v3642_v61 = vadd.f32 %v3627_v16, %v7170_v21  ;;  %v5658_v23 = vpop.f32.mrb[46].mxu0  ;;  %v5967_v21 = vld [vmem:[%s7857_s15 + $0x100] ss:$16 sps:$4 sm:$0xff]   ;;  %3944 = vmatprep.subr.bf16.mxu1 %v5969_v36 }
0x151b   : > { %v3630_v24 = vpop.f32.mrb[47].mxu0  ;;  %v7423_v17 = vadd.f32 %v5118_v7, %v3644_v0  ;;  %v3645_v5 = vadd.f32 %v5658_v23, %v7181_v47  ;;  %v5972_v47 = vld [vmem:[%s7857_s15 + $0x10c] ss:$16 sps:$4 sm:$0xff]   ;;  %3945 = vmatpush1.bf16.msra.mxu1 %v5967_v21  ;;  %v7549_v36 = vld [vmem:[%s7855_s13 + $0x1] ss:$0 sm:$0xff] }
0x151c   : > { %v7425_v44 = vadd.f32 %v5118_v7, %v3642_v61  ;;  %v3643_v9 = vadd.f32 %v3630_v24, %v7173_v26  ;;  %v5970_v26 = vld [vmem:[%s7857_s15 + $0x108] ss:$16 sps:$4 sm:$0xff]   ;;  %3997 = vmatprep.subr.bf16.mxu0 %v5972_v47  ;;  %3946 = vmatprep.subr.bf16.mxu1 %v5975_v56 }
0x151d   : > { %v3657_v25 = vadd.f32 %v5118_v7, %v3645_v5  ;;  %3998 = vmatpush1.bf16.msra.mxu0 %v5970_v26 }
0x151e   : > { %3662 = vadd.xlane.f32.xlu0 %v7425_v44  ;;  %v3655_v62 = vadd.f32 %v5118_v7, %v3643_v9  ;;  %3999 = vmatprep.subr.bf16.mxu0 %v5978_v49 }
0x151f   : > { %3947 = vmatpush1.bf16.msra.mxu1 %v5973_v46 }
0x1520   : > { %3664 = vadd.xlane.f32.xlu1 %v3655_v62  ;;  %3948 = vmatprep.subr.bf16.mxu1 %v5981_v15  ;;  %v6026_v15 = vld [vmem:[%s7859_s17 + $0x190] sm:$0xff]  }
0x1521   : > { %4000 = vmatpush1.bf16.msra.mxu0 %v5976_v51 }
0x1522   : > { %4001 = vmatprep.subr.bf16.mxu0 %v5984_v41  ;;  %v6027_v41 = vld [vmem:[%s7859_s17 + $0x158] sm:$0xff]  }
0x1523   : > { %3949 = vmatpush1.bf16.msra.mxu1 %v5979_v14  ;;  %v6028_v14 = vld [vmem:[%s7859_s17 + $0x1d8] sm:$0xff]  }
0x1524   : > { %3668 = vadd.xlane.f32.xlu1 %v3657_v25  ;;  %3950 = vmatprep.subr.bf16.mxu1 %v5987_v22  ;;  %v6030_v22 = vld [vmem:[%s7859_s17 + $0x198] sm:$0xff]  }
0x1525   : > { %4002 = vmatpush1.bf16.msra.mxu0 %v5982_v19  ;;  %v6029_v19 = vld [vmem:[%s7859_s17 + $0x118] sm:$0xff]  }
0x1526   : > { %4003 = vmatprep.subr.bf16.mxu0 %v5990_v4  ;;  %v6031_v4 = vld [vmem:[%s7859_s17 + $0x160] sm:$0xff]  }
0x1527   : > { %3951 = vmatpush1.bf16.msra.mxu1 %v5985_v27  ;;  %v6032_v27 = vld [vmem:[%s7859_s17 + $0x1e0] sm:$0xff]  }
0x1528   : > { %3952 = vmatprep.subr.bf16.mxu1 %v5993_v12  ;;  %v6034_v12 = vld [vmem:[%s7859_s17 + $0x1a0] sm:$0xff]  }
0x1529   : > { %4004 = vmatpush1.bf16.msra.mxu0 %v5988_v28  ;;  %v6033_v28 = vld [vmem:[%s7859_s17 + $0x120] sm:$0xff]  }
0x152a   : > { %4005 = vmatprep.subr.bf16.mxu0 %v5996_v30  ;;  %v6035_v30 = vld [vmem:[%s7859_s17 + $0x168] sm:$0xff]  }
0x152b   : > { %3953 = vmatpush1.bf16.msra.mxu1 %v5991_v33  ;;  %v6036_v33 = vld [vmem:[%s7859_s17 + $0x1e8] sm:$0xff]  }
0x152c   : > { %3954 = vmatprep.subr.bf16.mxu1 %v5999_v37  ;;  %v6038_v37 = vld [vmem:[%s7859_s17 + $0x1a8] sm:$0xff]  }
0x152d   : > { %4006 = vmatpush1.bf16.msra.mxu0 %v5994_v52  ;;  %v6037_v52 = vld [vmem:[%s7859_s17 + $0x128] sm:$0xff]  }
0x152e   : > { %4007 = vmatprep.subr.bf16.mxu0 %v6002_v39 }
0x152f   : > { %3955 = vmatpush1.bf16.msra.mxu1 %v5997_v13  ;;  %v6039_v13 = vld [vmem:[%s7859_s17 + $0x170] sm:$0xff]  }
0x1530   : > { %3956 = vmatprep.subr.bf16.mxu1 %v6005_v58  ;;  %v6041_v58 = vld [vmem:[%s7859_s17 + $0x130] sm:$0xff]  }
0x1531   : > { %4008 = vmatpush1.bf16.msra.mxu0 %v6000_v40  ;;  %v6040_v40 = vld [vmem:[%s7859_s17 + $0x1f0] sm:$0xff]  }
0x1532   : > { %4009 = vmatprep.subr.bf16.mxu0 %v6008_v29  ;;  %v6042_v29 = vld [vmem:[%s7859_s17 + $0x1b0] sm:$0xff]  }
0x1533   : > { %3957 = vmatpush1.bf16.msra.mxu1 %v6003_v10 }
0x1534   : > { %3958 = vmatprep.subr.bf16.mxu1 %v6011_v43  ;;  %v6044_v43 = vld [vmem:[%s7859_s17 + $0x1f8] sm:$0xff]  }
0x1535   : > { %4010 = vmatpush1.bf16.msra.mxu0 %v6006_v42  ;;  %v6043_v42 = vld [vmem:[%s7859_s17 + $0x178] sm:$0xff]  }
0x1536   : > { %4011 = vmatprep.subr.bf16.mxu0 %v6014_v45  ;;  %v6045_v45 = vld [vmem:[%s7859_s17 + $0x138] sm:$0xff]  }
0x1537   : > { %3959 = vmatpush1.bf16.msra.mxu1 %v6009_v59  ;;  %v6046_v59 = vld [vmem:[%s7859_s17 + $0x1b8] sm:$0xff]  }
0x1539   : > { %4012 = vmatpush1.bf16.msra.mxu0 %v6012_v54 }
0x15ab   : > { %v3663_v6 = vpop.xlane.xlu0 %3662 }
0x15ac   : > { %v3670_v53 = vmul.f32 0.0078125, %v3663_v6 }
0x15ad   : > { %v3665_v35 = vpop.xlane.xlu1 %3664 }
0x15ae   : > { %v7455_v57 = vsub.f32 %v7425_v44, %v3670_v53  ;;  %v3671_v8 = vmul.f32 0.0078125, %v3665_v35  ;;  %v6015_v53 = vld [vmem:[%s7859_s17 + $0x140] sm:$0xff]  }
0x15af   : > { %v6016_v35 = vld [vmem:[%s7859_s17 + $0x1c0] sm:$0xff]   ;;  %5440 = vmatprep.subr.bf16.mxu1 %v6015_v53 }
0x15b0   : > { %v7457_v48 = vsub.f32 %v3655_v62, %v3671_v8  ;;  %v3678_v50 = vmul.f32 %v7455_v57, %v7455_v57  ;;  %v6018_v8 = vld [vmem:[%s7859_s17 + $0x180] sm:$0xff]   ;;  %5468 = vmatprep.subr.bf16.mxu0 %v6016_v35 }
0x15b1   : > { %v3669_v38 = vpop.xlane.xlu1 %3668 }
0x15b2   : > { %v3673_v2 = vmul.f32 0.0078125, %v3669_v38  ;;  %3682 = vadd.xlane.f32.xlu0 %v3678_v50  ;;  %v3679_v55 = vmul.f32 %v7457_v48, %v7457_v48  ;;  %v6021_v50 = vld [vmem:[%s7859_s17 + $0x108] sm:$0xff]  }
0x15b3   : > { %v6022_v38 = vld [vmem:[%s7859_s17 + $0x188] sm:$0xff]  }
0x15b4   : > { %v7461_v11 = vsub.f32 %v3657_v25, %v3673_v2  ;;  %v6023_v2 = vld [vmem:[%s7859_s17 + $0x150] sm:$0xff]  }
0x15b6   : > { %3684 = vadd.xlane.f32.xlu0 %v3679_v55  ;;  %v3681_v63 = vmul.f32 %v7461_v11, %v7461_v11  ;;  %v6024_v55 = vld [vmem:[%s7859_s17 + $0x1d0] sm:$0xff]  }
0x15b8   : > { %3688 = vadd.xlane.f32.xlu1 %v3681_v63  ;;  %v6025_v63 = vld [vmem:[%s7859_s17 + $0x110] sm:$0xff]  }
0x15ba   : > { %3666 = vadd.xlane.f32.xlu0 %v7423_v17 }
0x163f   : > { %v3683_v18 = vpop.xlane.xlu0 %3682 }
0x1640   : > { %v3690_v7 = vmul.f32 0.0078125, %v3683_v18 }
0x1642   : > { %v3694_v0 = vadd.f32 1e-05, %v3690_v7 }
0x1643   : > { %v3685_v16 = vpop.xlane.xlu0 %3684 }
0x1644   : > { %6207 = vrsqrt.f32 %v3694_v0  ;;  %v3691_v61 = vmul.f32 0.0078125, %v3685_v16 }
0x1645   : > { %v3689_v39 = vpop.xlane.xlu1 %3688 }
0x1646   : > { %v3695_v23 = vadd.f32 1e-05, %v3691_v61  ;;  %v3693_v10 = vmul.f32 0.0078125, %v3689_v39 }
0x1647   : > { %v3667_v24 = vpop.xlane.xlu0 %3666 }
0x1648   : > { %6209 = vrsqrt.f32 %v3695_v23  ;;  %v3672_v9 = vmul.f32 0.0078125, %v3667_v24  ;;  %v3697_v54 = vadd.f32 1e-05, %v3693_v10 }
0x164a   : > { %v7541_v5 = vsub.f32 %v7423_v17, %v3672_v9  ;;  %v7556_v17 = vld [vmem:[%s7856_s14 + $0x1] ss:$0 sm:$0xff]  ;;  %6211 = vrsqrt.f32 %v3697_v54 }
0x164c   : > { %v3680_v62 = vmul.f32 %v7541_v5, %v7541_v5 }
0x164e   : > { %v6208_v25 = vpop.eup %6207  ;;  %3686 = vadd.xlane.f32.xlu0 %v3680_v62 }
0x164f   : > { %v3702_v21 = vmul.f32 %v6208_v25, %v7455_v57  ;;  %v6017_v57 = vld [vmem:[%s7859_s17 + $0x100] sm:$0xff]  }
0x1651   : > { %v3712_v56 = vmul.f32 %v7549_v36, %v3702_v21 }
0x1652   : > { %v6210_v26 = vpop.eup %6209 }
0x1653   : > { %v3703_v47 = vmul.f32 %v6210_v26, %v7457_v48  ;;  %v3722_v46 = vadd.f32 %v7556_v17, %v3712_v56  ;;  %v6020_v48 = vld [vmem:[%s7859_s17 + $0x1c8] sm:$0xff]  }
0x1654   : > { %v6212_v16 = vpop.eup %6211 }
0x1655   : > { %v3713_v49 = vmul.f32 %v7549_v36, %v3703_v47  ;;  %v3705_v61 = vmul.f32 %v6212_v16, %v7461_v11  ;;  %v5155_v47 = vld [vmem:[%s7858_s16 + $0x4] sm:$0xf] }
0x1656   : > { %v7669_v11 = vrot.slane %v5155_v47, %v6725_v32  ;;  %v7675_v56 = vrot.slane %v5155_v47, %v6731_v34 }
0x1657   : > { %v3723_v51 = vadd.f32 %v7556_v17, %v3713_v49  ;;  %v3715_v9 = vmul.f32 %v7549_v36, %v3705_v61 }
0x1659   : > { %v3726_v6 = vpack.c.bf16 %v3723_v51, %v3722_v46  ;;  %v3725_v21 = vadd.f32 %v7556_v17, %v3715_v9 }
0x165b   : > { %3977 = vmatmul.mubr.bf16.vlgmr.msra.gmra.mrb[52].mxu1 %v3726_v6  ;;  %4030 = vmatmul.mubr.bf16.vlgmr.msra.gmra.mrb[48].mxu0 %v3726_v6 }
0x165c   : > { %3986 = vmatprep.mubr.bf16.mxu1 %v6353_v1  ;;  %4039 = vmatprep.mubr.bf16.mxu0 %v6353_v1  ;;  %v6019_v1 = vld [vmem:[%s7859_s17 + $0x148] sm:$0xff]  }
0x165d   : > { %5441 = vmatpush3.bf16.msra.mxu1 %v6017_v57  ;;  %5469 = vmatpush3.bf16.msra.mxu0 %v6018_v8 }
0x165e   : > { %5442 = vmatprep.subr.bf16.mxu1 %v6019_v1  ;;  %5470 = vmatprep.subr.bf16.mxu0 %v6020_v48 }
0x1661   : > { %5443 = vmatpush3.bf16.msra.mxu1 %v6021_v50  ;;  %5471 = vmatpush3.bf16.msra.mxu0 %v6022_v38 }
0x1662   : > { %5444 = vmatprep.subr.bf16.mxu1 %v6023_v2  ;;  %5472 = vmatprep.subr.bf16.mxu0 %v6024_v55 }
0x1665   : > { %5445 = vmatpush3.bf16.msra.mxu1 %v6025_v63  ;;  %5473 = vmatpush3.bf16.msra.mxu0 %v6026_v15 }
0x1666   : > { %5446 = vmatprep.subr.bf16.mxu1 %v6027_v41  ;;  %5474 = vmatprep.subr.bf16.mxu0 %v6028_v14 }
0x1669   : > { %5447 = vmatpush3.bf16.msra.mxu1 %v6029_v19  ;;  %5475 = vmatpush3.bf16.msra.mxu0 %v6030_v22 }
0x166a   : > { %5448 = vmatprep.subr.bf16.mxu1 %v6031_v4  ;;  %5476 = vmatprep.subr.bf16.mxu0 %v6032_v27 }
0x166d   : > { %5449 = vmatpush3.bf16.msra.mxu1 %v6033_v28  ;;  %5477 = vmatpush3.bf16.msra.mxu0 %v6034_v12 }
0x166e   : > { %5450 = vmatprep.subr.bf16.mxu1 %v6035_v30  ;;  %5478 = vmatprep.subr.bf16.mxu0 %v6036_v33 }
0x1671   : > { %5451 = vmatpush3.bf16.msra.mxu1 %v6037_v52  ;;  %5479 = vmatpush3.bf16.msra.mxu0 %v6038_v37 }
0x1672   : > { %5452 = vmatprep.subr.bf16.mxu1 %v6039_v13  ;;  %5480 = vmatprep.subr.bf16.mxu0 %v6040_v40 }
0x1675   : > { %5453 = vmatpush3.bf16.msra.mxu1 %v6041_v58  ;;  %5481 = vmatpush3.bf16.msra.mxu0 %v6042_v29 }
0x1676   : > { %5454 = vmatprep.subr.bf16.mxu1 %v6043_v42  ;;  %5482 = vmatprep.subr.bf16.mxu0 %v6044_v43 }
0x1679   : > { %5455 = vmatpush3.bf16.msra.mxu1 %v6045_v45  ;;  %5483 = vmatpush3.bf16.msra.mxu0 %v6046_v59 }
0x16db   : > { %v3687_v18 = vpop.xlane.xlu0 %3686 }
0x16dc   : > { %v3692_v7 = vmul.f32 0.0078125, %v3687_v18 }
0x16de   : > { %v3696_v0 = vadd.f32 1e-05, %v3692_v7 }
0x16e0   : > { %6213 = vrsqrt.f32 %v3696_v0 }
0x16ea   : > { %v6214_v23 = vpop.eup %6213 }
0x16eb   : > { %v3704_v24 = vmul.f32 %v6214_v23, %v7541_v5  ;;  %v7672_v5 = vrot.slane %v5155_v47, %v6746_v60 }
0x16ed   : > { %v3714_v62 = vmul.f32 %v7549_v36, %v3704_v24  ;;  %v7679_v36 = vrot.slane %v5155_v47, %v2012_v3 }
0x16ef   : > { %v3724_v25 = vadd.f32 %v7556_v17, %v3714_v62 }
0x16f1   : > { %v3727_v26 = vpack.c.bf16 %v3725_v21, %v3724_v25 }
0x16f3   : > { %3987 = vmatmul.mubr.bf16.gmra.mrb[56].mxu1 %v3727_v26  ;;  %4040 = vmatmul.mubr.bf16.gmra.mrb[52].mxu0 %v3727_v26 }
0x172e   : > { %v3978_v17 = vpop.f32.mrb[52].mxu1  ;;  %v4031_v49 = vpop.f32.mrb[48].mxu0 }
0x172f   : > { %v7682_v46 = vadd.f32 %v3978_v17, %v7669_v11  ;;  %v7685_v51 = vadd.f32 %v4031_v49, %v7672_v5  ;;  %v3980_v32 = vpop.f32.mrb[53].mxu1  ;;  %v4033_v6 = vpop.f32.mrb[49].mxu0 }
0x1730   : > { %v7688_v60 = vadd.f32 %v3980_v32, %v7675_v56  ;;  %v7691_v34 = vadd.f32 %v4033_v6, %v7679_v36  ;;  %v3982_v53 = vpop.f32.mrb[54].mxu1  ;;  %v4035_v31 = vpop.f32.mrb[50].mxu0 }
0x1731   : > { %v5188_v3 = vmul.f32 -1.702, %v7682_v46  ;;  %v5190_v35 = vmul.f32 -1.702, %v7685_v51  ;;  %v3983_v57 = vadd.f32 %v3982_v53, %v7669_v11  ;;  %v4036_v8 = vadd.f32 %v4035_v31, %v7672_v5  ;;  %v3984_v1 = vpop.f32.mrb[55].mxu1  ;;  %v4037_v48 = vpop.f32.mrb[51].mxu0 }
0x1732   : > { %v5189_v50 = vmul.f32 -1.702, %v7688_v60  ;;  %v5191_v38 = vmul.f32 -1.702, %v7691_v34  ;;  %v3985_v2 = vadd.f32 %v3984_v1, %v7675_v56  ;;  %v4038_v55 = vadd.f32 %v4037_v48, %v7679_v36 }
0x1733   : > { %v4082_v63 = vmul.f32 1.442695, %v5188_v3  ;;  %v4086_v15 = vmul.f32 1.442695, %v5190_v35  ;;  %v5192_v41 = vmul.f32 -1.702, %v3983_v57 }
0x1734   : > { %v4084_v14 = vmul.f32 1.442695, %v5189_v50  ;;  %v4088_v19 = vmul.f32 1.442695, %v5191_v38  ;;  %v5194_v22 = vmul.f32 -1.702, %v4036_v8 }
0x1735   : > { %6215 = vpow2.f32 %v4082_v63  ;;  %v4090_v4 = vmul.f32 1.442695, %v5192_v41  ;;  %v5193_v27 = vmul.f32 -1.702, %v3985_v2  ;;  %v5195_v28 = vmul.f32 -1.702, %v4038_v55 }
0x1736   : > { %6217 = vpow2.f32 %v4086_v15  ;;  %v4094_v12 = vmul.f32 1.442695, %v5194_v22 }
0x1737   : > { %6219 = vpow2.f32 %v4084_v14  ;;  %v4092_v30 = vmul.f32 1.442695, %v5193_v27  ;;  %v4096_v33 = vmul.f32 1.442695, %v5195_v28 }
0x1738   : > { %6221 = vpow2.f32 %v4088_v19 }
0x1739   : > { %6223 = vpow2.f32 %v4090_v4 }
0x173a   : > { %6225 = vpow2.f32 %v4094_v12 }
0x173b   : > { %6227 = vpow2.f32 %v4092_v30 }
0x173c   : > { %6229 = vpow2.f32 %v4096_v33 }
0x173f   : > { %v6216_v52 = vpop.eup %6215 }
0x1740   : > { %v6218_v37 = vpop.eup %6217  ;;  %v4114_v39 = vadd.f32 1.0, %v6216_v52 }
0x1741   : > { %v6220_v13 = vpop.eup %6219  ;;  %v4116_v40 = vadd.f32 1.0, %v6218_v37 }
0x1742   : > { %v6222_v58 = vpop.eup %6221  ;;  %6231 = vrcp.f32 %v4114_v39  ;;  %v4115_v29 = vadd.f32 1.0, %v6220_v13 }
0x1743   : > { %v6224_v10 = vpop.eup %6223  ;;  %6233 = vrcp.f32 %v4116_v40  ;;  %v4117_v42 = vadd.f32 1.0, %v6222_v58 }
0x1744   : > { %v6226_v43 = vpop.eup %6225  ;;  %6235 = vrcp.f32 %v4115_v29  ;;  %v4118_v45 = vadd.f32 1.0, %v6224_v10 }
0x1745   : > { %v6228_v59 = vpop.eup %6227  ;;  %6237 = vrcp.f32 %v4117_v42  ;;  %v4120_v54 = vadd.f32 1.0, %v6226_v43 }
0x1746   : > { %v6230_v18 = vpop.eup %6229  ;;  %6239 = vrcp.f32 %v4118_v45  ;;  %v4119_v7 = vadd.f32 1.0, %v6228_v59 }
0x1747   : > { %6241 = vrcp.f32 %v4120_v54  ;;  %v4121_v0 = vadd.f32 1.0, %v6230_v18 }
0x1748   : > { %6243 = vrcp.f32 %v4119_v7 }
0x1749   : > { %6245 = vrcp.f32 %v4121_v0 }
0x174c   : > { %v6232_v16 = vpop.eup %6231 }
0x174d   : > { %v6234_v61 = vpop.eup %6233  ;;  %v4162_v25 = vmul.f32 %v6232_v16, %v7682_v46 }
0x174e   : > { %v6236_v23 = vpop.eup %6235  ;;  %v4164_v47 = vmul.f32 %v6234_v61, %v7685_v51 }
0x174f   : > { %v6238_v24 = vpop.eup %6237  ;;  %v4163_v32 = vmul.f32 %v6236_v23, %v7688_v60 }
0x1750   : > { %v6240_v9 = vpop.eup %6239  ;;  %v4165_v31 = vmul.f32 %v6238_v24, %v7691_v34 }
0x1751   : > { %v6242_v62 = vpop.eup %6241  ;;  %v4166_v21 = vmul.f32 %v6240_v9, %v3983_v57 }
0x1752   : > { %v6244_v26 = vpop.eup %6243  ;;  %v4168_v17 = vmul.f32 %v6242_v62, %v4036_v8 }
0x1753   : > { %v6246_v49 = vpop.eup %6245  ;;  %v4178_v6 = vpack.c.bf16 %v4166_v21, %v4162_v25  ;;  %v4167_v53 = vmul.f32 %v6244_v26, %v3985_v2 }
0x1754   : > { %v4180_v3 = vpack.c.bf16 %v4168_v17, %v4164_v47  ;;  %v4169_v35 = vmul.f32 %v6246_v49, %v4038_v55 }
0x1755   : > { %v4179_v1 = vpack.c.bf16 %v4167_v53, %v4163_v32 }
0x1756   : > { %v4181_v48 = vpack.c.bf16 %v4169_v35, %v4165_v31 }
0x1757   : > { %4475 = vmatprep.mubr.bf16.mxu1 %v4179_v1 }
0x1758   : > { %4521 = vmatprep.mubr.bf16.mxu0 %v4181_v48  ;;  %4476 = vmatmul.mubr.bf16.vlgmr.msra.gmra.mrb[60].mxu1 %v4178_v6 }
0x1759   : > { %4522 = vmatmul.mubr.bf16.vlgmr.msra.gmra.mrb[56].mxu0 %v4180_v3 }
0x17c6   : > { %v3988_v46 = vpop.f32.mrb[56].mxu1  ;;  %v4041_v57 = vpop.f32.mrb[52].mxu0 }
0x17c7   : > { %v7706_v51 = vadd.f32 %v3988_v46, %v7669_v11  ;;  %v7709_v8 = vadd.f32 %v4041_v57, %v7672_v5  ;;  %v3990_v60 = vpop.f32.mrb[57].mxu1  ;;  %v4043_v50 = vpop.f32.mrb[53].mxu0 }
0x17c8   : > { %v7712_v34 = vadd.f32 %v3990_v60, %v7675_v56  ;;  %v7715_v38 = vadd.f32 %v4043_v50, %v7679_v36  ;;  %v3992_v2 = vpop.f32.mrb[58].mxu1  ;;  %v4045_v55 = vpop.f32.mrb[54].mxu0 }
0x17c9   : > { %v5196_v63 = vmul.f32 -1.702, %v7706_v51  ;;  %v5198_v15 = vmul.f32 -1.702, %v7709_v8  ;;  %v3993_v41 = vadd.f32 %v3992_v2, %v7669_v11  ;;  %v4046_v14 = vadd.f32 %v4045_v55, %v7672_v5  ;;  %v3994_v19 = vpop.f32.mrb[59].mxu1  ;;  %v4047_v22 = vpop.f32.mrb[55].mxu0 }
0x17ca   : > { %v5197_v4 = vmul.f32 -1.702, %v7712_v34  ;;  %v5199_v27 = vmul.f32 -1.702, %v7715_v38  ;;  %v3995_v28 = vadd.f32 %v3994_v19, %v7675_v56  ;;  %v4048_v12 = vadd.f32 %v4047_v22, %v7679_v36 }
0x17cb   : > { %v4098_v30 = vmul.f32 1.442695, %v5196_v63  ;;  %v4102_v33 = vmul.f32 1.442695, %v5198_v15  ;;  %v5200_v52 = vmul.f32 -1.702, %v3993_v41 }
0x17cc   : > { %v4100_v37 = vmul.f32 1.442695, %v5197_v4  ;;  %v4104_v39 = vmul.f32 1.442695, %v5199_v27  ;;  %v5202_v13 = vmul.f32 -1.702, %v4046_v14 }
0x17cd   : > { %6247 = vpow2.f32 %v4098_v30  ;;  %v4106_v11 = vmul.f32 1.442695, %v5200_v52  ;;  %v5201_v40 = vmul.f32 -1.702, %v3995_v28  ;;  %v5203_v5 = vmul.f32 -1.702, %v4048_v12 }
0x17ce   : > { %6249 = vpow2.f32 %v4102_v33  ;;  %v4110_v58 = vmul.f32 1.442695, %v5202_v13  ;;  %v4572_v30 = vld [vmem:[%s7863_s21] sm:$0xff]  ;;  %v4573_v33 = vld [vmem:[%s7863_s21 + $0x8] sm:$0xff]  ;;  %v4574_v52 = vld [vmem:[%s7863_s21 + $0x10] sm:$0xff] }
0x17cf   : > { %6251 = vpow2.f32 %v4100_v37  ;;  %v4108_v29 = vmul.f32 1.442695, %v5201_v40  ;;  %v4112_v10 = vmul.f32 1.442695, %v5203_v5  ;;  %v6356_v37 = vmov 0.0|0.0   ;;  %v4577_v40 = vld [vmem:[%s7863_s21 + $0x28] sm:$0xff] }
0x17d0   : > { %6253 = vpow2.f32 %v4104_v39  ;;  %5699 = vmatprep.subr.bf16.mxu1 %v6356_v37  ;;  %v5700_v39 = vpack.c.bf16 %v4573_v33, %v4572_v30 }
0x17d1   : > { %6255 = vpow2.f32 %v4106_v11  ;;  %v4576_v11 = vld [vmem:[%s7863_s21 + $0x20] sm:$0xff] }
0x17d2   : > { %6257 = vpow2.f32 %v4110_v58  ;;  %5701 = vmatpush3.bf16.msra.mxu1 %v5700_v39  ;;  %v5706_v5 = vpack.c.bf16 %v4577_v40, %v4576_v11 }
0x17d3   : > { %6259 = vpow2.f32 %v4108_v29  ;;  %5702 = vmatprep.subr.bf16.mxu1 %v6356_v37 }
0x17d4   : > { %6261 = vpow2.f32 %v4112_v10 }
0x17d7   : > { %v6248_v56 = vpop.eup %6247 }
0x17d8   : > { %v6250_v36 = vpop.eup %6249  ;;  %v4122_v42 = vadd.f32 1.0, %v6248_v56 }
0x17d9   : > { %v6252_v43 = vpop.eup %6251  ;;  %v4124_v45 = vadd.f32 1.0, %v6250_v36 }
0x17da   : > { %v6254_v59 = vpop.eup %6253  ;;  %6263 = vrcp.f32 %v4122_v42  ;;  %v4123_v54 = vadd.f32 1.0, %v6252_v43 }
0x17db   : > { %v6256_v18 = vpop.eup %6255  ;;  %6265 = vrcp.f32 %v4124_v45  ;;  %v4125_v7 = vadd.f32 1.0, %v6254_v59 }
0x17dc   : > { %v6258_v0 = vpop.eup %6257  ;;  %6267 = vrcp.f32 %v4123_v54  ;;  %v4126_v16 = vadd.f32 1.0, %v6256_v18 }
0x17dd   : > { %v6260_v61 = vpop.eup %6259  ;;  %6269 = vrcp.f32 %v4125_v7  ;;  %v4128_v23 = vadd.f32 1.0, %v6258_v0  ;;  %v4578_v0 = vld [vmem:[%s7863_s21 + $0x30] sm:$0xff] }
0x17de   : > { %v6262_v24 = vpop.eup %6261  ;;  %6271 = vrcp.f32 %v4126_v16  ;;  %v4127_v9 = vadd.f32 1.0, %v6260_v61  ;;  %v4579_v16 = vld [vmem:[%s7863_s21 + $0x38] sm:$0xff] }
0x17df   : > { %6273 = vrcp.f32 %v4128_v23  ;;  %v4129_v62 = vadd.f32 1.0, %v6262_v24  ;;  %v5709_v61 = vpack.c.bf16 %v4579_v16, %v4578_v0  ;;  %v4580_v23 = vld [vmem:[%s7863_s21 + $0x40] sm:$0xff]  ;;  %v4581_v24 = vld [vmem:[%s7863_s21 + $0x48] sm:$0xff] }
0x17e0   : > { %6275 = vrcp.f32 %v4127_v9  ;;  %v5712_v9 = vpack.c.bf16 %v4581_v24, %v4580_v23 }
0x17e1   : > { %6277 = vrcp.f32 %v4129_v62  ;;  %v4582_v62 = vld [vmem:[%s7863_s21 + $0x50] sm:$0xff] }
0x17e4   : > { %v6264_v25 = vpop.eup %6263 }
0x17e5   : > { %v6266_v21 = vpop.eup %6265  ;;  %v4170_v32 = vmul.f32 %v6264_v25, %v7706_v51  ;;  %v4583_v25 = vld [vmem:[%s7863_s21 + $0x58] sm:$0xff] }
0x17e6   : > { %v6268_v26 = vpop.eup %6267  ;;  %v4172_v31 = vmul.f32 %v6266_v21, %v7709_v8  ;;  %v5715_v21 = vpack.c.bf16 %v4583_v25, %v4582_v62 }
0x17e7   : > { %v6270_v47 = vpop.eup %6269  ;;  %v4171_v1 = vmul.f32 %v6268_v26, %v7712_v34  ;;  %v4584_v26 = vld [vmem:[%s7863_s21 + $0x60] sm:$0xff] }
0x17e8   : > { %v6272_v17 = vpop.eup %6271  ;;  %v4173_v57 = vmul.f32 %v6270_v47, %v7715_v38  ;;  %v5301_v38 = vld [vmem:[%s7860_s18 + $0x1] ss:$0 sm:$0xff]  ;;  %v4585_v47 = vld [vmem:[%s7863_s21 + $0x68] sm:$0xff] }
0x17e9   : > { %v6274_v49 = vpop.eup %6273  ;;  %v4174_v6 = vmul.f32 %v6272_v17, %v3993_v41  ;;  %v5718_v17 = vpack.c.bf16 %v4585_v47, %v4584_v26 }
0x17ea   : > { %v6276_v53 = vpop.eup %6275  ;;  %v4176_v3 = vmul.f32 %v6274_v49, %v4046_v14  ;;  %v4586_v49 = vld [vmem:[%s7863_s21 + $0x70] sm:$0xff] }
0x17eb   : > { %v6278_v35 = vpop.eup %6277  ;;  %v4175_v48 = vmul.f32 %v6276_v53, %v3995_v28  ;;  %v4182_v46 = vpack.c.bf16 %v4174_v6, %v4170_v32  ;;  %v4587_v32 = vld [vmem:[%s7863_s21 + $0x78] sm:$0xff] }
0x17ec   : > { %v4177_v60 = vmul.f32 %v6278_v35, %v4048_v12  ;;  %v4184_v50 = vpack.c.bf16 %v4176_v3, %v4172_v31  ;;  %v5721_v6 = vpack.c.bf16 %v4587_v32, %v4586_v49 }
0x17ed   : > { %v4183_v2 = vpack.c.bf16 %v4175_v48, %v4171_v1  ;;  %v5302_v1 = vld [vmem:[%s7861_s19] ss:$0 sm:$0xff] }
0x17ee   : > { %v4185_v55 = vpack.c.bf16 %v4177_v60, %v4173_v57 }
0x17ef   : > { %4482 = vmatprep.mubr.bf16.mxu1 %v4183_v2 }
0x17f0   : > { %4528 = vmatprep.mubr.bf16.mxu0 %v4185_v55  ;;  %4483 = vmatmul.mubr.bf16.gmra.mrb[64].mxu1 %v4182_v46  ;;  %v5303_v46 = vld [vmem:[%s7862_s20] ss:$0 sm:$0xff] }
0x17f1   : > { %4529 = vmatmul.mubr.bf16.gmra.mrb[60].mxu0 %v4184_v50  ;;  %5691 = vmatprep.mubr.msk.f32.mxu1 %vm6357_vm2, %v6354_v20 }
0x182b   : > { %v5456_v51 = vpop.f32.mrb[60].mxu1 }
0x182c   : > { %v5484_v63 = vpop.f32.mrb[56].mxu0  ;;  %v5457_v15 = vpop.f32.mrb[61].mxu1 }
0x182d   : > { %v5458_v8 = vadd.f32 %v5457_v15, %v5456_v51  ;;  %v5485_v41 = vpop.f32.mrb[57].mxu0  ;;  %v5459_v14 = vpop.f32.mrb[62].mxu1 }
0x182e   : > { %v5486_v19 = vadd.f32 %v5485_v41, %v5484_v63  ;;  %v5487_v34 = vpop.f32.mrb[58].mxu0  ;;  %v5460_v22 = vpop.f32.mrb[63].mxu1  ;;  %v4674_v63 = vld [vmem:[%s7864_s22] sm:$0xff] }
0x182f   : > { %v5488_v4 = vpop.f32.mrb[59].mxu0 }
0x1830   : > { %v4524_v27 = vadd.f32 %v5486_v19, %v5458_v8 }
0x1832   : > { %v4535_v28 = vadd.f32 %v4524_v27, %v7425_v44  ;;  %v4575_v44 = vld [vmem:[%s7863_s21 + $0x18] sm:$0xff] }
0x1833   : > { %v5703_v13 = vpack.c.bf16 %v4575_v44, %v4574_v52 }
0x1834   : > { %v4544_v12 = vadd.f32 %v5301_v38, %v4535_v28 }
0x1835   : > { %5704 = vmatpush3.bf16.msra.mxu1 %v5703_v13 }
0x1836   : > { %4547 = vadd.xlane.f32.xlu0 %v4544_v12  ;;  %5705 = vmatprep.subr.bf16.mxu1 %v6356_v37 }
0x1839   : > { %5707 = vmatpush3.bf16.msra.mxu1 %v5706_v5 }
0x183a   : > { %5708 = vmatprep.subr.bf16.mxu1 %v6356_v37 }
0x183d   : > { %5710 = vmatpush3.bf16.msra.mxu1 %v5709_v61 }
0x183e   : > { %5711 = vmatprep.subr.bf16.mxu1 %v6356_v37 }
0x1841   : > { %5713 = vmatpush3.bf16.msra.mxu1 %v5712_v9 }
0x1842   : > { %5714 = vmatprep.subr.bf16.mxu1 %v6356_v37 }
0x1845   : > { %5716 = vmatpush3.bf16.msra.mxu1 %v5715_v21 }
0x1846   : > { %5717 = vmatprep.subr.bf16.mxu1 %v6356_v37 }
0x1849   : > { %5719 = vmatpush3.bf16.msra.mxu1 %v5718_v17 }
0x184a   : > { %5720 = vmatprep.subr.bf16.mxu1 %v6356_v37 }
0x184d   : > { %5722 = vmatpush3.bf16.msra.mxu1 %v5721_v6 }
0x184e   : > { %5694 = vmatprep.subr.mxu1 %v6354_v20 }
0x18c3   : > { %v4548_v58 = vpop.xlane.xlu0 %4547  ;;  %v5462_v29 = vpop.f32.mrb[64].mxu1 }
0x18c4   : > { %v4549_v10 = vmul.f32 0.0078125, %v4548_v58  ;;  %v5490_v56 = vpop.f32.mrb[60].mxu0  ;;  %v5463_v36 = vpop.f32.mrb[65].mxu1 }
0x18c5   : > { %v5491_v42 = vpop.f32.mrb[61].mxu0  ;;  %v5465_v43 = vpop.f32.mrb[66].mxu1 }
0x18c6   : > { %v4550_v45 = vsub.f32 %v4544_v12, %v4549_v10  ;;  %v5493_v59 = vpop.f32.mrb[62].mxu0  ;;  %v5466_v54 = vpop.f32.mrb[67].mxu1 }
0x18c7   : > { %v5494_v18 = vpop.f32.mrb[63].mxu0 }
0x18c8   : > { %v4551_v7 = vmul.f32 %v4550_v45, %v4550_v45 }
0x18ca   : > { %4552 = vadd.xlane.f32.xlu1 %v4551_v7 }
0x1957   : > { %v4553_v53 = vpop.xlane.xlu1 %4552 }
0x1958   : > { %v4554_v31 = vmul.f32 0.0078125, %v4553_v53 }
0x195a   : > { %v4555_v3 = vadd.f32 1e-05, %v4554_v31 }
0x195c   : > { %6279 = vrsqrt.f32 %v4555_v3 }
0x1966   : > { %v6280_v35 = vpop.eup %6279 }
0x1967   : > { %v4557_v48 = vmul.f32 %v6280_v35, %v4550_v45 }
0x1969   : > { %v4564_v57 = vmul.f32 %v5302_v1, %v4557_v48 }
0x196b   : > { %v4571_v60 = vadd.f32 %v5303_v46, %v4564_v57 }
0x196d   : > { %5692 = vmatmul.mubr.f32.vlgmr.msra.gmra.mrb[68].mxu1 %v4571_v60 }
0x196e   : > { %5696 = vmatprep.mubr.msk.f32.mxu1 %vm6357_vm2, %v6354_v20  ;;  %5695 = vmatpush3.xpose.msk.msra.mxu1 %vm900_vm0, %v4674_v63 }
0x1a40   : > { %v4654_v50 = vpop.f32.mrb[68].mxu1 }
0x1a41   : > { %v5693_v2 = vpop.f32.mrb[69].mxu1  ;;  %v4659_v55 = vmul.f32 %v4654_v50, %v4654_v50  ;;  %4658 = vst.msk [vmem:[%s774_s29] sm:$0xff] %vm900_vm0, %v4654_v50 }
0x1a43   : > { %v4660_v51 = vsel %vm900_vm0, %v4659_v55, 0.0 }
0x1a44   : > { %4661 = vadd.xlane.f32.xlu0 %v4660_v51 }
0x1ad1   : > { %v4662_v15 = vpop.xlane.xlu0 %4661 }
0x1ad2   : > { %6281 = vrsqrt.f32 %v4662_v15  ;;  %vm4665_vm3 = vcmp.eq.f32.partialorder %v4662_v15, inf  ;;  %v4668_v41 = vand.u32 2147483648, %v4662_v15  ;;  %vm4667_vm4 = vcmp.eq.f32.partialorder %v4662_v15, 0.0 }
0x1adc   : > { %v6282_v20 = vpop.eup %6281 }
0x1add   : > { %v4664_v8 = vmul.f32 %v6282_v20, %v4662_v15 }
0x1adf   : > { %v4666_v14 = vsel %vm4665_vm3, %v4662_v15, %v4664_v8 }
0x1ae0   : > { %v4669_v19 = vsel %vm4667_vm4, %v4668_v41, %v4666_v14 }
0x1ae1   : > { %v4670_v34 = vmax.f32 %v4669_v19, 1e-12 }
0x1ae3   : > { %6283 = vrcp.f32 %v4670_v34 }
0x1aed   : > { %v6284_v22 = vpop.eup %6283 }
0x1aee   : > { %v4673_v4 = vmul.f32 %v6284_v22, %v4654_v50 }
0x1af0   : > { %5697 = vmatmul.mubr.msk.f32.vlgmr.msra.gmra.mrb[70].mxu1 %vm900_vm0, %v4673_v4 }
0x1af1   : > { %6302 = shalt.err (!%p6299_p3)
}
0x1af2   : > { %s6303_s23 = scalar_lea.hbm %s7802_s9, 128  ;;  %s6307_s25 = scalar_lea.hbm %s7925_s8, 256 }
0x1af3   : > { %p6304_p4 = scmp.ne.s32.totalorder %s7802_s9, %s6303_s23  ;;  %p6308_p9 = scmp.lt.u32.totalorder %s7802_s9, %s7925_s8 }
0x1af4   : > { %p6309_p10 = scmp.lt.u32.totalorder %s6307_s25, %s6303_s23  ;;  %p6311_p12 = scmp.lt.u32.totalorder %s6303_s23, %s7802_s9 }
0x1af5   : > { %p6305_p7 = pnand %p6304_p4, %p6530_p5 }
0x1af6   : > { %p6310_p11 = por %p6309_p10, %p6308_p9 }
0x1af7   : > { %p6306_p8 = pneg %p6305_p7 }
0x1af8   : > { %p6312_p13 = por %p6311_p12, %p6310_p11 }
0x1afa   : > { %p6313_p0 = pnand %p6312_p13, %p6306_p8 }
0x1afc   : > { %6316 = shalt.err (!%p6313_p0)
}
0x1afd   : > { %s7926_s1 = sld [smem:[#allocation14_spill]]  ;;  %s4751_s6 = sld [smem:[#allocation3]]  ;;  %vm4754_vm5 = vcmask 64512  }
0x1afe   : > { %5731 = dma.vmem_to_hbm [thread:$0]  (%p6530_p5), %s4775_s24, 128, %s7802_s9, %s4757_s3  }
0x1aff   : > { %s7927_s29 = sld [smem:[#allocation26_spill]] }
0x1b03   : > { %s4881_s0 = sshll.u32 %s7926_s1, 3  ;;  %v4752_v27 = vstv %s4751_s6 }
0x1b05   : > { %s794_s4 = scalar_lea.vmem %s7927_s29, %s4881_s0 }
0x1bc3   : > { %v4747_v38 = vpop.f32.mrb[70].mxu1 }
0x1bc4   : > { %v4753_v28 = vmul.f32 %v4752_v27, %v4747_v38  ;;  %v5698_v12 = vpop.f32.mrb[71].mxu1 }
0x1bc6   : > { %4755 = vst.msk [vmem:[%s794_s4] sm:$0xff] %vm4754_vm5, %v4753_v28 }
0x1bc7 PF: > { %s7928_s23 = sld [smem:[#allocation9_spill]]  ;;  %s7929_s25 = sld [smem:[#allocation7_spill]] }
0x1bcd   : > { %p5737_p1 = scmp.ge.s32.totalorder %s7928_s23, 2  ;;  %s4789_s7 = sand.u32 1, %s7929_s25  }
0x1bce   : > { %s4790_s24 = scalar_lea.sflag [#allocation5], %s4789_s7 }
0x1bcf   : > { %p5734_p5 = pnand %p5737_p1, %p6534_p6 }
0x1bd1   : > { %6334 = dma.done.wait (!%p5734_p5), %s4790_s24, 128  }
0x1bd2   : > { %6336 = vsyncadd (!%p5734_p5), %s4790_s24, 4294967168  ;;  %s7931_s3 = sld [smem:[#allocation10_spill]]  ;;  %s7932_s9 = sld [smem:[#allocation8_spill]] }
0x1bd3   : > { %s7933_s7 = sld [smem:[#allocation11_spill]]  ;;  %s7934_s6 = smov %s6343_s30 }
0x1bd8   : > { %p37_p2 = scmp.ge.s32.totalorder %s7931_s3, 4   ;;  %s7935_s30 = smov %s7932_s9 }
0x1bda   :  { %39 = sbr.rel (!%p37_p2) target bundleno = 17 (0x11), region = 178 }
0x1be1   :  { %4802 = vsyncpa [#allocation5], 1 }
0x1be2   :  { %4804 = vsyncpa [#allocation5 + $0x1], 1 }

</bundles_post_ra>
